<compile_context>
chip_gen: v5e
topology: v5e:2x2
jax: 0.10.0
libtpu: 0.0.40
codegen_flags: <defaults>
</compile_context>

<pallas_src>
import functools

import jax
import jax.numpy as jnp
from jax.experimental import pallas as pl
from jax.experimental.pallas import tpu as pltpu


def _xyz_mlp_kernel(x_ref,
                    w0_ref, b0_ref,
                    w1_ref, b1_ref,
                    w2_ref, b2_ref,
                    w3_ref, b3_ref,
                    wf_ref, bf_ref,
                    o_ref):
    """Fused 4x (Linear+ReLU) + final Linear for one row-tile of points.

    Activations are [tile_m, C] (rows on sublanes, features on lanes).
    Weights are [C_in, C_out] bf16; biases are [1, C_out] f32.
    Matmuls run on the MXU with bf16 operands and f32 accumulation; the
    bias-add is f32, the ReLU runs on the bf16 downcast (cheap on v6e/v7x).
    """
    h = x_ref[...]  # bf16 [tile_m, 64]

    def hidden_layer(h_bf16, w_ref, b_ref):
        acc = jnp.dot(h_bf16, w_ref[...], preferred_element_type=jnp.float32)
        acc = acc + b_ref[...]                      # f32 bias-add
        return jnp.maximum(acc.astype(jnp.bfloat16), 0)   # bf16 ReLU

    h = hidden_layer(h, w0_ref, b0_ref)   # xyz_encoding_0
    h = hidden_layer(h, w1_ref, b1_ref)   # xyz_encoding_1
    h = hidden_layer(h, w2_ref, b2_ref)   # xyz_encoding_2
    h = hidden_layer(h, w3_ref, b3_ref)   # xyz_encoding_3

    # xyz_encoding_final : Linear, no activation. Output keeps its real
    # 8 columns — no lane padding, no excess HBM writeback.
    out = jnp.dot(h, wf_ref[...], preferred_element_type=jnp.float32)
    out = out + bf_ref[...]
    o_ref[...] = out.astype(o_ref.dtype)


def _round_up(v, m):
    return ((v + m - 1) // m) * m


def prepare_params(params, in_channels_xyz=63):
    """One-time layout prep: cast weights to bf16, zero-pad the first layer's
    input rows 63 -> 64 (aligned lane loads).  Biases stay f32, shape [1, C].
    Call once and reuse — keeps the pad/cast ops out of every inference call.
    """
    c_in = in_channels_xyz
    c_in_pad = _round_up(c_in, 64)   # 63 -> 64; do NOT pad to 128 (2x HBM read)
    prepared = {
        "w0": jnp.pad(params["w0"].astype(jnp.bfloat16),
                      ((0, c_in_pad - c_in), (0, 0))),
        "w1": params["w1"].astype(jnp.bfloat16),
        "w2": params["w2"].astype(jnp.bfloat16),
        "w3": params["w3"].astype(jnp.bfloat16),
        "wf": params["wf"].astype(jnp.bfloat16),
        "b0": params["b0"].astype(jnp.float32),
        "b1": params["b1"].astype(jnp.float32),
        "b2": params["b2"].astype(jnp.float32),
        "b3": params["b3"].astype(jnp.float32),
        "bf": params["bf"].astype(jnp.float32),
    }
    return prepared


@functools.partial(jax.jit, static_argnames=("tile_m",))
def xyz_mlp_pallas(x, prepared, tile_m=2048):
    """x: [N, in_channels_xyz] (any N); prepared: output of prepare_params().

    Returns [N, out_channels_xyz] f32 — same semantics as XyzMLP.forward
    (with bf16 MXU operands / f32 accumulation; documented precision change).
    """
    n, c_in = x.shape
    c_in_pad, w = prepared["w0"].shape     # 64, 128
    c_out = prepared["wf"].shape[1]        # 8

    # Effective row tile: multiple of 16 (bf16 sublane pairs); capped at
    # ceil(N/2) so the parallel grid has >= 2 steps (both v7x TensorCores
    # get work).  Shapes are static under jit, so this is trace-time math.
    tile = min(tile_m, max(16, _round_up(-(-n // 2), 16)))
    n_pad = _round_up(n, tile)

    # Only the activation stream is prepared per call (cheap, fused by XLA).
    x_p = jnp.pad(x.astype(jnp.bfloat16),
                  ((0, n_pad - n), (0, c_in_pad - c_in)))

    # Constant-index, resident, single-buffered weight/bias blocks.
    def resident(shape):
        return pl.BlockSpec(shape, lambda i: (0, 0),
                            pipeline_mode=pl.Buffered(1))

    grid_spec = pltpu.PrefetchScalarGridSpec(
        num_scalar_prefetch=0,
        grid=(n_pad // tile,),
        in_specs=[
            pl.BlockSpec((tile, c_in_pad), lambda i: (i, 0)),  # x tile (streamed)
            resident((c_in_pad, w)), resident((1, w)),         # layer 0
            resident((w, w)),        resident((1, w)),         # layer 1
            resident((w, w)),        resident((1, w)),         # layer 2
            resident((w, w)),        resident((1, w)),         # layer 3
            resident((w, c_out)),    resident((1, c_out)),     # final (8 cols)
        ],
        # Last dim (8) equals the full array dim -> legal block shape.
        out_specs=pl.BlockSpec((tile, c_out), lambda i: (i, 0)),
    )

    out_padded = pl.pallas_call(
        _xyz_mlp_kernel,
        out_shape=jax.ShapeDtypeStruct((n_pad, c_out), x.dtype),
        grid_spec=grid_spec,
        compiler_params=pltpu.CompilerParams(
            dimension_semantics=("parallel",)),
        # Default scoped VMEM is ample at tile<=4096 now that the out stream
        # is 8 cols; set vmem_limit_bytes explicitly only if sweeping higher.
    )(x_p,
      prepared["w0"], prepared["b0"],
      prepared["w1"], prepared["b1"],
      prepared["w2"], prepared["b2"],
      prepared["w3"], prepared["b3"],
      prepared["wf"], prepared["bf"])

    return out_padded[:n, :]   # only rows were padded


def init_params(key, d=4, w=128, in_channels_xyz=63, out_channels_xyz=8):
    """Deterministic init mimicking nn.Linear's U(-1/sqrt(fan_in), +1/sqrt(fan_in)).

    Weights stored as [C_in, C_out] (transposed vs. PyTorch)."""
    params = {}
    fan_ins = [in_channels_xyz] + [w] * (d - 1)
    keys = jax.random.split(key, 2 * d + 2)
    for i, fin in enumerate(fan_ins):
        bound = 1.0 / jnp.sqrt(fin)
        params[f"w{i}"] = jax.random.uniform(
            keys[2 * i], (fin, w), jnp.float32, -bound, bound)
        params[f"b{i}"] = jax.random.uniform(
            keys[2 * i + 1], (1, w), jnp.float32, -bound, bound)
    bound = 1.0 / jnp.sqrt(w)
    params["wf"] = jax.random.uniform(
        keys[2 * d], (w, out_channels_xyz), jnp.float32, -bound, bound)
    params["bf"] = jax.random.uniform(
        keys[2 * d + 1], (1, out_channels_xyz), jnp.float32, -bound, bound)
    return params


def xyz_mlp_reference(x, params, d=4):
    """Pure-JAX reference matching the kernel's bf16-operand / f32-accum math."""
    h = x.astype(jnp.bfloat16)
    for i in range(d):
        acc = jnp.dot(h, params[f"w{i}"].astype(jnp.bfloat16),
                      preferred_element_type=jnp.float32) + params[f"b{i}"]
        h = jnp.maximum(acc, 0.0).astype(jnp.bfloat16)
    out = jnp.dot(h, params["wf"].astype(jnp.bfloat16),
                  preferred_element_type=jnp.float32) + params["bf"]
    return out.astype(x.dtype)


if __name__ == "__main__":
    D, W, C_IN, C_OUT = 4, 128, 63, 8
    N = 2048       # batch of xyz-encoded points (small demo size)
    TILE_M = 2048  # effective tile auto-caps to 1024 here -> grid length 2

    key = jax.random.PRNGKey(0)
    kx, kp = jax.random.split(key)
    x = jax.random.normal(kx, (N, C_IN), jnp.float32)
    params = init_params(kp, d=D, w=W,
                         in_channels_xyz=C_IN, out_channels_xyz=C_OUT)
    prepared = prepare_params(params, in_channels_xyz=C_IN)   # once, reused

    out = xyz_mlp_pallas(x, prepared, tile_m=TILE_M)
    out = jax.block_until_ready(out)

    ref = xyz_mlp_reference(x, params, d=D)
    assert out.shape == (N, C_OUT)
    assert jnp.allclose(out, ref, atol=2e-2, rtol=2e-2), "mismatch vs reference"

    print("KERNEL_OK")
</pallas_src>

<mosaic_0001>
module attributes {stable_mosaic.version = 11 : i64} {
  func.func @_xyz_mlp_kernel(%arg0: i32, %arg1: memref<1024x64xbf16, #tpu.memory_space<vmem>>, %arg2: memref<64x128xbf16, #tpu.memory_space<vmem>>, %arg3: memref<1x128xf32, #tpu.memory_space<vmem>>, %arg4: memref<128x128xbf16, #tpu.memory_space<vmem>>, %arg5: memref<1x128xf32, #tpu.memory_space<vmem>>, %arg6: memref<128x128xbf16, #tpu.memory_space<vmem>>, %arg7: memref<1x128xf32, #tpu.memory_space<vmem>>, %arg8: memref<128x128xbf16, #tpu.memory_space<vmem>>, %arg9: memref<1x128xf32, #tpu.memory_space<vmem>>, %arg10: memref<128x8xbf16, #tpu.memory_space<vmem>>, %arg11: memref<1x8xf32, #tpu.memory_space<vmem>>, %arg12: memref<1024x8xf32, #tpu.memory_space<vmem>>) attributes {dimension_semantics = [#tpu.dimension_semantics<parallel>], iteration_bounds = array<i64: 2>, scalar_prefetch = 0 : i64, scratch_operands = 0 : i64, tpu.core_type = #tpu.core_type<tc>, window_params = [{transform_indices = @transform_0, window_bounds = array<i64: 1024, 64>}, {pipeline_mode = #tpu.pipeline_mode<synchronous>, transform_indices = @transform_1, window_bounds = array<i64: 64, 128>}, {pipeline_mode = #tpu.pipeline_mode<synchronous>, transform_indices = @transform_2, window_bounds = array<i64: 1, 128>}, {pipeline_mode = #tpu.pipeline_mode<synchronous>, transform_indices = @transform_3, window_bounds = array<i64: 128, 128>}, {pipeline_mode = #tpu.pipeline_mode<synchronous>, transform_indices = @transform_4, window_bounds = array<i64: 1, 128>}, {pipeline_mode = #tpu.pipeline_mode<synchronous>, transform_indices = @transform_5, window_bounds = array<i64: 128, 128>}, {pipeline_mode = #tpu.pipeline_mode<synchronous>, transform_indices = @transform_6, window_bounds = array<i64: 1, 128>}, {pipeline_mode = #tpu.pipeline_mode<synchronous>, transform_indices = @transform_7, window_bounds = array<i64: 128, 128>}, {pipeline_mode = #tpu.pipeline_mode<synchronous>, transform_indices = @transform_8, window_bounds = array<i64: 1, 128>}, {pipeline_mode = #tpu.pipeline_mode<synchronous>, transform_indices = @transform_9, window_bounds = array<i64: 128, 8>}, {pipeline_mode = #tpu.pipeline_mode<synchronous>, transform_indices = @transform_10, window_bounds = array<i64: 1, 8>}, {transform_indices = @transform_11, window_bounds = array<i64: 1024, 8>}]} {
    %c0 = arith.constant 0 : index
    %c0_0 = arith.constant 0 : index
    %0 = vector.load %arg1[%c0, %c0_0] : memref<1024x64xbf16, #tpu.memory_space<vmem>>, vector<1024x64xbf16>
    %c0_1 = arith.constant 0 : index
    %c0_2 = arith.constant 0 : index
    %1 = vector.load %arg2[%c0_1, %c0_2] : memref<64x128xbf16, #tpu.memory_space<vmem>>, vector<64x128xbf16>
    %cst = arith.constant dense<0.000000e+00> : vector<1024x128xf32>
    %2 = tpu.matmul %0, %1, %cst {dimension_numbers = #tpu.dot_dimension_numbers<[1], [0], [0], [1], [0, 0, 1, 1], [], []>} : vector<1024x64xbf16>, vector<64x128xbf16>, vector<1024x128xf32> -> vector<1024x128xf32>
    %c0_3 = arith.constant 0 : index
    %c0_4 = arith.constant 0 : index
    %3 = vector.load %arg3[%c0_3, %c0_4] : memref<1x128xf32, #tpu.memory_space<vmem>>, vector<1x128xf32>
    %4 = vector.broadcast %3 : vector<1x128xf32> to vector<1024x128xf32>
    %5 = arith.addf %2, %4 : vector<1024x128xf32>
    %6 = arith.truncf %5 : vector<1024x128xf32> to vector<1024x128xbf16>
    %cst_5 = arith.constant 0.000000e+00 : bf16
    %7 = vector.broadcast %cst_5 : bf16 to vector<1024x128xbf16>
    %8 = arith.maximumf %6, %7 : vector<1024x128xbf16>
    %c0_6 = arith.constant 0 : index
    %c0_7 = arith.constant 0 : index
    %9 = vector.load %arg4[%c0_6, %c0_7] : memref<128x128xbf16, #tpu.memory_space<vmem>>, vector<128x128xbf16>
    %cst_8 = arith.constant dense<0.000000e+00> : vector<1024x128xf32>
    %10 = tpu.matmul %8, %9, %cst_8 {dimension_numbers = #tpu.dot_dimension_numbers<[1], [0], [0], [1], [0, 0, 1, 1], [], []>} : vector<1024x128xbf16>, vector<128x128xbf16>, vector<1024x128xf32> -> vector<1024x128xf32>
    %c0_9 = arith.constant 0 : index
    %c0_10 = arith.constant 0 : index
    %11 = vector.load %arg5[%c0_9, %c0_10] : memref<1x128xf32, #tpu.memory_space<vmem>>, vector<1x128xf32>
    %12 = vector.broadcast %11 : vector<1x128xf32> to vector<1024x128xf32>
    %13 = arith.addf %10, %12 : vector<1024x128xf32>
    %14 = arith.truncf %13 : vector<1024x128xf32> to vector<1024x128xbf16>
    %cst_11 = arith.constant 0.000000e+00 : bf16
    %15 = vector.broadcast %cst_11 : bf16 to vector<1024x128xbf16>
    %16 = arith.maximumf %14, %15 : vector<1024x128xbf16>
    %c0_12 = arith.constant 0 : index
    %c0_13 = arith.constant 0 : index
    %17 = vector.load %arg6[%c0_12, %c0_13] : memref<128x128xbf16, #tpu.memory_space<vmem>>, vector<128x128xbf16>
    %cst_14 = arith.constant dense<0.000000e+00> : vector<1024x128xf32>
    %18 = tpu.matmul %16, %17, %cst_14 {dimension_numbers = #tpu.dot_dimension_numbers<[1], [0], [0], [1], [0, 0, 1, 1], [], []>} : vector<1024x128xbf16>, vector<128x128xbf16>, vector<1024x128xf32> -> vector<1024x128xf32>
    %c0_15 = arith.constant 0 : index
    %c0_16 = arith.constant 0 : index
    %19 = vector.load %arg7[%c0_15, %c0_16] : memref<1x128xf32, #tpu.memory_space<vmem>>, vector<1x128xf32>
    %20 = vector.broadcast %19 : vector<1x128xf32> to vector<1024x128xf32>
    %21 = arith.addf %18, %20 : vector<1024x128xf32>
    %22 = arith.truncf %21 : vector<1024x128xf32> to vector<1024x128xbf16>
    %cst_17 = arith.constant 0.000000e+00 : bf16
    %23 = vector.broadcast %cst_17 : bf16 to vector<1024x128xbf16>
    %24 = arith.maximumf %22, %23 : vector<1024x128xbf16>
    %c0_18 = arith.constant 0 : index
    %c0_19 = arith.constant 0 : index
    %25 = vector.load %arg8[%c0_18, %c0_19] : memref<128x128xbf16, #tpu.memory_space<vmem>>, vector<128x128xbf16>
    %cst_20 = arith.constant dense<0.000000e+00> : vector<1024x128xf32>
    %26 = tpu.matmul %24, %25, %cst_20 {dimension_numbers = #tpu.dot_dimension_numbers<[1], [0], [0], [1], [0, 0, 1, 1], [], []>} : vector<1024x128xbf16>, vector<128x128xbf16>, vector<1024x128xf32> -> vector<1024x128xf32>
    %c0_21 = arith.constant 0 : index
    %c0_22 = arith.constant 0 : index
    %27 = vector.load %arg9[%c0_21, %c0_22] : memref<1x128xf32, #tpu.memory_space<vmem>>, vector<1x128xf32>
    %28 = vector.broadcast %27 : vector<1x128xf32> to vector<1024x128xf32>
    %29 = arith.addf %26, %28 : vector<1024x128xf32>
    %30 = arith.truncf %29 : vector<1024x128xf32> to vector<1024x128xbf16>
    %cst_23 = arith.constant 0.000000e+00 : bf16
    %31 = vector.broadcast %cst_23 : bf16 to vector<1024x128xbf16>
    %32 = arith.maximumf %30, %31 : vector<1024x128xbf16>
    %c0_24 = arith.constant 0 : index
    %c0_25 = arith.constant 0 : index
    %33 = vector.load %arg10[%c0_24, %c0_25] : memref<128x8xbf16, #tpu.memory_space<vmem>>, vector<128x8xbf16>
    %cst_26 = arith.constant dense<0.000000e+00> : vector<1024x8xf32>
    %34 = tpu.matmul %32, %33, %cst_26 {dimension_numbers = #tpu.dot_dimension_numbers<[1], [0], [0], [1], [0, 0, 1, 1], [], []>} : vector<1024x128xbf16>, vector<128x8xbf16>, vector<1024x8xf32> -> vector<1024x8xf32>
    %c0_27 = arith.constant 0 : index
    %c0_28 = arith.constant 0 : index
    %35 = vector.load %arg11[%c0_27, %c0_28] : memref<1x8xf32, #tpu.memory_space<vmem>>, vector<1x8xf32>
    %36 = vector.broadcast %35 : vector<1x8xf32> to vector<1024x8xf32>
    %37 = arith.addf %34, %36 : vector<1024x8xf32>
    %c0_29 = arith.constant 0 : index
    %c0_30 = arith.constant 0 : index
    %38 = vector.load %arg12[%c0_29, %c0_30] : memref<1024x8xf32, #tpu.memory_space<vmem>>, vector<1024x8xf32>
    tpu.vector_store %arg12[%c0_29, %c0_30], %37 {strides = array<i32>} : memref<1024x8xf32, #tpu.memory_space<vmem>>, vector<1024x8xf32>,
    return
  }
  func.func @transform_0(%arg0: i32) -> (i32, i32) {
    %c0_i32 = arith.constant 0 : i32
    %c0_i32_0 = arith.constant 0 : i32
    return %arg0, %c0_i32 : i32, i32
  }
  func.func @transform_1(%arg0: i32) -> (i32, i32) {
    %c0_i32 = arith.constant 0 : i32
    %c0_i32_0 = arith.constant 0 : i32
    %c0_i32_1 = arith.constant 0 : i32
    return %c0_i32, %c0_i32_0 : i32, i32
  }
  func.func @transform_2(%arg0: i32) -> (i32, i32) {
    %c0_i32 = arith.constant 0 : i32
    %c0_i32_0 = arith.constant 0 : i32
    %c0_i32_1 = arith.constant 0 : i32
    return %c0_i32, %c0_i32_0 : i32, i32
  }
  func.func @transform_3(%arg0: i32) -> (i32, i32) {
    %c0_i32 = arith.constant 0 : i32
    %c0_i32_0 = arith.constant 0 : i32
    %c0_i32_1 = arith.constant 0 : i32
    return %c0_i32, %c0_i32_0 : i32, i32
  }
  func.func @transform_4(%arg0: i32) -> (i32, i32) {
    %c0_i32 = arith.constant 0 : i32
    %c0_i32_0 = arith.constant 0 : i32
    %c0_i32_1 = arith.constant 0 : i32
    return %c0_i32, %c0_i32_0 : i32, i32
  }
  func.func @transform_5(%arg0: i32) -> (i32, i32) {
    %c0_i32 = arith.constant 0 : i32
    %c0_i32_0 = arith.constant 0 : i32
    %c0_i32_1 = arith.constant 0 : i32
    return %c0_i32, %c0_i32_0 : i32, i32
  }
  func.func @transform_6(%arg0: i32) -> (i32, i32) {
    %c0_i32 = arith.constant 0 : i32
    %c0_i32_0 = arith.constant 0 : i32
    %c0_i32_1 = arith.constant 0 : i32
    return %c0_i32, %c0_i32_0 : i32, i32
  }
  func.func @transform_7(%arg0: i32) -> (i32, i32) {
    %c0_i32 = arith.constant 0 : i32
    %c0_i32_0 = arith.constant 0 : i32
    %c0_i32_1 = arith.constant 0 : i32
    return %c0_i32, %c0_i32_0 : i32, i32
  }
  func.func @transform_8(%arg0: i32) -> (i32, i32) {
    %c0_i32 = arith.constant 0 : i32
    %c0_i32_0 = arith.constant 0 : i32
    %c0_i32_1 = arith.constant 0 : i32
    return %c0_i32, %c0_i32_0 : i32, i32
  }
  func.func @transform_9(%arg0: i32) -> (i32, i32) {
    %c0_i32 = arith.constant 0 : i32
    %c0_i32_0 = arith.constant 0 : i32
    %c0_i32_1 = arith.constant 0 : i32
    return %c0_i32, %c0_i32_0 : i32, i32
  }
  func.func @transform_10(%arg0: i32) -> (i32, i32) {
    %c0_i32 = arith.constant 0 : i32
    %c0_i32_0 = arith.constant 0 : i32
    %c0_i32_1 = arith.constant 0 : i32
    return %c0_i32, %c0_i32_0 : i32, i32
  }
  func.func @transform_11(%arg0: i32) -> (i32, i32) {
    %c0_i32 = arith.constant 0 : i32
    %c0_i32_0 = arith.constant 0 : i32
    return %arg0, %c0_i32 : i32, i32
  }
}

</mosaic_0001>

<bundles_post_ra>
// kernel: xyz_mlp_pallas.1
= control target key start
LH: loop header
LB: loop body
LE: loop exit
PB: predicated region body
PF: predicated region fallthrough
CT: control target
= control target key end

     0   :  { %s5653_s17 = smov 0   ;;  %s7155_s0 = inlined_call_operand.vmem [shape: bf16[2048,64], index: 0, kind: input, shape index: {}]   ;;  %s7156_s1 = inlined_call_operand.vmem [shape: bf16[64,128], index: 1, kind: input, shape index: {}]   ;;  %s7157_s2 = inlined_call_operand.vmem [shape: f32[1,128], index: 2, kind: input, shape index: {}]   ;;  %s7158_s3 = inlined_call_operand.vmem [shape: bf16[128,128], index: 3, kind: input, shape index: {}]   ;;  %s7159_s4 = inlined_call_operand.vmem [shape: f32[1,128], index: 4, kind: input, shape index: {}]   ;;  %s7160_s5 = inlined_call_operand.vmem [shape: bf16[128,128], index: 5, kind: input, shape index: {}]   ;;  %s7161_s6 = inlined_call_operand.vmem [shape: f32[1,128], index: 6, kind: input, shape index: {}]   ;;  %s7162_s7 = inlined_call_operand.vmem [shape: bf16[128,128], index: 7, kind: input, shape index: {}]   ;;  %s7163_s8 = inlined_call_operand.vmem [shape: f32[1,128], index: 8, kind: input, shape index: {}]   ;;  %s7164_s9 = inlined_call_operand.vmem [shape: bf16[128,8], index: 9, kind: input, shape index: {}]   ;;  %s7165_s10 = inlined_call_operand.vmem [shape: f32[1,8], index: 10, kind: input, shape index: {}]   ;;  %s7166_s11 = inlined_call_operand.vmem [shape: f32[2048,8], index: 11, kind: output, shape index: {}]  }
   0x1 LB: > { %s4962_s18 = sadd.s32 4294967295, %s5591_s17   ;;  %p4966_p0 = scmp.ge.s32.totalorder %s5591_s17, 1  ;;  %s5591_s17 = sphi %s5653_s17, %s21_s17  }
   0x2   : > { %p338_p1 = scmp.lt.s32.totalorder %s5591_s17, 3 }
   0x4   : > { %p339_p2 = pnand %p4966_p0, %p338_p1 }
   0x6   : > { %342 = sbr.rel (%p339_p2) target bundleno = 1882 (0x75a), region = 64 }
   0xb   : > { %v5504_v0 = vld [vmem:[%s7156_s1 + $0x18] sm:$0xff]  ;;  %s4967_s21 = sshll.u32 %s4962_s18, 7  ;;  %v5503_v1 = vld [vmem:[%s7156_s1 + $0x10] sm:$0xff]  ;;  %v5502_v2 = vld [vmem:[%s7156_s1 + $0x8] sm:$0xff]  ;;  %vm875_vm0 = vcmask 523264   ;;  %vm4777_vm1 = vcmask 64512  }
   0xc   : > { %p379_p3 = scmp.lt.s32.totalorder %s4967_s21, 255  ;;  %5537 = vmatpush.bf16.msra.mxu1 %v5504_v0  ;;  %1072 = vmatpush.bf16.msra.mxu0 %v5504_v0  ;;  %v5501_v3 = vld [vmem:[%s7156_s1] sm:$0xff]  ;;  %v5512_v4 = vld [vmem:[%s7158_s3 + $0x38] sm:$0xff]  ;;  %v5511_v6 = vld [vmem:[%s7158_s3 + $0x30] sm:$0xff] }
   0xd   : > { %5538 = vmatpush.bf16.msra.mxu2 %v5504_v0  ;;  %5539 = vmatpush.bf16.msra.mxu3 %v5504_v0  ;;  %v5510_v9 = vld [vmem:[%s7158_s3 + $0x28] sm:$0xff]  ;;  %v5509_v12 = vld [vmem:[%s7158_s3 + $0x20] sm:$0xff]  ;;  %v5508_v16 = vld [vmem:[%s7158_s3 + $0x18] sm:$0xff] }
   0xe   : > { %s7210_s21 = smov (!%p379_p3, %s4967_s21), 255  ;;  %v5520_v21 = vld [vmem:[%s7160_s5 + $0x38] sm:$0xff]  ;;  %v5727_v24 = vld [vmem:[%s7157_s2] ss:$0 sm:$0xff]  ;;  %v5507_v31 = vld [vmem:[%s7158_s3 + $0x10] sm:$0xff] }
   0xf   : > { %s4968_s26 = sshll.u32 %s7210_s21, 2  ;;  %v5519_v43 = vld [vmem:[%s7160_s5 + $0x30] sm:$0xff]  ;;  %v5506_v54 = vld [vmem:[%s7158_s3 + $0x8] sm:$0xff]  ;;  %s4970_s25 = sshll.u32 %s7210_s21, 3 }
  0x10   : > { %5540 = vmatpush.bf16.msra.mxu1 %v5503_v1  ;;  %1073 = vmatpush.bf16.msra.mxu0 %v5503_v1  ;;  %s5679_s12 = scalar_lea.vmem %s7155_s0, %s4968_s26  ;;  %s6324_s30 = scalar_lea.vmem %s7166_s11, %s4970_s25 }
  0x11   : > { %5541 = vmatpush.bf16.msra.mxu2 %v5503_v1  ;;  %5542 = vmatpush.bf16.msra.mxu3 %v5503_v1  ;;  %v5454_v5 = vld [vmem:[%s5679_s12 + $0x88] sm:$0xff]  ;;  %v5455_v7 = vld [vmem:[%s5679_s12 + $0x90] sm:$0xff]  ;;  %v5456_v8 = vld [vmem:[%s5679_s12 + $0x98] sm:$0xff] }
  0x12   : > { %v5457_v10 = vld [vmem:[%s5679_s12 + $0xa0] sm:$0xff]  ;;  %v5458_v11 = vld [vmem:[%s5679_s12 + $0xa8] sm:$0xff]  ;;  %v5459_v13 = vld [vmem:[%s5679_s12 + $0xb0] sm:$0xff] }
  0x13   : > { %v5437_v14 = vld [vmem:[%s5679_s12] sm:$0xff]  ;;  %v5460_v15 = vld [vmem:[%s5679_s12 + $0xb8] sm:$0xff]  ;;  %v5438_v17 = vld [vmem:[%s5679_s12 + $0x8] sm:$0xff] }
  0x14   : > { %5543 = vmatpush.bf16.msra.mxu1 %v5502_v2  ;;  %1074 = vmatpush.bf16.msra.mxu0 %v5502_v2  ;;  %v5461_v18 = vld [vmem:[%s5679_s12 + $0xc0] sm:$0xff]  ;;  %v5471_v19 = vld [vmem:[%s5679_s12 + $0x110] sm:$0xff]  ;;  %v5462_v22 = vld [vmem:[%s5679_s12 + $0xc8] sm:$0xff] }
  0x15   : > { %5544 = vmatpush.bf16.msra.mxu2 %v5502_v2  ;;  %5545 = vmatpush.bf16.msra.mxu3 %v5502_v2  ;;  %v5439_v20 = vld [vmem:[%s5679_s12 + $0x10] sm:$0xff]  ;;  %v5472_v25 = vld [vmem:[%s5679_s12 + $0x118] sm:$0xff]  ;;  %v5473_v36 = vld [vmem:[%s5679_s12 + $0x120] sm:$0xff] }
  0x16   : > { %v5440_v32 = vld [vmem:[%s5679_s12 + $0x18] sm:$0xff]  ;;  %v5463_v34 = vld [vmem:[%s5679_s12 + $0xd0] sm:$0xff]  ;;  %v5441_v42 = vld [vmem:[%s5679_s12 + $0x20] sm:$0xff] }
  0x17   : > { %v5464_v45 = vld [vmem:[%s5679_s12 + $0xd8] sm:$0xff]  ;;  %v5474_v47 = vld [vmem:[%s5679_s12 + $0x128] sm:$0xff]  ;;  %v5465_v56 = vld [vmem:[%s5679_s12 + $0xe0] sm:$0xff] }
  0x18   : > { %5546 = vmatpush.bf16.msra.mxu1 %v5501_v3  ;;  %1075 = vmatpush.bf16.msra.mxu0 %v5501_v3  ;;  %v5442_v53 = vld [vmem:[%s5679_s12 + $0x28] sm:$0xff]  ;;  %v5475_v58 = vld [vmem:[%s5679_s12 + $0x130] sm:$0xff] }
  0x19   : > { %5547 = vmatpush.bf16.msra.mxu2 %v5501_v3  ;;  %5548 = vmatpush.bf16.msra.mxu3 %v5501_v3  ;;  %v5443_v0 = vld [vmem:[%s5679_s12 + $0x30] sm:$0xff]  ;;  %v5518_v1 = vld [vmem:[%s7160_s5 + $0x28] sm:$0xff] }
  0x1a   : > { %v5466_v3 = vld [vmem:[%s5679_s12 + $0xe8] sm:$0xff] }
  0x1b   : > { %5260 = vmatmul.msk.bf16.vlgmr.msra.gmra.mxu1 %vm875_vm0, %v5454_v5  ;;  %5243 = vmatmul.msk.bf16.vlgmr.msra.gmra.mxu0 %vm875_vm0, %v5437_v14  ;;  %v5476_v5 = vld [vmem:[%s5679_s12 + $0x138] sm:$0xff] }
  0x1c   : > { %1913 = vmatpush.bf16.msrb.mxu1 %v5512_v4  ;;  %5277 = vmatmul.msk.bf16.vlgmr.msra.gmra.mxu2 %vm875_vm0, %v5471_v19 }
  0x1d   : > { %2758 = vmatpush.bf16.msrb.mxu2 %v5520_v21 }
  0x20   : > { %1914 = vmatpush.bf16.msrb.mxu1 %v5511_v6 }
  0x21   : > { %2759 = vmatpush.bf16.msrb.mxu2 %v5519_v43  ;;  %v5479_v43 = vld [vmem:[%s5679_s12 + $0x150] sm:$0xff] }
  0x24   : > { %1915 = vmatpush.bf16.msrb.mxu1 %v5510_v9 }
  0x25   : > { %2760 = vmatpush.bf16.msrb.mxu2 %v5518_v1 }
  0x28   : > { %1916 = vmatpush.bf16.msrb.mxu1 %v5509_v12 }
  0x2b   : > { %5261 = vmatmul.msk.bf16.gmra.mxu1 %vm875_vm0, %v5455_v7  ;;  %5244 = vmatmul.msk.bf16.gmra.mxu0 %vm875_vm0, %v5438_v17 }
  0x2c   : > { %1917 = vmatpush.bf16.msrb.mxu1 %v5508_v16  ;;  %5278 = vmatmul.msk.bf16.gmra.mxu2 %vm875_vm0, %v5472_v25  ;;  %v5477_v16 = vld [vmem:[%s5679_s12 + $0x140] sm:$0xff] }
  0x2d   : > { %v5517_v25 = vld [vmem:[%s7160_s5 + $0x20] sm:$0xff] }
  0x2e   : > { %2761 = vmatpush.bf16.msrb.mxu2 %v5517_v25  ;;  %v5481_v25 = vld [vmem:[%s5679_s12 + $0x160] sm:$0xff] }
  0x30   : > { %1918 = vmatpush.bf16.msrb.mxu1 %v5507_v31 }
  0x34   : > { %1919 = vmatpush.bf16.msrb.mxu1 %v5506_v54 }
  0x3b   : > { %5262 = vmatmul.msk.bf16.gmra.mxu1 %vm875_vm0, %v5456_v8  ;;  %5245 = vmatmul.msk.bf16.gmra.mxu0 %vm875_vm0, %v5439_v20 }
  0x3c   : > { %5279 = vmatmul.msk.bf16.gmra.mxu2 %vm875_vm0, %v5473_v36 }
  0x4b   : > { %5263 = vmatmul.msk.bf16.gmra.mxu1 %vm875_vm0, %v5457_v10  ;;  %5246 = vmatmul.msk.bf16.gmra.mxu0 %vm875_vm0, %v5440_v32 }
  0x4c   : > { %5280 = vmatmul.msk.bf16.gmra.mxu2 %vm875_vm0, %v5474_v47 }
  0x5b   : > { %5264 = vmatmul.msk.bf16.gmra.mxu1 %vm875_vm0, %v5458_v11  ;;  %5247 = vmatmul.msk.bf16.gmra.mxu0 %vm875_vm0, %v5441_v42  ;;  %v5444_v11 = vld [vmem:[%s5679_s12 + $0x38] sm:$0xff] }
  0x5c   : > { %5281 = vmatmul.msk.bf16.gmra.mxu2 %vm875_vm0, %v5475_v58 }
  0x6b   : > { %5265 = vmatmul.msk.bf16.gmra.mxu1 %vm875_vm0, %v5459_v13  ;;  %5248 = vmatmul.msk.bf16.gmra.mxu0 %vm875_vm0, %v5442_v53  ;;  %v5467_v13 = vld [vmem:[%s5679_s12 + $0xf0] sm:$0xff]  ;;  %v5516_v53 = vld [vmem:[%s7160_s5 + $0x18] sm:$0xff] }
  0x6c   : > { %5282 = vmatmul.msk.bf16.gmra.mxu2 %vm875_vm0, %v5476_v5 }
  0x6d   : > { %2762 = vmatpush.bf16.msrb.mxu2 %v5516_v53 }
  0x7b   : > { %5266 = vmatmul.msk.bf16.gmra.mxu1 %vm875_vm0, %v5460_v15  ;;  %5249 = vmatmul.msk.bf16.gmra.mxu0 %vm875_vm0, %v5443_v0  ;;  %v5505_v15 = vld [vmem:[%s7158_s3] sm:$0xff] }
  0x7c   : > { %1920 = vmatpush.bf16.msrb.mxu1 %v5505_v15  ;;  %5283 = vmatmul.msk.bf16.gmra.mxu2 %vm875_vm0, %v5477_v16 }
  0x8b   : > { %5267 = vmatmul.msk.bf16.gmra.mxu1 %vm875_vm0, %v5461_v18  ;;  %5250 = vmatmul.msk.bf16.gmra.mxu0 %vm875_vm0, %v5444_v11 }
  0x98   : > { %v1162_v23 = vpop.f32.mrf.mxu1 }
  0x99   : > { %v1163_v26 = vadd.f32 %v5727_v24, %v1162_v23  ;;  %v5445_v23 = vld [vmem:[%s5679_s12 + $0x40] sm:$0xff] }
  0x9b   : > { %5268 = vmatmul.msk.bf16.gmra.mxu1 %vm875_vm0, %v5462_v22  ;;  %v1687_v29 = vmax.f32 %v1163_v26, 0.0  ;;  %v1077_v22 = vpop.f32.mrf.mxu0  ;;  %5251 = vmatmul.msk.bf16.gmra.mxu0 %vm875_vm0, %v5445_v23 }
  0x9c   : > { %v1078_v5 = vadd.f32 %v5727_v24, %v1077_v22 }
  0xa0   : > { %v1164_v27 = vpop.f32.mrf.mxu1 }
  0xa1   : > { %v1165_v28 = vadd.f32 %v5727_v24, %v1164_v27  ;;  %v5468_v27 = vld [vmem:[%s5679_s12 + $0xf8] sm:$0xff] }
  0xa3   : > { %v1688_v30 = vmax.f32 %v1165_v28, 0.0 }
  0xa5   : > { %v5739_v33 = vpack.c.bf16 %v1688_v30, %v1687_v29  ;;  %v1079_v29 = vpop.f32.mrf.mxu0  ;;  %v5478_v30 = vld [vmem:[%s5679_s12 + $0x148] sm:$0xff] }
  0xa6   : > { %5284 = vmatmul.msk.bf16.gmra.mxu2 %vm875_vm0, %v5478_v30 }
  0xa8   : > { %v1167_v35 = vpop.f32.mrf.mxu1 }
  0xa9   : > { %v1168_v37 = vadd.f32 %v5727_v24, %v1167_v35 }
  0xab   : > { %5269 = vmatmul.msk.bf16.gmra.mxu1 %vm875_vm0, %v5463_v34  ;;  %v1689_v40 = vmax.f32 %v1168_v37, 0.0 }
  0xad   : > { %v1082_v37 = vpop.f32.mrf.mxu0 }
  0xb0   : > { %v1169_v38 = vpop.f32.mrf.mxu1 }
  0xb1   : > { %v1170_v39 = vadd.f32 %v5727_v24, %v1169_v38  ;;  %v5446_v38 = vld [vmem:[%s5679_s12 + $0x48] sm:$0xff] }
  0xb2   : > { %5252 = vmatmul.msk.bf16.gmra.mxu0 %vm875_vm0, %v5446_v38 }
  0xb3   : > { %v1690_v41 = vmax.f32 %v1170_v39, 0.0 }
  0xb5   : > { %v5752_v44 = vpack.c.bf16 %v1690_v41, %v1689_v40  ;;  %v5469_v40 = vld [vmem:[%s5679_s12 + $0x100] sm:$0xff]  ;;  %v1084_v42 = vpop.f32.mrf.mxu0 }
  0xb6   : > { %5285 = vmatmul.msk.bf16.gmra.mxu2 %vm875_vm0, %v5479_v43  ;;  %v5515_v43 = vld [vmem:[%s7160_s5 + $0x10] sm:$0xff] }
  0xb7   : > { %2763 = vmatpush.bf16.msrb.mxu2 %v5515_v43  ;;  %v5451_v43 = vld [vmem:[%s5679_s12 + $0x70] sm:$0xff] }
  0xb8   : > { %v1172_v46 = vpop.f32.mrf.mxu1 }
  0xb9   : > { %v1173_v48 = vadd.f32 %v5727_v24, %v1172_v46 }
  0xbb   : > { %5270 = vmatmul.msk.bf16.gmra.mxu1 %vm875_vm0, %v5464_v45  ;;  %v1691_v51 = vmax.f32 %v1173_v48, 0.0  ;;  %v1247_v48 = vpop.f32.mrf.mxu2 }
  0xc0   : > { %v1174_v49 = vpop.f32.mrf.mxu1 }
  0xc1   : > { %v1175_v50 = vadd.f32 %v5727_v24, %v1174_v49 }
  0xc3   : > { %v1692_v52 = vmax.f32 %v1175_v50, 0.0 }
  0xc5   : > { %v5765_v55 = vpack.c.bf16 %v1692_v52, %v1691_v51  ;;  %v5822_v51 = vpop.f32.mrf.mxu0  ;;  %v5447_v52 = vld [vmem:[%s5679_s12 + $0x50] sm:$0xff] }
  0xc6   : > { %5253 = vmatmul.msk.bf16.gmra.mxu0 %vm875_vm0, %v5447_v52 }
  0xc8   : > { %v1177_v57 = vpop.f32.mrf.mxu1 }
  0xc9   : > { %v1178_v59 = vadd.f32 %v5727_v24, %v1177_v57  ;;  %v1248_v57 = vadd.f32 %v5727_v24, %v1247_v48 }
  0xcb   : > { %5271 = vmatmul.msk.bf16.gmra.mxu1 %vm875_vm0, %v5465_v56  ;;  %v1693_v62 = vmax.f32 %v1178_v59, 0.0  ;;  %v5470_v56 = vld [vmem:[%s5679_s12 + $0x108] sm:$0xff]  ;;  %v1249_v59 = vpop.f32.mrf.mxu2 }
  0xd0   : > { %v1179_v60 = vpop.f32.mrf.mxu1 }
  0xd1   : > { %v1180_v61 = vadd.f32 %v5727_v24, %v1179_v60  ;;  %v1721_v60 = vmax.f32 %v1248_v57, 0.0 }
  0xd3   : > { %v1694_v63 = vmax.f32 %v1180_v61, 0.0  ;;  %v1250_v61 = vadd.f32 %v5727_v24, %v1249_v59  ;;  %v5487_v59 = vld [vmem:[%s5679_s12 + $0x190] sm:$0xff] }
  0xd4   : > { %5293 = vmatmul.msk.bf16.vlgmr.msra.gmra.mxu3 %vm875_vm0, %v5487_v59 }
  0xd5   : > { %v5778_v2 = vpack.c.bf16 %v1694_v63, %v1693_v62  ;;  %v5835_v62 = vpop.f32.mrf.mxu0  ;;  %v5480_v63 = vld [vmem:[%s5679_s12 + $0x158] sm:$0xff]  ;;  %v1722_v0 = vmax.f32 %v1250_v61, 0.0 }
  0xd6   : > { %5286 = vmatmul.msk.bf16.gmra.mxu2 %vm875_vm0, %v5480_v63  ;;  %v1088_v63 = vadd.f32 %v5727_v24, %v5822_v51 }
  0xd8   : > { %v1182_v4 = vpop.f32.mrf.mxu1 }
  0xd9   : > { %v1183_v6 = vadd.f32 %v5727_v24, %v1182_v4 }
  0xdb   : > { %5272 = vmatmul.msk.bf16.gmra.mxu1 %vm875_vm0, %v5466_v3  ;;  %v1695_v9 = vmax.f32 %v1183_v6, 0.0  ;;  %v5840_v3 = vpack.c.bf16 %v1722_v0, %v1721_v60  ;;  %v1080_v6 = vadd.f32 %v5727_v24, %v1079_v29  ;;  %v1090_v0 = vadd.f32 %v5727_v24, %v5835_v62 }
  0xdd   : > { %v5845_v11 = vpop.f32.mrf.mxu0  ;;  %v1654_v15 = vmax.f32 %v1080_v6, 0.0 }
  0xe0   : > { %v1184_v7 = vpop.f32.mrf.mxu1 }
  0xe1   : > { %v1185_v8 = vadd.f32 %v5727_v24, %v1184_v7 }
  0xe3   : > { %v1696_v10 = vmax.f32 %v1185_v8, 0.0  ;;  %v1252_v8 = vpop.f32.mrf.mxu2 }
  0xe5   : > { %v5788_v12 = vpack.c.bf16 %v1696_v10, %v1695_v9  ;;  %v5853_v23 = vpop.f32.mrf.mxu0 }
  0xe6   : > { %5287 = vmatmul.msk.bf16.gmra.mxu2 %vm875_vm0, %v5481_v25 }
  0xe8   : > { %v1187_v14 = vpop.f32.mrf.mxu1 }
  0xe9   : > { %v1188_v17 = vadd.f32 %v5727_v24, %v1187_v14  ;;  %v1653_v14 = vmax.f32 %v1078_v5, 0.0 }
  0xeb   : > { %5273 = vmatmul.msk.bf16.gmra.mxu1 %vm875_vm0, %v5467_v13  ;;  %v1697_v20 = vmax.f32 %v1188_v17, 0.0  ;;  %v5448_v13 = vld [vmem:[%s5679_s12 + $0x58] sm:$0xff]  ;;  %v1253_v17 = vadd.f32 %v5727_v24, %v1252_v8  ;;  %v5450_v8 = vld [vmem:[%s5679_s12 + $0x68] sm:$0xff] }
  0xec   : > { %5254 = vmatmul.msk.bf16.gmra.mxu0 %vm875_vm0, %v5448_v13 }
  0xf0   : > { %v1189_v18 = vpop.f32.mrf.mxu1 }
  0xf1   : > { %v1190_v19 = vadd.f32 %v5727_v24, %v1189_v18 }
  0xf3   : > { %v1698_v21 = vmax.f32 %v1190_v19, 0.0  ;;  %v1781_v19 = vpack.c.bf16 %v1654_v15, %v1653_v14 }
  0xf5   : > { %v5804_v26 = vpack.c.bf16 %v1698_v21, %v1697_v20  ;;  %v1254_v20 = vpop.f32.mrf.mxu2  ;;  %v1723_v21 = vmax.f32 %v1253_v17, 0.0 }
  0xf6   : > { %v1255_v22 = vadd.f32 %v5727_v24, %v1254_v20 }
  0xf8   : > { %v1192_v28 = vpop.f32.mrf.mxu1 }
  0xf9   : > { %v1193_v31 = vadd.f32 %v5727_v24, %v1192_v28 }
  0xfb   : > { %5274 = vmatmul.msk.bf16.gmra.mxu1 %vm875_vm0, %v5468_v27  ;;  %v1699_v35 = vmax.f32 %v1193_v31, 0.0  ;;  %v1724_v27 = vmax.f32 %v1255_v22, 0.0  ;;  %v1083_v31 = vadd.f32 %v5727_v24, %v1082_v37 }
  0xfd   : > { %v5858_v29 = vpack.c.bf16 %v1724_v27, %v1723_v21  ;;  %v5483_v21 = vld [vmem:[%s5679_s12 + $0x170] sm:$0xff]  ;;  %v5488_v27 = vld [vmem:[%s5679_s12 + $0x198] sm:$0xff] }
  0xfe   : > { %5294 = vmatmul.msk.bf16.gmra.mxu3 %vm875_vm0, %v5488_v27 }
 0x100   : > { %v1194_v32 = vpop.f32.mrf.mxu1 }
 0x101   : > { %v1195_v34 = vadd.f32 %v5727_v24, %v1194_v32  ;;  %v1085_v32 = vadd.f32 %v5727_v24, %v1084_v42 }
 0x103   : > { %v1700_v36 = vmax.f32 %v1195_v34, 0.0 }
 0x105   : > { %v5814_v39 = vpack.c.bf16 %v1700_v36, %v1699_v35  ;;  %v1257_v35 = vpop.f32.mrf.mxu2 }
 0x106   : > { %v1258_v42 = vadd.f32 %v5727_v24, %v1257_v35 }
 0x108   : > { %v1197_v41 = vpop.f32.mrf.mxu1 }
 0x109   : > { %v1198_v45 = vadd.f32 %v5727_v24, %v1197_v41  ;;  %v5449_v41 = vld [vmem:[%s5679_s12 + $0x60] sm:$0xff] }
 0x10a   : > { %5255 = vmatmul.msk.bf16.gmra.mxu0 %vm875_vm0, %v5449_v41 }
 0x10b   : > { %5275 = vmatmul.msk.bf16.gmra.mxu1 %vm875_vm0, %v5469_v40  ;;  %v1701_v49 = vmax.f32 %v1198_v45, 0.0  ;;  %v5863_v40 = vpop.f32.mrf.mxu0  ;;  %v1655_v45 = vmax.f32 %v1083_v31, 0.0  ;;  %v1093_v31 = vadd.f32 %v5727_v24, %v5845_v11  ;;  %v5514_v11 = vld [vmem:[%s7160_s5 + $0x8] sm:$0xff] }
 0x10c   : > { %2764 = vmatpush.bf16.msrb.mxu2 %v5514_v11  ;;  %v5486_v11 = vld [vmem:[%s5679_s12 + $0x188] sm:$0xff] }
 0x110   : > { %v1199_v46 = vpop.f32.mrf.mxu1 }
 0x111   : > { %v1200_v47 = vadd.f32 %v5727_v24, %v1199_v46  ;;  %v1656_v46 = vmax.f32 %v1085_v32, 0.0  ;;  %v1095_v32 = vadd.f32 %v5727_v24, %v5853_v23 }
 0x113   : > { %v1702_v50 = vmax.f32 %v1200_v47, 0.0  ;;  %v1782_v48 = vpack.c.bf16 %v1656_v46, %v1655_v45  ;;  %v5874_v53 = vpop.f32.mrf.mxu0  ;;  %v1659_v45 = vmax.f32 %v1093_v31, 0.0  ;;  %v1660_v46 = vmax.f32 %v1095_v32, 0.0  ;;  %v5453_v31 = vld [vmem:[%s5679_s12 + $0x80] sm:$0xff] }
 0x114   : > { %v1100_v59 = vadd.f32 %v5727_v24, %v5874_v53  ;;  %v5513_v32 = vld [vmem:[%s7160_s5] sm:$0xff] }
 0x115   : > { %v5829_v54 = vpack.c.bf16 %v1702_v50, %v1701_v49  ;;  %v1259_v49 = vpop.f32.mrf.mxu2  ;;  %v1725_v50 = vmax.f32 %v1258_v42, 0.0  ;;  %2765 = vmatpush.bf16.msrb.mxu2 %v5513_v32 }
 0x116   : > { %v1260_v52 = vadd.f32 %v5727_v24, %v1259_v49 }
 0x118   : > { %v1202_v58 = vpop.f32.mrf.mxu1  ;;  %v1726_v57 = vmax.f32 %v1260_v52, 0.0 }
 0x119   : > { %v1203_v1 = vadd.f32 %v5727_v24, %v1202_v58 }
 0x11a   : > { %v5880_v60 = vpack.c.bf16 %v1726_v57, %v1725_v50  ;;  %5256 = vmatmul.msk.bf16.gmra.mxu0 %vm875_vm0, %v5450_v8  ;;  %v5484_v50 = vld [vmem:[%s5679_s12 + $0x178] sm:$0xff]  ;;  %v1662_v8 = vmax.f32 %v1100_v59, 0.0 }
 0x11b   : > { %5276 = vmatmul.msk.bf16.gmra.mxu1 %vm875_vm0, %v5470_v56  ;;  %v1703_v9 = vmax.f32 %v1203_v1, 0.0  ;;  %v5482_v56 = vld [vmem:[%s5679_s12 + $0x168] sm:$0xff] }
 0x11c   : > { %5288 = vmatmul.msk.bf16.gmra.mxu2 %vm875_vm0, %v5482_v56  ;;  %v5489_v56 = vld [vmem:[%s5679_s12 + $0x1a0] sm:$0xff] }
 0x11d   : > { %5295 = vmatmul.msk.bf16.gmra.mxu3 %vm875_vm0, %v5489_v56 }
 0x120   : > { %v1204_v4 = vpop.f32.mrf.mxu1 }
 0x121   : > { %v1205_v7 = vadd.f32 %v5727_v24, %v1204_v4  ;;  %v1262_v4 = vpop.f32.mrf.mxu2 }
 0x122   : > { %v1263_v62 = vadd.f32 %v5727_v24, %v1262_v4 }
 0x123   : > { %v1704_v10 = vmax.f32 %v1205_v7, 0.0  ;;  %v5888_v7 = vpop.f32.mrf.mxu0 }
 0x124   : > { %v1727_v17 = vmax.f32 %v1263_v62, 0.0 }
 0x125   : > { %v5849_v16 = vpack.c.bf16 %v1704_v10, %v1703_v9  ;;  %v1657_v9 = vmax.f32 %v1088_v63, 0.0  ;;  %v1658_v10 = vmax.f32 %v1090_v0, 0.0 }
 0x127   : > { %v1783_v14 = vpack.c.bf16 %v1658_v10, %v1657_v9 }
 0x128   : > { %v1207_v18 = vpop.f32.mrf.mxu1 }
 0x129   : > { %v1208_v28 = vadd.f32 %v5727_v24, %v1207_v18  ;;  %v1264_v15 = vpop.f32.mrf.mxu2  ;;  %v5528_v18 = vld [vmem:[%s7162_s7 + $0x38] sm:$0xff] }
 0x12a   : > { %3603 = vmatpush.bf16.msrb.mxu3 %v5528_v18  ;;  %5257 = vmatmul.msk.bf16.gmra.mxu0 %vm875_vm0, %v5451_v43 }
 0x12b   : > { %1921 = vmatmul.bf16.vlgmr.msrb.gmra.mxu1 %v1781_v19  ;;  %v1705_v36 = vmax.f32 %v1208_v28, 0.0  ;;  %v1265_v19 = vadd.f32 %v5727_v24, %v1264_v15  ;;  %v1104_v20 = vpop.f32.mrf.mxu0 }
 0x12c   : > { %5289 = vmatmul.msk.bf16.gmra.mxu2 %vm875_vm0, %v5483_v21  ;;  %v1105_v21 = vadd.f32 %v5727_v24, %v1104_v20 }
 0x12d   : > { %v1728_v22 = vmax.f32 %v1265_v19, 0.0  ;;  %v1103_v19 = vadd.f32 %v5727_v24, %v5888_v7 }
 0x12e   : > { %v1664_v7 = vmax.f32 %v1105_v21, 0.0 }
 0x12f   : > { %v5903_v28 = vpack.c.bf16 %v1728_v22, %v1727_v17  ;;  %v5490_v17 = vld [vmem:[%s5679_s12 + $0x1a8] sm:$0xff] }
 0x130   : > { %v1209_v30 = vpop.f32.mrf.mxu1  ;;  %5296 = vmatmul.msk.bf16.gmra.mxu3 %vm875_vm0, %v5490_v17 }
 0x131   : > { %v1210_v34 = vadd.f32 %v5727_v24, %v1209_v30  ;;  %v5911_v35 = vpop.f32.mrf.mxu2 }
 0x133   : > { %v1706_v38 = vmax.f32 %v1210_v34, 0.0  ;;  %v5913_v41 = vpop.f32.mrf.mxu0 }
 0x135   : > { %v5870_v37 = vpack.c.bf16 %v1706_v38, %v1705_v36 }
 0x138   : > { %v1212_v47 = vpop.f32.mrf.mxu1 }
 0x139   : > { %v1213_v58 = vadd.f32 %v5727_v24, %v1212_v47  ;;  %v1784_v47 = vpack.c.bf16 %v1660_v46, %v1659_v45 }
 0x13b   : > { %1926 = vmatmul.bf16.gmra.mxu1 %v1782_v48  ;;  %v1707_v5 = vmax.f32 %v1213_v58, 0.0  ;;  %v5922_v48 = vpop.f32.mrf.mxu2  ;;  %v1109_v49 = vpop.f32.mrf.mxu0  ;;  %v1098_v58 = vadd.f32 %v5727_v24, %v5863_v40 }
 0x13c   : > { %5290 = vmatmul.msk.bf16.gmra.mxu2 %vm875_vm0, %v5484_v50  ;;  %v1110_v56 = vadd.f32 %v5727_v24, %v1109_v49 }
 0x13d   : > { %v1661_v40 = vmax.f32 %v1098_v58, 0.0 }
 0x13f   : > { %v1785_v10 = vpack.c.bf16 %v1662_v8, %v1661_v40 }
 0x140   : > { %v1214_v61 = vpop.f32.mrf.mxu1 }
 0x141   : > { %v1215_v1 = vadd.f32 %v5727_v24, %v1214_v61 }
 0x143   : > { %v1708_v6 = vmax.f32 %v1215_v1, 0.0  ;;  %v5934_v63 = vpop.f32.mrf.mxu2  ;;  %v1112_v4 = vpop.f32.mrf.mxu0 }
 0x145   : > { %v5892_v51 = vpack.c.bf16 %v1708_v6, %v1707_v5  ;;  %v5527_v5 = vld [vmem:[%s7162_s7 + $0x30] sm:$0xff]  ;;  %v5452_v6 = vld [vmem:[%s5679_s12 + $0x78] sm:$0xff] }
 0x146   : > { %3604 = vmatpush.bf16.msrb.mxu3 %v5527_v5  ;;  %5258 = vmatmul.msk.bf16.gmra.mxu0 %vm875_vm0, %v5452_v6 }
 0x148   : > { %v1217_v13 = vpop.f32.mrf.mxu1 }
 0x149   : > { %v1218_v25 = vadd.f32 %v5727_v24, %v1217_v13 }
 0x14b   : > { %1931 = vmatmul.bf16.gmra.mxu1 %v1783_v14  ;;  %v1709_v36 = vmax.f32 %v1218_v25, 0.0  ;;  %v5943_v62 = vpop.f32.mrf.mxu2  ;;  %v1114_v13 = vpop.f32.mrf.mxu0  ;;  %v5485_v14 = vld [vmem:[%s5679_s12 + $0x180] sm:$0xff] }
 0x14c   : > { %5291 = vmatmul.msk.bf16.gmra.mxu2 %vm875_vm0, %v5485_v14  ;;  %v1113_v14 = vadd.f32 %v5727_v24, %v1112_v4 }
 0x150   : > { %v1219_v30 = vpop.f32.mrf.mxu1 }
 0x151   : > { %v1220_v34 = vadd.f32 %v5727_v24, %v1219_v30 }
 0x153   : > { %v1710_v38 = vmax.f32 %v1220_v34, 0.0  ;;  %v5954_v30 = vpop.f32.mrf.mxu2  ;;  %v1117_v34 = vpop.f32.mrf.mxu0 }
 0x155   : > { %v5920_v23 = vpack.c.bf16 %v1710_v38, %v1709_v36  ;;  %v1663_v36 = vmax.f32 %v1103_v19, 0.0 }
 0x156   : > { %5259 = vmatmul.msk.bf16.gmra.mxu0 %vm875_vm0, %v5453_v31 }
 0x157   : > { %v1786_v43 = vpack.c.bf16 %v1664_v7, %v1663_v36 }
 0x158   : > { %v1222_v42 = vpop.f32.mrf.mxu1 }
 0x159   : > { %v1223_v52 = vadd.f32 %v5727_v24, %v1222_v42 }
 0x15b   : > { %1936 = vmatmul.bf16.gmra.mxu1 %v1784_v47  ;;  %v1711_v0 = vmax.f32 %v1223_v52, 0.0  ;;  %v5964_v45 = vpop.f32.mrf.mxu2  ;;  %v1119_v46 = vpop.f32.mrf.mxu0  ;;  %v5491_v47 = vld [vmem:[%s5679_s12 + $0x1b0] sm:$0xff]  ;;  %v1108_v52 = vadd.f32 %v5727_v24, %v5913_v41 }
 0x15c   : > { %5292 = vmatmul.msk.bf16.gmra.mxu2 %vm875_vm0, %v5486_v11  ;;  %5297 = vmatmul.msk.bf16.gmra.mxu3 %vm875_vm0, %v5491_v47  ;;  %v1120_v47 = vadd.f32 %v5727_v24, %v1119_v46 }
 0x160   : > { %v1224_v57 = vpop.f32.mrf.mxu1 }
 0x161   : > { %v1225_v61 = vadd.f32 %v5727_v24, %v1224_v57 }
 0x163   : > { %v1712_v1 = vmax.f32 %v1225_v61, 0.0  ;;  %v5526_v61 = vld [vmem:[%s7162_s7 + $0x28] sm:$0xff]  ;;  %v5979_v6 = vpop.f32.mrf.mxu2  ;;  %v1122_v49 = vpop.f32.mrf.mxu0 }
 0x164   : > { %3605 = vmatpush.bf16.msrb.mxu3 %v5526_v61 }
 0x165   : > { %v5941_v53 = vpack.c.bf16 %v1712_v1, %v1711_v0  ;;  %v1665_v0 = vmax.f32 %v1108_v52, 0.0  ;;  %v1666_v1 = vmax.f32 %v1110_v56, 0.0 }
 0x167   : > { %v1787_v40 = vpack.c.bf16 %v1666_v1, %v1665_v0 }
 0x168   : > { %v1227_v9 = vpop.f32.mrf.mxu1 }
 0x169   : > { %v1228_v15 = vadd.f32 %v5727_v24, %v1227_v9  ;;  %v5492_v9 = vld [vmem:[%s5679_s12 + $0x1b8] sm:$0xff] }
 0x16b   : > { %1941 = vmatmul.bf16.gmra.mxu1 %v1785_v10  ;;  %v1713_v25 = vmax.f32 %v1228_v15, 0.0  ;;  %v1115_v15 = vadd.f32 %v5727_v24, %v1114_v13  ;;  %v1124_v19 = vpop.f32.mrf.mxu0  ;;  %v5525_v13 = vld [vmem:[%s7162_s7 + $0x20] sm:$0xff] }
 0x16c   : > { %5298 = vmatmul.msk.bf16.gmra.mxu3 %vm875_vm0, %v5492_v9 }
 0x16d   : > { %3606 = vmatpush.bf16.msrb.mxu3 %v5525_v13 }
 0x170   : > { %v1229_v18 = vpop.f32.mrf.mxu1 }
 0x171   : > { %v1230_v22 = vadd.f32 %v5727_v24, %v1229_v18  ;;  %v5986_v18 = vpop.f32.mrf.mxu2 }
 0x173   : > { %v1714_v27 = vmax.f32 %v1230_v22, 0.0  ;;  %v1127_v7 = vpop.f32.mrf.mxu0 }
 0x175   : > { %v5961_v20 = vpack.c.bf16 %v1714_v27, %v1713_v25  ;;  %v1667_v25 = vmax.f32 %v1113_v14, 0.0  ;;  %v1668_v27 = vmax.f32 %v1115_v15, 0.0  ;;  %v1123_v14 = vadd.f32 %v5727_v24, %v1122_v49  ;;  %v5524_v49 = vld [vmem:[%s7162_s7 + $0x18] sm:$0xff] }
 0x176   : > { %v1125_v15 = vadd.f32 %v5727_v24, %v1124_v19  ;;  %3607 = vmatpush.bf16.msrb.mxu3 %v5524_v49 }
 0x177   : > { %v1788_v36 = vpack.c.bf16 %v1668_v27, %v1667_v25  ;;  %v1671_v25 = vmax.f32 %v1123_v14, 0.0 }
 0x178   : > { %v1232_v38 = vpop.f32.mrf.mxu1  ;;  %v1672_v27 = vmax.f32 %v1125_v15, 0.0 }
 0x179   : > { %v1233_v42 = vadd.f32 %v5727_v24, %v1232_v38  ;;  %v5991_v4 = vpop.f32.mrf.mxu2 }
 0x17a   : > { %v1790_v13 = vpack.c.bf16 %v1672_v27, %v1671_v25 }
 0x17b   : > { %1946 = vmatmul.bf16.gmra.mxu1 %v1786_v43  ;;  %v1715_v58 = vmax.f32 %v1233_v42, 0.0  ;;  %v5493_v43 = vld [vmem:[%s5679_s12 + $0x1c0] sm:$0xff]  ;;  %v1118_v42 = vadd.f32 %v5727_v24, %v1117_v34  ;;  %v1129_v0 = vpop.f32.mrf.mxu0 }
 0x17c   : > { %5299 = vmatmul.msk.bf16.gmra.mxu3 %vm875_vm0, %v5493_v43  ;;  %v6009_v34 = vld [vmem:[%s7159_s4] ss:$0 sm:$0xff] }
 0x180   : > { %v1234_v50 = vpop.f32.mrf.mxu1 }
 0x181   : > { %v1235_v57 = vadd.f32 %v5727_v24, %v1234_v50 }
 0x183   : > { %v1716_v59 = vmax.f32 %v1235_v57, 0.0  ;;  %v1669_v57 = vmax.f32 %v1118_v42, 0.0 }
 0x185   : > { %v5977_v5 = vpack.c.bf16 %v1716_v59, %v1715_v58  ;;  %v1670_v58 = vmax.f32 %v1120_v47, 0.0  ;;  %v6002_v59 = vpop.f32.mrf.mxu2  ;;  %v1128_v47 = vadd.f32 %v5727_v24, %v1127_v7 }
 0x188   : > { %v1237_v41 = vpop.f32.mrf.mxu1 }
 0x189   : > { %v1238_v8 = vadd.f32 %v5727_v24, %v1237_v41  ;;  %v1789_v41 = vpack.c.bf16 %v1670_v58, %v1669_v57 }
 0x18b   : > { %1951 = vmatmul.bf16.gmra.mxu1 %v1787_v40  ;;  %v1717_v21 = vmax.f32 %v1238_v8, 0.0  ;;  %v5494_v8 = vld [vmem:[%s5679_s12 + $0x1c8] sm:$0xff] }
 0x18c   : > { %5300 = vmatmul.msk.bf16.gmra.mxu3 %vm875_vm0, %v5494_v8  ;;  %v1673_v8 = vmax.f32 %v1128_v47, 0.0 }
 0x18d   : > { %v6012_v40 = vpop.f32.mrf.mxu2 }
 0x190   : > { %v1239_v10 = vpop.f32.mrf.mxu1 }
 0x191   : > { %v1240_v17 = vadd.f32 %v5727_v24, %v1239_v10  ;;  %v1132_v10 = vpop.f32.mrf.mxu0 }
 0x193   : > { %v1718_v22 = vmax.f32 %v1240_v17, 0.0 }
 0x195   : > { %v5989_v31 = vpack.c.bf16 %v1718_v22, %v1717_v21 }
 0x198   : > { %v1242_v32 = vpop.f32.mrf.mxu1 }
 0x199   : > { %v1243_v38 = vadd.f32 %v5727_v24, %v1242_v32  ;;  %v1134_v43 = vpop.f32.mrf.mxu0 }
 0x19b   : > { %1956 = vmatmul.bf16.gmra.mxu1 %v1788_v36  ;;  %v1719_v52 = vmax.f32 %v1243_v38, 0.0  ;;  %v6019_v38 = vpop.f32.mrf.mxu2 }
 0x1a0   : > { %v1244_v11 = vpop.f32.mrf.mxu1 }
 0x1a1   : > { %v1245_v50 = vadd.f32 %v5727_v24, %v1244_v11  ;;  %v5495_v11 = vld [vmem:[%s5679_s12 + $0x1d0] sm:$0xff] }
 0x1a2   : > { %5301 = vmatmul.msk.bf16.gmra.mxu3 %vm875_vm0, %v5495_v11  ;;  %v1135_v11 = vadd.f32 %v5727_v24, %v1134_v43 }
 0x1a3   : > { %v1720_v56 = vmax.f32 %v1245_v50, 0.0  ;;  %v1130_v50 = vadd.f32 %v5727_v24, %v1129_v0  ;;  %v6030_v58 = vpop.f32.mrf.mxu2 }
 0x1a5   : > { %v6004_v61 = vpack.c.bf16 %v1720_v56, %v1719_v52  ;;  %v1674_v7 = vmax.f32 %v1130_v50, 0.0 }
 0x1a7   : > { %v1791_v14 = vpack.c.bf16 %v1674_v7, %v1673_v8  ;;  %v1676_v8 = vmax.f32 %v1135_v11, 0.0 }
 0x1a8   : > { %v1922_v1 = vpop.f32.mrf.mxu1 }
 0x1a9   : > { %v1923_v46 = vadd.f32 %v6009_v34, %v1922_v1  ;;  %v6035_v1 = vld [vmem:[%s7164_s9 + $0x38] sm:$0xff] }
 0x1aa   : > { %4448 = vmatpush.bf16.msrb.mxu0 %v6035_v1 }
 0x1ab   : > { %1961 = vmatmul.bf16.gmra.mxu1 %v1789_v41  ;;  %v2498_v21 = vmax.f32 %v1923_v46, 0.0  ;;  %v1137_v41 = vpop.f32.mrf.mxu0  ;;  %v1327_v46 = vpop.f32.mrf.mxu3 }
 0x1ac   : > { %v1328_v15 = vadd.f32 %v5727_v24, %v1327_v46 }
 0x1b0   : > { %v1924_v9 = vpop.f32.mrf.mxu1 }
 0x1b1   : > { %v1925_v17 = vadd.f32 %v6009_v34, %v1924_v9 }
 0x1b3   : > { %v2499_v22 = vmax.f32 %v1925_v17, 0.0  ;;  %v1329_v17 = vpop.f32.mrf.mxu3  ;;  %v1139_v27 = vpop.f32.mrf.mxu0 }
 0x1b4   : > { %v1330_v25 = vadd.f32 %v5727_v24, %v1329_v17 }
 0x1b5   : > { %v2626_v32 = vpack.c.bf16 %v2499_v22, %v2498_v21  ;;  %v6039_v21 = vpop.f32.mrf.mxu2  ;;  %v1753_v22 = vmax.f32 %v1328_v15, 0.0 }
 0x1b7   : > { %2766 = vmatmul.bf16.vlgmr.msrb.gmra.mxu2 %v2626_v32 }
 0x1b8   : > { %v1927_v36 = vpop.f32.mrf.mxu1 }
 0x1b9   : > { %v1928_v19 = vadd.f32 %v6009_v34, %v1927_v36  ;;  %v1754_v36 = vmax.f32 %v1330_v25, 0.0 }
 0x1bb   : > { %1966 = vmatmul.bf16.gmra.mxu1 %v1790_v13  ;;  %v2500_v56 = vmax.f32 %v1928_v19, 0.0  ;;  %v5496_v13 = vld [vmem:[%s5679_s12 + $0x1d8] sm:$0xff]  ;;  %v1133_v19 = vadd.f32 %v5727_v24, %v1132_v10  ;;  %v6048_v47 = vpack.c.bf16 %v1754_v36, %v1753_v22  ;;  %v5497_v36 = vld [vmem:[%s5679_s12 + $0x1e0] sm:$0xff] }
 0x1bc   : > { %5302 = vmatmul.msk.bf16.gmra.mxu3 %vm875_vm0, %v5496_v13 }
 0x1bd   : > { %v1675_v46 = vmax.f32 %v1133_v19, 0.0  ;;  %v6053_v10 = vpop.f32.mrf.mxu2  ;;  %v1140_v19 = vadd.f32 %v5727_v24, %v1139_v27 }
 0x1c0   : > { %v1929_v42 = vpop.f32.mrf.mxu1 }
 0x1c1   : > { %v1930_v52 = vadd.f32 %v6009_v34, %v1929_v42 }
 0x1c3   : > { %v2501_v57 = vmax.f32 %v1930_v52, 0.0 }
 0x1c5   : > { %v2627_v9 = vpack.c.bf16 %v2501_v57, %v2500_v56  ;;  %v5523_v56 = vld [vmem:[%s7162_s7 + $0x10] sm:$0xff]  ;;  %v1332_v57 = vpop.f32.mrf.mxu3 }
 0x1c6   : > { %3608 = vmatpush.bf16.msrb.mxu3 %v5523_v56 }
 0x1c7   : > { %2771 = vmatmul.bf16.gmra.mxu2 %v2627_v9  ;;  %v1142_v9 = vpop.f32.mrf.mxu0 }
 0x1c8   : > { %v1932_v0 = vpop.f32.mrf.mxu1 }
 0x1c9   : > { %v1933_v32 = vadd.f32 %v6009_v34, %v1932_v0  ;;  %v1792_v0 = vpack.c.bf16 %v1676_v8, %v1675_v46  ;;  %v6070_v46 = vld [vmem:[%s7164_s9 + $0x30] sm:$0xff]  ;;  %v1678_v8 = vmax.f32 %v1140_v19, 0.0 }
 0x1ca   : > { %4449 = vmatpush.bf16.msrb.mxu0 %v6070_v46 }
 0x1cb   : > { %1971 = vmatmul.bf16.gmra.mxu1 %v1791_v14  ;;  %v2502_v50 = vmax.f32 %v1933_v32, 0.0  ;;  %v1333_v14 = vadd.f32 %v5727_v24, %v1332_v57 }
 0x1cc   : > { %5303 = vmatmul.msk.bf16.gmra.mxu3 %vm875_vm0, %v5497_v36  ;;  %v1143_v36 = vadd.f32 %v5727_v24, %v1142_v9 }
 0x1cd   : > { %v1334_v15 = vpop.f32.mrf.mxu3  ;;  %v1755_v17 = vmax.f32 %v1333_v14, 0.0 }
 0x1ce   : > { %v1335_v22 = vadd.f32 %v5727_v24, %v1334_v15 }
 0x1d0   : > { %v1934_v49 = vpop.f32.mrf.mxu1  ;;  %v1756_v32 = vmax.f32 %v1335_v22, 0.0 }
 0x1d1   : > { %v1935_v42 = vadd.f32 %v6009_v34, %v1934_v49  ;;  %v1138_v49 = vadd.f32 %v5727_v24, %v1137_v41 }
 0x1d3   : > { %v2503_v52 = vmax.f32 %v1935_v42, 0.0  ;;  %v6062_v42 = vpop.f32.mrf.mxu2  ;;  %v1677_v27 = vmax.f32 %v1138_v49, 0.0 }
 0x1d5   : > { %v2628_v7 = vpack.c.bf16 %v2503_v52, %v2502_v50  ;;  %v6065_v50 = vpack.c.bf16 %v1756_v32, %v1755_v17  ;;  %v1144_v52 = vpop.f32.mrf.mxu0  ;;  %v6072_v41 = vpop.f32.mrf.mxu3 }
 0x1d6   : > { %7168 = vst [vmem:[#allocation3_spill] sm:$0xff] %v6072_v41 }
 0x1d7   : > { %2776 = vmatmul.bf16.gmra.mxu2 %v2628_v7  ;;  %7167 = vst [vmem:[#allocation2_spill] sm:$0xff] %v6065_v50 }
 0x1d8   : > { %v1937_v43 = vpop.f32.mrf.mxu1 }
 0x1d9   : > { %v1938_v25 = vadd.f32 %v6009_v34, %v1937_v43 }
 0x1db   : > { %1976 = vmatmul.bf16.gmra.mxu1 %v1792_v0  ;;  %v2504_v56 = vmax.f32 %v1938_v25, 0.0  ;;  %v1793_v0 = vpack.c.bf16 %v1678_v8, %v1677_v27  ;;  %v6075_v14 = vpop.f32.mrf.mxu2  ;;  %v5498_v25 = vld [vmem:[%s5679_s12 + $0x1e8] sm:$0xff]  ;;  %v1679_v27 = vmax.f32 %v1143_v36, 0.0 }
 0x1dc   : > { %5304 = vmatmul.msk.bf16.gmra.mxu3 %vm875_vm0, %v5498_v25 }
 0x1dd   : > { %v1147_v15 = vpop.f32.mrf.mxu0  ;;  %v6077_v17 = vpop.f32.mrf.mxu3 }
 0x1de   : > { %7169 = vst [vmem:[#allocation4_spill] sm:$0xff] %v6077_v17  ;;  %v1148_v36 = vadd.f32 %v5727_v24, %v1147_v15 }
 0x1e0   : > { %v1939_v13 = vpop.f32.mrf.mxu1 }
 0x1e1   : > { %v1940_v11 = vadd.f32 %v6009_v34, %v1939_v13  ;;  %v1145_v13 = vadd.f32 %v5727_v24, %v1144_v52 }
 0x1e3   : > { %v2505_v57 = vmax.f32 %v1940_v11, 0.0  ;;  %v1680_v8 = vmax.f32 %v1145_v13, 0.0 }
 0x1e5   : > { %v2629_v7 = vpack.c.bf16 %v2505_v57, %v2504_v56  ;;  %v5522_v56 = vld [vmem:[%s7162_s7 + $0x8] sm:$0xff]  ;;  %v6088_v57 = vpop.f32.mrf.mxu3  ;;  %v1149_v9 = vpop.f32.mrf.mxu0 }
 0x1e6   : > { %7170 = vst [vmem:[#allocation5_spill] sm:$0xff] %v6088_v57  ;;  %3609 = vmatpush.bf16.msrb.mxu3 %v5522_v56  ;;  %v1150_v13 = vadd.f32 %v5727_v24, %v1149_v9 }
 0x1e7   : > { %2781 = vmatmul.bf16.gmra.mxu2 %v2629_v7 }
 0x1e8   : > { %v1942_v43 = vpop.f32.mrf.mxu1 }
 0x1e9   : > { %v1943_v22 = vadd.f32 %v6009_v34, %v1942_v43  ;;  %v6090_v43 = vpop.f32.mrf.mxu2 }
 0x1eb   : > { %1981 = vmatmul.bf16.gmra.mxu1 %v1793_v0  ;;  %v2506_v19 = vmax.f32 %v1943_v22, 0.0  ;;  %v1794_v0 = vpack.c.bf16 %v1680_v8, %v1679_v27  ;;  %v5534_v27 = vld [vmem:[%s7164_s9 + $0x28] sm:$0xff]  ;;  %v1681_v8 = vmax.f32 %v1148_v36, 0.0  ;;  %v5500_v36 = vld [vmem:[%s5679_s12 + $0x1f8] sm:$0xff] }
 0x1ec   : > { %4450 = vmatpush.bf16.msrb.mxu0 %v5534_v27 }
 0x1ed   : > { %v6092_v22 = vpop.f32.mrf.mxu3  ;;  %v1152_v57 = vpop.f32.mrf.mxu0 }
 0x1ee   : > { %7171 = vst [vmem:[#allocation6_spill] sm:$0xff] %v6092_v22 }
 0x1f0   : > { %v1944_v32 = vpop.f32.mrf.mxu1 }
 0x1f1   : > { %v1945_v49 = vadd.f32 %v6009_v34, %v1944_v32  ;;  %v6095_v32 = vpop.f32.mrf.mxu2 }
 0x1f3   : > { %v2507_v11 = vmax.f32 %v1945_v49, 0.0  ;;  %v5499_v49 = vld [vmem:[%s5679_s12 + $0x1f0] sm:$0xff] }
 0x1f4   : > { %5305 = vmatmul.msk.bf16.gmra.mxu3 %vm875_vm0, %v5499_v49 }
 0x1f5   : > { %v2630_v7 = vpack.c.bf16 %v2507_v11, %v2506_v19 }
 0x1f7   : > { %2786 = vmatmul.bf16.gmra.mxu2 %v2630_v7  ;;  %v1682_v7 = vmax.f32 %v1150_v13, 0.0 }
 0x1f8   : > { %v1947_v52 = vpop.f32.mrf.mxu1 }
 0x1f9   : > { %v1948_v25 = vadd.f32 %v6009_v34, %v1947_v52  ;;  %v1795_v9 = vpack.c.bf16 %v1682_v7, %v1681_v8  ;;  %v6107_v22 = vpop.f32.mrf.mxu2 }
 0x1fb   : > { %1986 = vmatmul.bf16.gmra.mxu1 %v1794_v0  ;;  %v2508_v11 = vmax.f32 %v1948_v25, 0.0  ;;  %v6105_v0 = vpop.f32.mrf.mxu3  ;;  %v5521_v25 = vld [vmem:[%s7162_s7] sm:$0xff] }
 0x1fc   : > { %7172 = vst [vmem:[#allocation7_spill] sm:$0xff] %v6105_v0  ;;  %3610 = vmatpush.bf16.msrb.mxu3 %v5521_v25 }
 0x200   : > { %v1949_v17 = vpop.f32.mrf.mxu1  ;;  %5549 = vmatpush.bf16.msra.mxu3 %v6035_v1 }
 0x201   : > { %v1950_v19 = vadd.f32 %v6009_v34, %v1949_v17  ;;  %v1154_v17 = vpop.f32.mrf.mxu0 }
 0x203   : > { %v2509_v56 = vmax.f32 %v1950_v19, 0.0  ;;  %v6115_v19 = vpop.f32.mrf.mxu3 }
 0x204   : > { %7173 = vst [vmem:[#allocation8_spill] sm:$0xff] %v6115_v19  ;;  %5306 = vmatmul.msk.bf16.gmra.mxu3 %vm875_vm0, %v5500_v36  ;;  %v6132_v36 = vld [vmem:[%s7157_s2] ss:$0 sm:$0xff] }
 0x205   : > { %v2631_v52 = vpack.c.bf16 %v2509_v56, %v2508_v11  ;;  %v1153_v11 = vadd.f32 %v5727_v24, %v1152_v57  ;;  %v1155_v56 = vadd.f32 %v5727_v24, %v1154_v17  ;;  %5550 = vmatpush.bf16.msra.mxu3 %v6070_v46 }
 0x207   : > { %2791 = vmatmul.bf16.gmra.mxu2 %v2631_v52  ;;  %v1684_v25 = vmax.f32 %v1155_v56, 0.0 }
 0x208   : > { %v1952_v15 = vpop.f32.mrf.mxu1 }
 0x209   : > { %v1953_v49 = vadd.f32 %v6009_v34, %v1952_v15  ;;  %v1157_v1 = vpop.f32.mrf.mxu0  ;;  %v1683_v15 = vmax.f32 %v1153_v11, 0.0  ;;  %5551 = vmatpush.bf16.msra.mxu3 %v5534_v27 }
 0x20b   : > { %1991 = vmatmul.bf16.gmra.mxu1 %v1795_v9  ;;  %v2510_v7 = vmax.f32 %v1953_v49, 0.0  ;;  %v6122_v9 = vpop.f32.mrf.mxu2  ;;  %v1796_v57 = vpack.c.bf16 %v1684_v25, %v1683_v15  ;;  %v6124_v41 = vpop.f32.mrf.mxu3 }
 0x20c   : > { %7174 = vst [vmem:[#allocation9_spill] sm:$0xff] %v6124_v41 }
 0x210   : > { %v1954_v13 = vpop.f32.mrf.mxu1 }
 0x211   : > { %v1955_v8 = vadd.f32 %v6009_v34, %v1954_v13  ;;  %v1159_v17 = vpop.f32.mrf.mxu0  ;;  %v1158_v13 = vadd.f32 %v6132_v36, %v1157_v1 }
 0x212   : > { %v1160_v27 = vadd.f32 %v6132_v36, %v1159_v17 }
 0x213   : > { %v2511_v52 = vmax.f32 %v1955_v8, 0.0  ;;  %v6126_v24 = vpop.f32.mrf.mxu2  ;;  %v6137_v8 = vpop.f32.mrf.mxu3 }
 0x214   : > { %7175 = vst [vmem:[#allocation10_spill] sm:$0xff] %v6137_v8 }
 0x215   : > { %v2632_v0 = vpack.c.bf16 %v2511_v52, %v2510_v7  ;;  %v1685_v7 = vmax.f32 %v1158_v13, 0.0  ;;  %v1686_v52 = vmax.f32 %v1160_v27, 0.0 }
 0x217   : > { %2796 = vmatmul.bf16.gmra.mxu2 %v2632_v0  ;;  %v1797_v1 = vpack.c.bf16 %v1686_v52, %v1685_v7  ;;  %v6156_v52 = vld [vmem:[%s7161_s6] ss:$0 sm:$0xff] }
 0x218   : > { %v1957_v19 = vpop.f32.mrf.mxu1 }
 0x219   : > { %v1958_v46 = vadd.f32 %v6009_v34, %v1957_v19  ;;  %v5533_v19 = vld [vmem:[%s7164_s9 + $0x20] sm:$0xff] }
 0x21a   : > { %4451 = vmatpush.bf16.msrb.mxu0 %v5533_v19  ;;  %5552 = vmatpush.bf16.msra.mxu3 %v5533_v19 }
 0x21b   : > { %1996 = vmatmul.bf16.gmra.mxu1 %v1796_v57  ;;  %v2512_v11 = vmax.f32 %v1958_v46, 0.0  ;;  %v6142_v25 = vpop.f32.mrf.mxu2  ;;  %v6144_v17 = vpop.f32.mrf.mxu3 }
 0x21c   : > { %7176 = vst [vmem:[#allocation11_spill] sm:$0xff] %v6144_v17 }
 0x220   : > { %v1959_v49 = vpop.f32.mrf.mxu1 }
 0x221   : > { %v1960_v0 = vadd.f32 %v6009_v34, %v1959_v49 }
 0x223   : > { %v2513_v56 = vmax.f32 %v1960_v0, 0.0  ;;  %v6148_v27 = vpop.f32.mrf.mxu2  ;;  %v6150_v8 = vpop.f32.mrf.mxu3 }
 0x224   : > { %7177 = vst [vmem:[#allocation12_spill] sm:$0xff] %v6150_v8 }
 0x225   : > { %v2633_v15 = vpack.c.bf16 %v2513_v56, %v2512_v11 }
 0x227   : > { %2801 = vmatmul.bf16.gmra.mxu2 %v2633_v15 }
 0x228   : > { %v1962_v57 = vpop.f32.mrf.mxu1 }
 0x229   : > { %v1963_v46 = vadd.f32 %v6009_v34, %v1962_v57 }
 0x22b   : > { %2001 = vmatmul.bf16.gmra.mxu1 %v1797_v1  ;;  %v2514_v0 = vmax.f32 %v1963_v46, 0.0 }
 0x230   : > { %v1964_v49 = vpop.f32.mrf.mxu1 }
 0x231   : > { %v1965_v13 = vadd.f32 %v6009_v34, %v1964_v49 }
 0x233   : > { %v2515_v11 = vmax.f32 %v1965_v13, 0.0  ;;  %v6161_v13 = vpop.f32.mrf.mxu3 }
 0x234   : > { %7178 = vst [vmem:[#allocation13_spill] sm:$0xff] %v6161_v13 }
 0x235   : > { %v2634_v56 = vpack.c.bf16 %v2515_v11, %v2514_v0 }
 0x237   : > { %2806 = vmatmul.bf16.gmra.mxu2 %v2634_v56 }
 0x238   : > { %v1967_v15 = vpop.f32.mrf.mxu1 }
 0x239   : > { %v1968_v19 = vadd.f32 %v6009_v34, %v1967_v15 }
 0x23a   : > { %v2767_v7 = vpop.f32.mrf.mxu2 }
 0x23b   : > { %2006 = vmatmul.bf16.gmra.mxu1 %v5739_v33  ;;  %v2768_v1 = vadd.f32 %v6156_v52, %v2767_v7  ;;  %v2516_v0 = vmax.f32 %v1968_v19, 0.0  ;;  %v5532_v7 = vld [vmem:[%s7164_s9 + $0x18] sm:$0xff] }
 0x23c   : > { %4452 = vmatpush.bf16.msrb.mxu0 %v5532_v7  ;;  %5553 = vmatpush.bf16.msra.mxu3 %v5532_v7 }
 0x23d   : > { %v3343_v33 = vmax.f32 %v2768_v1, 0.0 }
 0x240   : > { %v1969_v57 = vpop.f32.mrf.mxu1 }
 0x241   : > { %v1970_v46 = vadd.f32 %v6009_v34, %v1969_v57  ;;  %v6168_v57 = vpop.f32.mrf.mxu3 }
 0x242   : > { %v2769_v49 = vpop.f32.mrf.mxu2  ;;  %7179 = vst [vmem:[#allocation14_spill] sm:$0xff] %v6168_v57 }
 0x243   : > { %v2517_v11 = vmax.f32 %v1970_v46, 0.0  ;;  %v2770_v56 = vadd.f32 %v6156_v52, %v2769_v49 }
 0x245   : > { %v3344_v8 = vmax.f32 %v2770_v56, 0.0  ;;  %v2635_v17 = vpack.c.bf16 %v2517_v11, %v2516_v0 }
 0x247   : > { %v3471_v41 = vpack.c.bf16 %v3344_v8, %v3343_v33  ;;  %2811 = vmatmul.bf16.gmra.mxu2 %v2635_v17 }
 0x248   : > { %v1972_v50 = vpop.f32.mrf.mxu1 }
 0x249   : > { %3611 = vmatmul.bf16.vlgmr.msrb.gmra.mxu3 %v3471_v41  ;;  %v1973_v19 = vadd.f32 %v6009_v34, %v1972_v50  ;;  %v6174_v33 = vpop.f32.mrf.mxu3 }
 0x24a   : > { %v2772_v15 = vpop.f32.mrf.mxu2 }
 0x24b   : > { %2011 = vmatmul.bf16.gmra.mxu1 %v5752_v44  ;;  %v2773_v46 = vadd.f32 %v6156_v52, %v2772_v15  ;;  %v2518_v41 = vmax.f32 %v1973_v19, 0.0 }
 0x24d   : > { %v3345_v0 = vmax.f32 %v2773_v46, 0.0 }
 0x250   : > { %v1974_v1 = vpop.f32.mrf.mxu1 }
 0x251   : > { %v1975_v8 = vadd.f32 %v6009_v34, %v1974_v1  ;;  %v6178_v13 = vpop.f32.mrf.mxu3 }
 0x252   : > { %v2774_v17 = vpop.f32.mrf.mxu2 }
 0x253   : > { %v2519_v49 = vmax.f32 %v1975_v8, 0.0  ;;  %v2775_v44 = vadd.f32 %v6156_v52, %v2774_v17 }
 0x255   : > { %v3346_v11 = vmax.f32 %v2775_v44, 0.0  ;;  %v2636_v56 = vpack.c.bf16 %v2519_v49, %v2518_v41 }
 0x257   : > { %2816 = vmatmul.bf16.gmra.mxu2 %v2636_v56  ;;  %v3472_v57 = vpack.c.bf16 %v3346_v11, %v3345_v0 }
 0x258   : > { %v1977_v7 = vpop.f32.mrf.mxu1 }
 0x259   : > { %3616 = vmatmul.bf16.gmra.mxu3 %v3472_v57  ;;  %v1978_v15 = vadd.f32 %v6009_v34, %v1977_v7  ;;  %v6183_v7 = vpop.f32.mrf.mxu3 }
 0x25a   : > { %v2777_v50 = vpop.f32.mrf.mxu2 }
 0x25b   : > { %2016 = vmatmul.bf16.gmra.mxu1 %v5765_v55  ;;  %v2778_v19 = vadd.f32 %v6156_v52, %v2777_v50  ;;  %v2520_v17 = vmax.f32 %v1978_v15, 0.0  ;;  %v5531_v50 = vld [vmem:[%s7164_s9 + $0x10] sm:$0xff] }
 0x25c   : > { %4453 = vmatpush.bf16.msrb.mxu0 %v5531_v50  ;;  %5554 = vmatpush.bf16.msra.mxu3 %v5531_v50 }
 0x25d   : > { %v3347_v44 = vmax.f32 %v2778_v19, 0.0 }
 0x260   : > { %v1979_v1 = vpop.f32.mrf.mxu1 }
 0x261   : > { %v1980_v46 = vadd.f32 %v6009_v34, %v1979_v1 }
 0x262   : > { %v2779_v8 = vpop.f32.mrf.mxu2 }
 0x263   : > { %v2521_v41 = vmax.f32 %v1980_v46, 0.0  ;;  %v2780_v49 = vadd.f32 %v6156_v52, %v2779_v8 }
 0x265   : > { %v3348_v0 = vmax.f32 %v2780_v49, 0.0  ;;  %v2637_v57 = vpack.c.bf16 %v2521_v41, %v2520_v17 }
 0x267   : > { %2821 = vmatmul.bf16.gmra.mxu2 %v2637_v57  ;;  %v3473_v11 = vpack.c.bf16 %v3348_v0, %v3347_v44  ;;  %v6193_v44 = vpop.f32.mrf.mxu3 }
 0x268   : > { %v1982_v55 = vpop.f32.mrf.mxu1  ;;  %7180 = vst [vmem:[#allocation15_spill] sm:$0xff] %v6193_v44 }
 0x269   : > { %3621 = vmatmul.bf16.gmra.mxu3 %v3473_v11  ;;  %v1983_v15 = vadd.f32 %v6009_v34, %v1982_v55 }
 0x26a   : > { %v2782_v56 = vpop.f32.mrf.mxu2 }
 0x26b   : > { %2021 = vmatmul.bf16.gmra.mxu1 %v5778_v2  ;;  %v2783_v19 = vadd.f32 %v6156_v52, %v2782_v56  ;;  %v2522_v17 = vmax.f32 %v1983_v15, 0.0 }
 0x26d   : > { %v3349_v2 = vmax.f32 %v2783_v19, 0.0 }
 0x26f   : > { %v6196_v56 = vpop.f32.mrf.mxu3 }
 0x270   : > { %v1984_v1 = vpop.f32.mrf.mxu1 }
 0x271   : > { %v1985_v46 = vadd.f32 %v6009_v34, %v1984_v1 }
 0x272   : > { %v2784_v8 = vpop.f32.mrf.mxu2 }
 0x273   : > { %v2523_v41 = vmax.f32 %v1985_v46, 0.0  ;;  %v2785_v49 = vadd.f32 %v6156_v52, %v2784_v8 }
 0x275   : > { %v3350_v0 = vmax.f32 %v2785_v49, 0.0  ;;  %v2638_v57 = vpack.c.bf16 %v2523_v41, %v2522_v17 }
 0x277   : > { %2826 = vmatmul.bf16.gmra.mxu2 %v2638_v57  ;;  %v3474_v11 = vpack.c.bf16 %v3350_v0, %v3349_v2 }
 0x278   : > { %v1987_v55 = vpop.f32.mrf.mxu1 }
 0x279   : > { %3626 = vmatmul.bf16.gmra.mxu3 %v3474_v11  ;;  %v1988_v1 = vadd.f32 %v6009_v34, %v1987_v55  ;;  %v6202_v11 = vpop.f32.mrf.mxu3 }
 0x27a   : > { %v2787_v50 = vpop.f32.mrf.mxu2  ;;  %7181 = vst [vmem:[#allocation16_spill] sm:$0xff] %v6202_v11 }
 0x27b   : > { %2026 = vmatmul.bf16.gmra.mxu1 %v5788_v12  ;;  %v2788_v46 = vadd.f32 %v6156_v52, %v2787_v50  ;;  %v2524_v19 = vmax.f32 %v1988_v1, 0.0  ;;  %v5530_v50 = vld [vmem:[%s7164_s9 + $0x8] sm:$0xff] }
 0x27c   : > { %4454 = vmatpush.bf16.msrb.mxu0 %v5530_v50  ;;  %5555 = vmatpush.bf16.msra.mxu3 %v5530_v50 }
 0x27d   : > { %v3351_v41 = vmax.f32 %v2788_v46, 0.0 }
 0x280   : > { %v1989_v15 = vpop.f32.mrf.mxu1 }
 0x281   : > { %v1990_v8 = vadd.f32 %v6009_v34, %v1989_v15 }
 0x282   : > { %v2789_v44 = vpop.f32.mrf.mxu2 }
 0x283   : > { %v2525_v49 = vmax.f32 %v1990_v8, 0.0  ;;  %v2790_v17 = vadd.f32 %v6156_v52, %v2789_v44 }
 0x285   : > { %v3352_v2 = vmax.f32 %v2790_v17, 0.0  ;;  %v2639_v0 = vpack.c.bf16 %v2525_v49, %v2524_v19  ;;  %v6211_v19 = vpop.f32.mrf.mxu3 }
 0x286   : > { %7182 = vst [vmem:[#allocation17_spill] sm:$0xff] %v6211_v19 }
 0x287   : > { %2831 = vmatmul.bf16.gmra.mxu2 %v2639_v0  ;;  %v3475_v57 = vpack.c.bf16 %v3352_v2, %v3351_v41 }
 0x288   : > { %v1992_v12 = vpop.f32.mrf.mxu1 }
 0x289   : > { %3631 = vmatmul.bf16.gmra.mxu3 %v3475_v57  ;;  %v1993_v1 = vadd.f32 %v6009_v34, %v1992_v12 }
 0x28a   : > { %v2792_v55 = vpop.f32.mrf.mxu2 }
 0x28b   : > { %2031 = vmatmul.bf16.gmra.mxu1 %v5804_v26  ;;  %v2793_v15 = vadd.f32 %v6156_v52, %v2792_v55  ;;  %v2526_v49 = vmax.f32 %v1993_v1, 0.0 }
 0x28d   : > { %v3353_v41 = vmax.f32 %v2793_v15, 0.0  ;;  %v6215_v55 = vpop.f32.mrf.mxu3 }
 0x28e   : > { %7183 = vst [vmem:[#allocation18_spill] sm:$0xff] %v6215_v55 }
 0x290   : > { %v1994_v44 = vpop.f32.mrf.mxu1 }
 0x291   : > { %v1995_v46 = vadd.f32 %v6009_v34, %v1994_v44 }
 0x292   : > { %v2794_v8 = vpop.f32.mrf.mxu2 }
 0x293   : > { %v2527_v17 = vmax.f32 %v1995_v46, 0.0  ;;  %v2795_v26 = vadd.f32 %v6156_v52, %v2794_v8 }
 0x295   : > { %v3354_v2 = vmax.f32 %v2795_v26, 0.0  ;;  %v2640_v0 = vpack.c.bf16 %v2527_v17, %v2526_v49 }
 0x297   : > { %2836 = vmatmul.bf16.gmra.mxu2 %v2640_v0  ;;  %v3476_v57 = vpack.c.bf16 %v3354_v2, %v3353_v41  ;;  %v6221_v0 = vpop.f32.mrf.mxu3 }
 0x298   : > { %v1997_v12 = vpop.f32.mrf.mxu1  ;;  %7184 = vst [vmem:[#allocation19_spill] sm:$0xff] %v6221_v0 }
 0x299   : > { %3636 = vmatmul.bf16.gmra.mxu3 %v3476_v57  ;;  %v1998_v44 = vadd.f32 %v6009_v34, %v1997_v12 }
 0x29a   : > { %v2797_v50 = vpop.f32.mrf.mxu2 }
 0x29b   : > { %2036 = vmatmul.bf16.gmra.mxu1 %v5814_v39  ;;  %v2798_v1 = vadd.f32 %v6156_v52, %v2797_v50  ;;  %v2528_v15 = vmax.f32 %v1998_v44, 0.0 }
 0x29d   : > { %v3355_v17 = vmax.f32 %v2798_v1, 0.0 }
 0x29f   : > { %v6228_v44 = vpop.f32.mrf.mxu3 }
 0x2a0   : > { %v1999_v11 = vpop.f32.mrf.mxu1  ;;  %7185 = vst [vmem:[#allocation20_spill] sm:$0xff] %v6228_v44 }
 0x2a1   : > { %v2000_v46 = vadd.f32 %v6009_v34, %v1999_v11  ;;  %v5529_v11 = vld [vmem:[%s7164_s9] sm:$0xff] }
 0x2a2   : > { %v2799_v8 = vpop.f32.mrf.mxu2  ;;  %4455 = vmatpush.bf16.msrb.mxu0 %v5529_v11  ;;  %5556 = vmatpush.bf16.msra.mxu3 %v5529_v11 }
 0x2a3   : > { %v2529_v26 = vmax.f32 %v2000_v46, 0.0  ;;  %v2800_v49 = vadd.f32 %v6156_v52, %v2799_v8 }
 0x2a5   : > { %v3356_v41 = vmax.f32 %v2800_v49, 0.0  ;;  %v2641_v2 = vpack.c.bf16 %v2529_v26, %v2528_v15 }
 0x2a7   : > { %2841 = vmatmul.bf16.gmra.mxu2 %v2641_v2  ;;  %v3477_v39 = vpack.c.bf16 %v3356_v41, %v3355_v17  ;;  %v6233_v44 = vpop.f32.mrf.mxu3 }
 0x2a8   : > { %v2002_v57 = vpop.f32.mrf.mxu1  ;;  %7186 = vst [vmem:[#allocation21_spill] sm:$0xff] %v6233_v44 }
 0x2a9   : > { %3641 = vmatmul.bf16.gmra.mxu3 %v3477_v39  ;;  %v2003_v50 = vadd.f32 %v6009_v34, %v2002_v57 }
 0x2aa   : > { %v2802_v12 = vpop.f32.mrf.mxu2 }
 0x2ab   : > { %2041 = vmatmul.bf16.gmra.mxu1 %v5829_v54  ;;  %v2803_v46 = vadd.f32 %v6156_v52, %v2802_v12  ;;  %v2530_v26 = vmax.f32 %v2003_v50, 0.0 }
 0x2ad   : > { %v3357_v17 = vmax.f32 %v2803_v46, 0.0 }
 0x2b0   : > { %v2004_v1 = vpop.f32.mrf.mxu1 }
 0x2b1   : > { %v2005_v8 = vadd.f32 %v6009_v34, %v2004_v1 }
 0x2b2   : > { %v2804_v15 = vpop.f32.mrf.mxu2 }
 0x2b3   : > { %v2531_v49 = vmax.f32 %v2005_v8, 0.0  ;;  %v2805_v54 = vadd.f32 %v6156_v52, %v2804_v15 }
 0x2b5   : > { %v3358_v41 = vmax.f32 %v2805_v54, 0.0  ;;  %v2642_v2 = vpack.c.bf16 %v2531_v49, %v2530_v26  ;;  %v6240_v49 = vpop.f32.mrf.mxu3 }
 0x2b6   : > { %7187 = vst [vmem:[#allocation22_spill] sm:$0xff] %v6240_v49 }
 0x2b7   : > { %2846 = vmatmul.bf16.gmra.mxu2 %v2642_v2  ;;  %v3478_v39 = vpack.c.bf16 %v3358_v41, %v3357_v17 }
 0x2b8   : > { %v2007_v57 = vpop.f32.mrf.mxu1 }
 0x2b9   : > { %3646 = vmatmul.bf16.gmra.mxu3 %v3478_v39  ;;  %v2008_v12 = vadd.f32 %v6009_v34, %v2007_v57 }
 0x2ba   : > { %v2807_v0 = vpop.f32.mrf.mxu2 }
 0x2bb   : > { %2046 = vmatmul.bf16.gmra.mxu1 %v5849_v16  ;;  %v2808_v50 = vadd.f32 %v6156_v52, %v2807_v0  ;;  %v2532_v46 = vmax.f32 %v2008_v12, 0.0  ;;  %v6247_v12 = vld [vmem:[%s7163_s8] ss:$0 sm:$0xff] }
 0x2bd   : > { %v3359_v54 = vmax.f32 %v2808_v50, 0.0 }
 0x2c0   : > { %v2009_v11 = vpop.f32.mrf.mxu1 }
 0x2c1   : > { %v2010_v1 = vadd.f32 %v6009_v34, %v2009_v11 }
 0x2c2   : > { %v2809_v8 = vpop.f32.mrf.mxu2 }
 0x2c3   : > { %v2533_v15 = vmax.f32 %v2010_v1, 0.0  ;;  %v2810_v26 = vadd.f32 %v6156_v52, %v2809_v8 }
 0x2c5   : > { %v3360_v17 = vmax.f32 %v2810_v26, 0.0  ;;  %v2643_v41 = vpack.c.bf16 %v2533_v15, %v2532_v46 }
 0x2c7   : > { %2851 = vmatmul.bf16.gmra.mxu2 %v2643_v41  ;;  %v3479_v2 = vpack.c.bf16 %v3360_v17, %v3359_v54 }
 0x2c8   : > { %v2012_v16 = vpop.f32.mrf.mxu1 }
 0x2c9   : > { %3651 = vmatmul.bf16.gmra.mxu3 %v3479_v2  ;;  %v2013_v57 = vadd.f32 %v6009_v34, %v2012_v16 }
 0x2ca   : > { %v2812_v39 = vpop.f32.mrf.mxu2 }
 0x2cb   : > { %2051 = vmatmul.bf16.gmra.mxu1 %v5870_v37  ;;  %v2813_v50 = vadd.f32 %v6156_v52, %v2812_v39  ;;  %v2534_v46 = vmax.f32 %v2013_v57, 0.0 }
 0x2cc   : > { %v3612_v0 = vpop.f32.mrf.mxu3 }
 0x2cd   : > { %v3613_v15 = vadd.f32 %v6247_v12, %v3612_v0  ;;  %v3361_v17 = vmax.f32 %v2813_v50, 0.0 }
 0x2cf   : > { %v4188_v49 = vmax.f32 %v3613_v15, 0.0 }
 0x2d0   : > { %v2014_v11 = vpop.f32.mrf.mxu1 }
 0x2d1   : > { %v2015_v1 = vadd.f32 %v6009_v34, %v2014_v11 }
 0x2d2   : > { %v2814_v8 = vpop.f32.mrf.mxu2 }
 0x2d3   : > { %v2535_v26 = vmax.f32 %v2015_v1, 0.0  ;;  %v2815_v37 = vadd.f32 %v6156_v52, %v2814_v8 }
 0x2d4   : > { %v3614_v54 = vpop.f32.mrf.mxu3 }
 0x2d5   : > { %v3362_v41 = vmax.f32 %v2815_v37, 0.0  ;;  %v3615_v2 = vadd.f32 %v6247_v12, %v3614_v54  ;;  %v2644_v16 = vpack.c.bf16 %v2535_v26, %v2534_v46 }
 0x2d7   : > { %v4189_v44 = vmax.f32 %v3615_v2, 0.0  ;;  %2856 = vmatmul.bf16.gmra.mxu2 %v2644_v16  ;;  %v3480_v55 = vpack.c.bf16 %v3362_v41, %v3361_v17 }
 0x2d8   : > { %v2017_v39 = vpop.f32.mrf.mxu1 }
 0x2d9   : > { %v4316_v19 = vpack.c.bf16 %v4189_v44, %v4188_v49  ;;  %3656 = vmatmul.bf16.gmra.mxu3 %v3480_v55  ;;  %v2018_v57 = vadd.f32 %v6009_v34, %v2017_v39 }
 0x2da   : > { %v2817_v11 = vpop.f32.mrf.mxu2 }
 0x2db   : > { %2056 = vmatmul.bf16.gmra.mxu1 %v5892_v51  ;;  %4456 = vmatmul.bf16.vlgmr.msrb.gmra.mxu0 %v4316_v19  ;;  %v2818_v50 = vadd.f32 %v6156_v52, %v2817_v11  ;;  %v2536_v15 = vmax.f32 %v2018_v57, 0.0 }
 0x2dc   : > { %v3617_v0 = vpop.f32.mrf.mxu3 }
 0x2dd   : > { %v3618_v26 = vadd.f32 %v6247_v12, %v3617_v0  ;;  %v3363_v49 = vmax.f32 %v2818_v50, 0.0 }
 0x2df   : > { %v4190_v17 = vmax.f32 %v3618_v26, 0.0 }
 0x2e0   : > { %v2019_v1 = vpop.f32.mrf.mxu1 }
 0x2e1   : > { %v2020_v8 = vadd.f32 %v6009_v34, %v2019_v1 }
 0x2e2   : > { %v2819_v46 = vpop.f32.mrf.mxu2 }
 0x2e3   : > { %v2537_v37 = vmax.f32 %v2020_v8, 0.0  ;;  %v2820_v44 = vadd.f32 %v6156_v52, %v2819_v46 }
 0x2e4   : > { %v3619_v55 = vpop.f32.mrf.mxu3 }
 0x2e5   : > { %v3364_v54 = vmax.f32 %v2820_v44, 0.0  ;;  %v3620_v51 = vadd.f32 %v6247_v12, %v3619_v55  ;;  %v2645_v19 = vpack.c.bf16 %v2537_v37, %v2536_v15 }
 0x2e7   : > { %v4191_v41 = vmax.f32 %v3620_v51, 0.0  ;;  %2861 = vmatmul.bf16.gmra.mxu2 %v2645_v19  ;;  %v3481_v2 = vpack.c.bf16 %v3364_v54, %v3363_v49 }
 0x2e8   : > { %v2022_v16 = vpop.f32.mrf.mxu1 }
 0x2e9   : > { %3661 = vmatmul.bf16.gmra.mxu3 %v3481_v2  ;;  %v4317_v39 = vpack.c.bf16 %v4191_v41, %v4190_v17  ;;  %v2023_v57 = vadd.f32 %v6009_v34, %v2022_v16 }
 0x2ea   : > { %v2822_v11 = vpop.f32.mrf.mxu2 }
 0x2eb   : > { %2061 = vmatmul.bf16.gmra.mxu1 %v5920_v23  ;;  %4461 = vmatmul.bf16.gmra.mxu0 %v4317_v39  ;;  %v2823_v50 = vadd.f32 %v6156_v52, %v2822_v11  ;;  %v2538_v15 = vmax.f32 %v2023_v57, 0.0 }
 0x2ec   : > { %v3622_v0 = vpop.f32.mrf.mxu3 }
 0x2ed   : > { %v3623_v26 = vadd.f32 %v6247_v12, %v3622_v0  ;;  %v3365_v49 = vmax.f32 %v2823_v50, 0.0 }
 0x2ef   : > { %v4192_v19 = vmax.f32 %v3623_v26, 0.0 }
 0x2f0   : > { %v2024_v1 = vpop.f32.mrf.mxu1 }
 0x2f1   : > { %v2025_v8 = vadd.f32 %v6009_v34, %v2024_v1 }
 0x2f2   : > { %v2824_v46 = vpop.f32.mrf.mxu2 }
 0x2f3   : > { %v2539_v37 = vmax.f32 %v2025_v8, 0.0  ;;  %v2825_v44 = vadd.f32 %v6156_v52, %v2824_v46 }
 0x2f4   : > { %v3624_v55 = vpop.f32.mrf.mxu3 }
 0x2f5   : > { %v3366_v54 = vmax.f32 %v2825_v44, 0.0  ;;  %v3625_v23 = vadd.f32 %v6247_v12, %v3624_v55  ;;  %v2646_v51 = vpack.c.bf16 %v2539_v37, %v2538_v15 }
 0x2f7   : > { %v4193_v17 = vmax.f32 %v3625_v23, 0.0  ;;  %2866 = vmatmul.bf16.gmra.mxu2 %v2646_v51  ;;  %v3482_v41 = vpack.c.bf16 %v3366_v54, %v3365_v49 }
 0x2f8   : > { %v2027_v2 = vpop.f32.mrf.mxu1 }
 0x2f9   : > { %3666 = vmatmul.bf16.gmra.mxu3 %v3482_v41  ;;  %v4318_v16 = vpack.c.bf16 %v4193_v17, %v4192_v19  ;;  %v2028_v0 = vadd.f32 %v6009_v34, %v2027_v2 }
 0x2fa   : > { %v2827_v39 = vpop.f32.mrf.mxu2 }
 0x2fb   : > { %2066 = vmatmul.bf16.gmra.mxu1 %v5941_v53  ;;  %4466 = vmatmul.bf16.gmra.mxu0 %v4318_v16  ;;  %v2828_v1 = vadd.f32 %v6156_v52, %v2827_v39  ;;  %v2540_v46 = vmax.f32 %v2028_v0, 0.0 }
 0x2fc   : > { %v3627_v11 = vpop.f32.mrf.mxu3 }
 0x2fd   : > { %v3628_v15 = vadd.f32 %v6247_v12, %v3627_v11  ;;  %v3367_v55 = vmax.f32 %v2828_v1, 0.0 }
 0x2ff   : > { %v4194_v23 = vmax.f32 %v3628_v15, 0.0 }
 0x300   : > { %v2029_v57 = vpop.f32.mrf.mxu1 }
 0x301   : > { %v2030_v50 = vadd.f32 %v6009_v34, %v2029_v57 }
 0x302   : > { %v2829_v8 = vpop.f32.mrf.mxu2 }
 0x303   : > { %v2541_v26 = vmax.f32 %v2030_v50, 0.0  ;;  %v2830_v37 = vadd.f32 %v6156_v52, %v2829_v8 }
 0x304   : > { %v3629_v44 = vpop.f32.mrf.mxu3 }
 0x305   : > { %v3368_v49 = vmax.f32 %v2830_v37, 0.0  ;;  %v3630_v53 = vadd.f32 %v6247_v12, %v3629_v44  ;;  %v2647_v54 = vpack.c.bf16 %v2541_v26, %v2540_v46 }
 0x307   : > { %v4195_v51 = vmax.f32 %v3630_v53, 0.0  ;;  %2871 = vmatmul.bf16.gmra.mxu2 %v2647_v54  ;;  %v3483_v19 = vpack.c.bf16 %v3368_v49, %v3367_v55 }
 0x308   : > { %v2032_v17 = vpop.f32.mrf.mxu1 }
 0x309   : > { %3671 = vmatmul.bf16.gmra.mxu3 %v3483_v19  ;;  %v4319_v41 = vpack.c.bf16 %v4195_v51, %v4194_v23  ;;  %v2033_v39 = vadd.f32 %v6009_v34, %v2032_v17  ;;  %v6286_v17 = vld [vmem:[%s7159_s4] ss:$0 sm:$0xff] }
 0x30a   : > { %v2832_v2 = vpop.f32.mrf.mxu2 }
 0x30b   : > { %2071 = vmatmul.bf16.gmra.mxu1 %v5961_v20  ;;  %4471 = vmatmul.bf16.gmra.mxu0 %v4319_v41  ;;  %v2833_v0 = vadd.f32 %v6156_v52, %v2832_v2  ;;  %v2542_v50 = vmax.f32 %v2033_v39, 0.0 }
 0x30c   : > { %v3632_v16 = vpop.f32.mrf.mxu3 }
 0x30d   : > { %v3633_v8 = vadd.f32 %v6247_v12, %v3632_v16  ;;  %v3369_v37 = vmax.f32 %v2833_v0, 0.0 }
 0x30f   : > { %v4196_v49 = vmax.f32 %v3633_v8, 0.0 }
 0x310   : > { %v2034_v11 = vpop.f32.mrf.mxu1 }
 0x311   : > { %v2035_v57 = vadd.f32 %v6009_v34, %v2034_v11 }
 0x312   : > { %v2834_v1 = vpop.f32.mrf.mxu2 }
 0x313   : > { %v2543_v46 = vmax.f32 %v2035_v57, 0.0  ;;  %v2835_v15 = vadd.f32 %v6156_v52, %v2834_v1 }
 0x314   : > { %v3634_v26 = vpop.f32.mrf.mxu3 }
 0x315   : > { %v3370_v44 = vmax.f32 %v2835_v15, 0.0  ;;  %v3635_v20 = vadd.f32 %v6247_v12, %v3634_v26  ;;  %v2648_v55 = vpack.c.bf16 %v2543_v46, %v2542_v50 }
 0x317   : > { %v4197_v53 = vmax.f32 %v3635_v20, 0.0  ;;  %2876 = vmatmul.bf16.gmra.mxu2 %v2648_v55  ;;  %v3484_v54 = vpack.c.bf16 %v3370_v44, %v3369_v37 }
 0x318   : > { %v2037_v23 = vpop.f32.mrf.mxu1 }
 0x319   : > { %3676 = vmatmul.bf16.gmra.mxu3 %v3484_v54  ;;  %v4320_v34 = vpack.c.bf16 %v4197_v53, %v4196_v49  ;;  %v2038_v41 = vadd.f32 %v6286_v17, %v2037_v23 }
 0x31a   : > { %v2837_v51 = vpop.f32.mrf.mxu2 }
 0x31b   : > { %2076 = vmatmul.bf16.gmra.mxu1 %v5977_v5  ;;  %4476 = vmatmul.bf16.gmra.mxu0 %v4320_v34  ;;  %v2838_v16 = vadd.f32 %v6156_v52, %v2837_v51  ;;  %v2544_v0 = vmax.f32 %v2038_v41, 0.0 }
 0x31c   : > { %v3637_v19 = vpop.f32.mrf.mxu3 }
 0x31d   : > { %v3638_v57 = vadd.f32 %v6247_v12, %v3637_v19  ;;  %v3371_v8 = vmax.f32 %v2838_v16, 0.0 }
 0x31f   : > { %v4198_v37 = vmax.f32 %v3638_v57, 0.0 }
 0x320   : > { %v2039_v2 = vpop.f32.mrf.mxu1 }
 0x321   : > { %v2040_v39 = vadd.f32 %v6286_v17, %v2039_v2 }
 0x322   : > { %v2839_v11 = vpop.f32.mrf.mxu2 }
 0x323   : > { %v2545_v1 = vmax.f32 %v2040_v39, 0.0  ;;  %v2840_v5 = vadd.f32 %v6156_v52, %v2839_v11 }
 0x324   : > { %v3639_v50 = vpop.f32.mrf.mxu3 }
 0x325   : > { %v3372_v46 = vmax.f32 %v2840_v5, 0.0  ;;  %v3640_v15 = vadd.f32 %v6247_v12, %v3639_v50  ;;  %v2649_v26 = vpack.c.bf16 %v2545_v1, %v2544_v0 }
 0x327   : > { %v4199_v44 = vmax.f32 %v3640_v15, 0.0  ;;  %2881 = vmatmul.bf16.gmra.mxu2 %v2649_v26  ;;  %v3485_v20 = vpack.c.bf16 %v3372_v46, %v3371_v8 }
 0x328   : > { %v2042_v55 = vpop.f32.mrf.mxu1 }
 0x329   : > { %3681 = vmatmul.bf16.gmra.mxu3 %v3485_v20  ;;  %v4321_v49 = vpack.c.bf16 %v4199_v44, %v4198_v37  ;;  %v2043_v23 = vadd.f32 %v6286_v17, %v2042_v55 }
 0x32a   : > { %v2842_v53 = vpop.f32.mrf.mxu2 }
 0x32b   : > { %2081 = vmatmul.bf16.gmra.mxu1 %v5989_v31  ;;  %4481 = vmatmul.bf16.gmra.mxu0 %v4321_v49  ;;  %v2843_v51 = vadd.f32 %v6156_v52, %v2842_v53  ;;  %v2546_v2 = vmax.f32 %v2043_v23, 0.0 }
 0x32c   : > { %v3642_v54 = vpop.f32.mrf.mxu3 }
 0x32d   : > { %v3643_v16 = vadd.f32 %v6247_v12, %v3642_v54  ;;  %v3373_v57 = vmax.f32 %v2843_v51, 0.0 }
 0x32f   : > { %v4200_v50 = vmax.f32 %v3643_v16, 0.0 }
 0x330   : > { %v2044_v34 = vpop.f32.mrf.mxu1 }
 0x331   : > { %v2045_v19 = vadd.f32 %v6286_v17, %v2044_v34 }
 0x332   : > { %v2844_v41 = vpop.f32.mrf.mxu2 }
 0x333   : > { %v2547_v39 = vmax.f32 %v2045_v19, 0.0  ;;  %v2845_v11 = vadd.f32 %v6156_v52, %v2844_v41 }
 0x334   : > { %v3644_v0 = vpop.f32.mrf.mxu3 }
 0x335   : > { %v3374_v1 = vmax.f32 %v2845_v11, 0.0  ;;  %v3645_v31 = vadd.f32 %v6247_v12, %v3644_v0  ;;  %v2650_v5 = vpack.c.bf16 %v2547_v39, %v2546_v2 }
 0x337   : > { %v4201_v8 = vmax.f32 %v3645_v31, 0.0  ;;  %2886 = vmatmul.bf16.gmra.mxu2 %v2650_v5  ;;  %v3486_v46 = vpack.c.bf16 %v3374_v1, %v3373_v57 }
 0x338   : > { %v2047_v15 = vpop.f32.mrf.mxu1 }
 0x339   : > { %3686 = vmatmul.bf16.gmra.mxu3 %v3486_v46  ;;  %v4322_v26 = vpack.c.bf16 %v4201_v8, %v4200_v50  ;;  %v2048_v20 = vadd.f32 %v6286_v17, %v2047_v15 }
 0x33a   : > { %v2847_v37 = vpop.f32.mrf.mxu2 }
 0x33b   : > { %2086 = vmatmul.bf16.gmra.mxu1 %v6004_v61  ;;  %4486 = vmatmul.bf16.gmra.mxu0 %v4322_v26  ;;  %v2848_v49 = vadd.f32 %v6156_v52, %v2847_v37  ;;  %v2548_v23 = vmax.f32 %v2048_v20, 0.0 }
 0x33c   : > { %v3647_v44 = vpop.f32.mrf.mxu3 }
 0x33d   : > { %v3648_v34 = vadd.f32 %v6247_v12, %v3647_v44  ;;  %v3375_v2 = vmax.f32 %v2848_v49, 0.0 }
 0x33f   : > { %v4202_v11 = vmax.f32 %v3648_v34, 0.0 }
 0x340   : > { %v2049_v55 = vpop.f32.mrf.mxu1 }
 0x341   : > { %v2050_v53 = vadd.f32 %v6286_v17, %v2049_v55 }
 0x342   : > { %v2849_v54 = vpop.f32.mrf.mxu2 }
 0x343   : > { %v2549_v51 = vmax.f32 %v2050_v53, 0.0  ;;  %v2850_v19 = vadd.f32 %v6156_v52, %v2849_v54 }
 0x344   : > { %v3649_v41 = vpop.f32.mrf.mxu3 }
 0x345   : > { %v3376_v16 = vmax.f32 %v2850_v19, 0.0  ;;  %v3650_v61 = vadd.f32 %v6247_v12, %v3649_v41  ;;  %v2651_v39 = vpack.c.bf16 %v2549_v51, %v2548_v23  ;;  %v6319_v51 = vld [vmem:[%s7165_s10] ss:$0 sm:$0xff] }
 0x347   : > { %v4203_v0 = vmax.f32 %v3650_v61, 0.0  ;;  %2891 = vmatmul.bf16.gmra.mxu2 %v2651_v39  ;;  %v3487_v57 = vpack.c.bf16 %v3376_v16, %v3375_v2 }
 0x348   : > { %v2052_v1 = vpop.f32.mrf.mxu1 }
 0x349   : > { %3691 = vmatmul.bf16.gmra.mxu3 %v3487_v57  ;;  %v4323_v31 = vpack.c.bf16 %v4203_v0, %v4202_v11  ;;  %v2053_v8 = vadd.f32 %v6286_v17, %v2052_v1 }
 0x34a   : > { %v2852_v5 = vpop.f32.mrf.mxu2 }
 0x34b   : > { %2091 = vmatmul.bf16.gmra.mxu1 %v5840_v3  ;;  %4491 = vmatmul.bf16.gmra.mxu0 %v4323_v31  ;;  %v2853_v15 = vadd.f32 %v6156_v52, %v2852_v5  ;;  %v2550_v44 = vmax.f32 %v2053_v8, 0.0 }
 0x34c   : > { %v3652_v50 = vpop.f32.mrf.mxu3 }
 0x34d   : > { %v3653_v20 = vadd.f32 %v6247_v12, %v3652_v50  ;;  %v3377_v54 = vmax.f32 %v2853_v15, 0.0 }
 0x34f   : > { %v4204_v19 = vmax.f32 %v3653_v20, 0.0 }
 0x350   : > { %v2054_v46 = vpop.f32.mrf.mxu1 }
 0x351   : > { %v2055_v26 = vadd.f32 %v6286_v17, %v2054_v46 }
 0x352   : > { %v2854_v37 = vpop.f32.mrf.mxu2 }
 0x353   : > { %v2551_v55 = vmax.f32 %v2055_v26, 0.0  ;;  %v2855_v49 = vadd.f32 %v6156_v52, %v2854_v37 }
 0x354   : > { %v3654_v53 = vpop.f32.mrf.mxu3 }
 0x355   : > { %v3378_v3 = vmax.f32 %v2855_v49, 0.0  ;;  %v3655_v23 = vadd.f32 %v6247_v12, %v3654_v53  ;;  %v2652_v34 = vpack.c.bf16 %v2551_v55, %v2550_v44 }
 0x357   : > { %v4205_v41 = vmax.f32 %v3655_v23, 0.0  ;;  %2896 = vmatmul.bf16.gmra.mxu2 %v2652_v34  ;;  %v3488_v2 = vpack.c.bf16 %v3378_v3, %v3377_v54 }
 0x358   : > { %v2057_v16 = vpop.f32.mrf.mxu1  ;;  %v4457_v61 = vpop.f32.mrf.mxu0 }
 0x359   : > { %v4458_v39 = vadd.f32 %v6319_v51, %v4457_v61  ;;  %3696 = vmatmul.bf16.gmra.mxu3 %v3488_v2  ;;  %v4324_v11 = vpack.c.bf16 %v4205_v41, %v4204_v19  ;;  %v2058_v1 = vadd.f32 %v6286_v17, %v2057_v16 }
 0x35a   : > { %v2857_v0 = vpop.f32.mrf.mxu2 }
 0x35b   : > { %4778 = vst.msk [vmem:[%s6324_s30] sm:$0xff] %vm4777_vm1, %v4458_v39  ;;  %2096 = vmatmul.bf16.gmra.mxu1 %v5858_v29  ;;  %4496 = vmatmul.bf16.gmra.mxu0 %v4324_v11  ;;  %v2858_v50 = vadd.f32 %v6156_v52, %v2857_v0  ;;  %v2552_v26 = vmax.f32 %v2058_v1, 0.0 }
 0x35c   : > { %v3657_v57 = vpop.f32.mrf.mxu3 }
 0x35d   : > { %v3658_v37 = vadd.f32 %v6247_v12, %v3657_v57  ;;  %v3379_v55 = vmax.f32 %v2858_v50, 0.0 }
 0x35f   : > { %v4206_v3 = vmax.f32 %v3658_v37, 0.0 }
 0x360   : > { %v2059_v31 = vpop.f32.mrf.mxu1  ;;  %v4459_v5 = vpop.f32.mrf.mxu0 }
 0x361   : > { %v2060_v8 = vadd.f32 %v6286_v17, %v2059_v31  ;;  %v4460_v46 = vadd.f32 %v6319_v51, %v4459_v5 }
 0x362   : > { %v2859_v15 = vpop.f32.mrf.mxu2 }
 0x363   : > { %v2553_v44 = vmax.f32 %v2060_v8, 0.0  ;;  %4779 = vst.msk [vmem:[%s6324_s30 + $0x8] sm:$0xff] %vm4777_vm1, %v4460_v46  ;;  %v2860_v29 = vadd.f32 %v6156_v52, %v2859_v15 }
 0x364   : > { %v3659_v20 = vpop.f32.mrf.mxu3 }
 0x365   : > { %v3380_v49 = vmax.f32 %v2860_v29, 0.0  ;;  %v3660_v53 = vadd.f32 %v6247_v12, %v3659_v20  ;;  %v2653_v54 = vpack.c.bf16 %v2553_v44, %v2552_v26 }
 0x367   : > { %v4207_v23 = vmax.f32 %v3660_v53, 0.0  ;;  %2901 = vmatmul.bf16.gmra.mxu2 %v2653_v54  ;;  %v3489_v34 = vpack.c.bf16 %v3380_v49, %v3379_v55 }
 0x368   : > { %v2062_v19 = vpop.f32.mrf.mxu1  ;;  %v4462_v41 = vpop.f32.mrf.mxu0 }
 0x369   : > { %v4463_v2 = vadd.f32 %v6319_v51, %v4462_v41  ;;  %3701 = vmatmul.bf16.gmra.mxu3 %v3489_v34  ;;  %v4325_v16 = vpack.c.bf16 %v4207_v23, %v4206_v3  ;;  %v2063_v11 = vadd.f32 %v6286_v17, %v2062_v19 }
 0x36a   : > { %v2862_v61 = vpop.f32.mrf.mxu2 }
 0x36b   : > { %4780 = vst.msk [vmem:[%s6324_s30 + $0x10] sm:$0xff] %vm4777_vm1, %v4463_v2  ;;  %2101 = vmatmul.bf16.gmra.mxu1 %v5880_v60  ;;  %4501 = vmatmul.bf16.gmra.mxu0 %v4325_v16  ;;  %v2863_v1 = vadd.f32 %v6156_v52, %v2862_v61  ;;  %v2554_v8 = vmax.f32 %v2063_v11, 0.0  ;;  %v1268_v16 = vadd.f32 %v6132_v36, %v5911_v35 }
 0x36c   : > { %v3662_v39 = vpop.f32.mrf.mxu3  ;;  %v1270_v61 = vadd.f32 %v6132_v36, %v5922_v48 }
 0x36d   : > { %v3663_v46 = vadd.f32 %v6247_v12, %v3662_v39  ;;  %v3381_v37 = vmax.f32 %v2863_v1, 0.0 }
 0x36f   : > { %v4208_v55 = vmax.f32 %v3663_v46, 0.0  ;;  %v1730_v46 = vmax.f32 %v1270_v61, 0.0  ;;  %v6385_v61 = vld [vmem:[%s7161_s6] ss:$0 sm:$0xff] }
 0x370   : > { %v2064_v0 = vpop.f32.mrf.mxu1  ;;  %v4464_v57 = vpop.f32.mrf.mxu0 }
 0x371   : > { %v2065_v31 = vadd.f32 %v6286_v17, %v2064_v0  ;;  %v4465_v5 = vadd.f32 %v6319_v51, %v4464_v57 }
 0x372   : > { %v2864_v50 = vpop.f32.mrf.mxu2 }
 0x373   : > { %v2555_v15 = vmax.f32 %v2065_v31, 0.0  ;;  %4781 = vst.msk [vmem:[%s6324_s30 + $0x18] sm:$0xff] %vm4777_vm1, %v4465_v5  ;;  %v2865_v60 = vadd.f32 %v6156_v52, %v2864_v50 }
 0x374   : > { %v3664_v26 = vpop.f32.mrf.mxu3 }
 0x375   : > { %v3382_v44 = vmax.f32 %v2865_v60, 0.0  ;;  %v3665_v29 = vadd.f32 %v6247_v12, %v3664_v26  ;;  %v2654_v20 = vpack.c.bf16 %v2555_v15, %v2554_v8  ;;  %v1729_v8 = vmax.f32 %v1268_v16, 0.0 }
 0x377   : > { %v4209_v49 = vmax.f32 %v3665_v29, 0.0  ;;  %2906 = vmatmul.bf16.gmra.mxu2 %v2654_v20  ;;  %v3490_v53 = vpack.c.bf16 %v3382_v44, %v3381_v37 }
 0x378   : > { %v2067_v54 = vpop.f32.mrf.mxu1  ;;  %v4467_v3 = vpop.f32.mrf.mxu0 }
 0x379   : > { %v4468_v23 = vadd.f32 %v6319_v51, %v4467_v3  ;;  %3706 = vmatmul.bf16.gmra.mxu3 %v3490_v53  ;;  %v4326_v34 = vpack.c.bf16 %v4209_v49, %v4208_v55  ;;  %v2068_v2 = vadd.f32 %v6286_v17, %v2067_v54  ;;  %v1819_v53 = vpack.c.bf16 %v1730_v46, %v1729_v8 }
 0x37a   : > { %v2867_v19 = vpop.f32.mrf.mxu2 }
 0x37b   : > { %4782 = vst.msk [vmem:[%s6324_s30 + $0x20] sm:$0xff] %vm4777_vm1, %v4468_v23  ;;  %2106 = vmatmul.bf16.gmra.mxu1 %v5903_v28  ;;  %4506 = vmatmul.bf16.gmra.mxu0 %v4326_v34  ;;  %v2868_v0 = vadd.f32 %v6156_v52, %v2867_v19  ;;  %v2556_v28 = vmax.f32 %v2068_v2, 0.0  ;;  %v6376_v34 = vld [vmem:[%s7157_s2] ss:$0 sm:$0xff] }
 0x37c   : > { %v3667_v41 = vpop.f32.mrf.mxu3  ;;  %v1273_v19 = vadd.f32 %v6376_v34, %v5934_v63 }
 0x37d   : > { %v3668_v5 = vadd.f32 %v6247_v12, %v3667_v41  ;;  %v3383_v36 = vmax.f32 %v2868_v0, 0.0  ;;  %v1275_v41 = vadd.f32 %v6376_v34, %v5943_v62 }
 0x37f   : > { %v4210_v37 = vmax.f32 %v3668_v5, 0.0  ;;  %v1732_v5 = vmax.f32 %v1275_v41, 0.0 }
 0x380   : > { %v2069_v39 = vpop.f32.mrf.mxu1  ;;  %v4469_v11 = vpop.f32.mrf.mxu0 }
 0x381   : > { %v2070_v57 = vadd.f32 %v6286_v17, %v2069_v39  ;;  %v4470_v1 = vadd.f32 %v6319_v51, %v4469_v11 }
 0x382   : > { %v2869_v31 = vpop.f32.mrf.mxu2 }
 0x383   : > { %v2557_v50 = vmax.f32 %v2070_v57, 0.0  ;;  %4783 = vst.msk [vmem:[%s6324_s30 + $0x28] sm:$0xff] %vm4777_vm1, %v4470_v1  ;;  %v2870_v35 = vadd.f32 %v6156_v52, %v2869_v31 }
 0x384   : > { %v3669_v48 = vpop.f32.mrf.mxu3 }
 0x385   : > { %v3384_v15 = vmax.f32 %v2870_v35, 0.0  ;;  %v3670_v60 = vadd.f32 %v6247_v12, %v3669_v48  ;;  %v2655_v26 = vpack.c.bf16 %v2557_v50, %v2556_v28  ;;  %v1731_v28 = vmax.f32 %v1273_v19, 0.0 }
 0x387   : > { %v4211_v44 = vmax.f32 %v3670_v60, 0.0  ;;  %2911 = vmatmul.bf16.gmra.mxu2 %v2655_v26  ;;  %v3491_v29 = vpack.c.bf16 %v3384_v15, %v3383_v36 }
 0x388   : > { %v2072_v20 = vpop.f32.mrf.mxu1  ;;  %v4472_v55 = vpop.f32.mrf.mxu0 }
 0x389   : > { %v4473_v49 = vadd.f32 %v6319_v51, %v4472_v55  ;;  %3711 = vmatmul.bf16.gmra.mxu3 %v3491_v29  ;;  %v4327_v52 = vpack.c.bf16 %v4211_v44, %v4210_v37  ;;  %v2073_v23 = vadd.f32 %v6286_v17, %v2072_v20  ;;  %v1820_v29 = vpack.c.bf16 %v1732_v5, %v1731_v28 }
 0x38a   : > { %v2872_v54 = vpop.f32.mrf.mxu2 }
 0x38b   : > { %4784 = vst.msk [vmem:[%s6324_s30 + $0x30] sm:$0xff] %vm4777_vm1, %v4473_v49  ;;  %2111 = vmatmul.bf16.gmra.mxu1 %v1819_v53  ;;  %4511 = vmatmul.bf16.gmra.mxu0 %v4327_v52  ;;  %v2873_v39 = vadd.f32 %v6385_v61, %v2872_v54  ;;  %v2558_v1 = vmax.f32 %v2073_v23, 0.0  ;;  %v1278_v52 = vadd.f32 %v6376_v34, %v5954_v30 }
 0x38c   : > { %v3672_v3 = vpop.f32.mrf.mxu3  ;;  %v1280_v54 = vadd.f32 %v6376_v34, %v5964_v45 }
 0x38d   : > { %v3673_v63 = vadd.f32 %v6247_v12, %v3672_v3  ;;  %v3385_v35 = vmax.f32 %v2873_v39, 0.0 }
 0x38f   : > { %v4212_v36 = vmax.f32 %v3673_v63, 0.0 }
 0x390   : > { %v2074_v2 = vpop.f32.mrf.mxu1  ;;  %v4474_v16 = vpop.f32.mrf.mxu0 }
 0x391   : > { %v2075_v11 = vadd.f32 %v6286_v17, %v2074_v2  ;;  %v4475_v0 = vadd.f32 %v6319_v51, %v4474_v16 }
 0x392   : > { %v2874_v57 = vpop.f32.mrf.mxu2 }
 0x393   : > { %v2559_v31 = vmax.f32 %v2075_v11, 0.0  ;;  %4785 = vst.msk [vmem:[%s6324_s30 + $0x38] sm:$0xff] %vm4777_vm1, %v4475_v0  ;;  %v2875_v62 = vadd.f32 %v6385_v61, %v2874_v57  ;;  %v1733_v57 = vmax.f32 %v1278_v52, 0.0 }
 0x394   : > { %v3674_v50 = vpop.f32.mrf.mxu3 }
 0x395   : > { %v3386_v8 = vmax.f32 %v2875_v62, 0.0  ;;  %v3675_v46 = vadd.f32 %v6247_v12, %v3674_v50  ;;  %v2656_v48 = vpack.c.bf16 %v2559_v31, %v2558_v1  ;;  %v1734_v1 = vmax.f32 %v1280_v54, 0.0 }
 0x397   : > { %v4213_v15 = vmax.f32 %v3675_v46, 0.0  ;;  %2916 = vmatmul.bf16.gmra.mxu2 %v2656_v48  ;;  %v3492_v60 = vpack.c.bf16 %v3386_v8, %v3385_v35 }
 0x398   : > { %v2077_v26 = vpop.f32.mrf.mxu1  ;;  %v4477_v37 = vpop.f32.mrf.mxu0 }
 0x399   : > { %v4478_v44 = vadd.f32 %v6319_v51, %v4477_v37  ;;  %3716 = vmatmul.bf16.gmra.mxu3 %v3492_v60  ;;  %v4328_v20 = vpack.c.bf16 %v4213_v15, %v4212_v36  ;;  %v2078_v53 = vadd.f32 %v6286_v17, %v2077_v26  ;;  %v1821_v36 = vpack.c.bf16 %v1734_v1, %v1733_v57 }
 0x39a   : > { %v2877_v55 = vpop.f32.mrf.mxu2 }
 0x39b   : > { %4786 = vst.msk [vmem:[%s6324_s30 + $0x40] sm:$0xff] %vm4777_vm1, %v4478_v44  ;;  %2116 = vmatmul.bf16.gmra.mxu1 %v1820_v29  ;;  %4516 = vmatmul.bf16.gmra.mxu0 %v4328_v20  ;;  %v2878_v19 = vadd.f32 %v6385_v61, %v2877_v55  ;;  %v2560_v39 = vmax.f32 %v2078_v53, 0.0  ;;  %v1283_v44 = vadd.f32 %v6376_v34, %v5979_v6 }
 0x39c   : > { %v3677_v49 = vpop.f32.mrf.mxu3  ;;  %v1285_v29 = vadd.f32 %v6376_v34, %v5986_v18 }
 0x39d   : > { %v3678_v11 = vadd.f32 %v6247_v12, %v3677_v49  ;;  %v3387_v63 = vmax.f32 %v2878_v19, 0.0 }
 0x39f   : > { %v4214_v5 = vmax.f32 %v3678_v11, 0.0 }
 0x3a0   : > { %v2079_v3 = vpop.f32.mrf.mxu1  ;;  %v4479_v23 = vpop.f32.mrf.mxu0 }
 0x3a1   : > { %v2080_v41 = vadd.f32 %v6286_v17, %v2079_v3  ;;  %v4480_v2 = vadd.f32 %v6319_v51, %v4479_v23 }
 0x3a2   : > { %v2879_v16 = vpop.f32.mrf.mxu2 }
 0x3a3   : > { %v2561_v0 = vmax.f32 %v2080_v41, 0.0  ;;  %4787 = vst.msk [vmem:[%s6324_s30 + $0x48] sm:$0xff] %vm4777_vm1, %v4480_v2  ;;  %v2880_v30 = vadd.f32 %v6385_v61, %v2879_v16  ;;  %v1735_v41 = vmax.f32 %v1283_v44, 0.0  ;;  %v1736_v2 = vmax.f32 %v1285_v29, 0.0 }
 0x3a4   : > { %v3679_v45 = vpop.f32.mrf.mxu3 }
 0x3a5   : > { %v3388_v31 = vmax.f32 %v2880_v30, 0.0  ;;  %v3680_v62 = vadd.f32 %v6247_v12, %v3679_v45  ;;  %v2657_v28 = vpack.c.bf16 %v2561_v0, %v2560_v39 }
 0x3a7   : > { %v4215_v50 = vmax.f32 %v3680_v62, 0.0  ;;  %2921 = vmatmul.bf16.gmra.mxu2 %v2657_v28  ;;  %v3493_v35 = vpack.c.bf16 %v3388_v31, %v3387_v63  ;;  %v1822_v62 = vpack.c.bf16 %v1736_v2, %v1735_v41 }
 0x3a8   : > { %v2082_v8 = vpop.f32.mrf.mxu1  ;;  %v4482_v46 = vpop.f32.mrf.mxu0 }
 0x3a9   : > { %v4483_v48 = vadd.f32 %v6319_v51, %v4482_v46  ;;  %3721 = vmatmul.bf16.gmra.mxu3 %v3493_v35  ;;  %v4329_v15 = vpack.c.bf16 %v4215_v50, %v4214_v5  ;;  %v2083_v37 = vadd.f32 %v6286_v17, %v2082_v8  ;;  %v1288_v8 = vadd.f32 %v6376_v34, %v5991_v4 }
 0x3aa   : > { %v2882_v60 = vpop.f32.mrf.mxu2  ;;  %v1290_v46 = vadd.f32 %v6376_v34, %v6002_v59 }
 0x3ab   : > { %4788 = vst.msk [vmem:[%s6324_s30 + $0x50] sm:$0xff] %vm4777_vm1, %v4483_v48  ;;  %2121 = vmatmul.bf16.gmra.mxu1 %v1821_v36  ;;  %4521 = vmatmul.bf16.gmra.mxu0 %v4329_v15  ;;  %v2883_v49 = vadd.f32 %v6385_v61, %v2882_v60  ;;  %v2562_v3 = vmax.f32 %v2083_v37, 0.0 }
 0x3ac   : > { %v3682_v26 = vpop.f32.mrf.mxu3 }
 0x3ad   : > { %v3683_v23 = vadd.f32 %v6247_v12, %v3682_v26  ;;  %v3389_v16 = vmax.f32 %v2883_v49, 0.0  ;;  %v1738_v49 = vmax.f32 %v1290_v46, 0.0 }
 0x3af   : > { %v4216_v30 = vmax.f32 %v3683_v23, 0.0 }
 0x3b0   : > { %v2084_v20 = vpop.f32.mrf.mxu1  ;;  %v4484_v55 = vpop.f32.mrf.mxu0 }
 0x3b1   : > { %v2085_v53 = vadd.f32 %v6286_v17, %v2084_v20  ;;  %v4485_v52 = vadd.f32 %v6319_v51, %v4484_v55  ;;  %v1737_v55 = vmax.f32 %v1288_v8, 0.0 }
 0x3b2   : > { %v2884_v54 = vpop.f32.mrf.mxu2 }
 0x3b3   : > { %v2563_v19 = vmax.f32 %v2085_v53, 0.0  ;;  %4789 = vst.msk [vmem:[%s6324_s30 + $0x58] sm:$0xff] %vm4777_vm1, %v4485_v52  ;;  %v2885_v6 = vadd.f32 %v6385_v61, %v2884_v54 }
 0x3b4   : > { %v3684_v18 = vpop.f32.mrf.mxu3 }
 0x3b5   : > { %v3390_v39 = vmax.f32 %v2885_v6, 0.0  ;;  %v3685_v11 = vadd.f32 %v6247_v12, %v3684_v18  ;;  %v2658_v0 = vpack.c.bf16 %v2563_v19, %v2562_v3 }
 0x3b7   : > { %v4217_v57 = vmax.f32 %v3685_v11, 0.0  ;;  %2926 = vmatmul.bf16.gmra.mxu2 %v2658_v0  ;;  %v3494_v1 = vpack.c.bf16 %v3390_v39, %v3389_v16  ;;  %v1823_v16 = vpack.c.bf16 %v1738_v49, %v1737_v55 }
 0x3b8   : > { %v2087_v45 = vpop.f32.mrf.mxu1  ;;  %v4487_v63 = vpop.f32.mrf.mxu0 }
 0x3b9   : > { %v4488_v31 = vadd.f32 %v6319_v51, %v4487_v63  ;;  %3726 = vmatmul.bf16.gmra.mxu3 %v3494_v1  ;;  %v4330_v28 = vpack.c.bf16 %v4217_v57, %v4216_v30  ;;  %v2088_v35 = vadd.f32 %v6286_v17, %v2087_v45  ;;  %v1293_v57 = vadd.f32 %v6376_v34, %v6012_v40 }
 0x3ba   : > { %v2887_v5 = vpop.f32.mrf.mxu2  ;;  %v1295_v1 = vadd.f32 %v6376_v34, %v6019_v38 }
 0x3bb   : > { %4790 = vst.msk [vmem:[%s6324_s30 + $0x60] sm:$0xff] %vm4777_vm1, %v4488_v31  ;;  %2126 = vmatmul.bf16.gmra.mxu1 %v1822_v62  ;;  %4526 = vmatmul.bf16.gmra.mxu0 %v4330_v28  ;;  %v2888_v15 = vadd.f32 %v6385_v61, %v2887_v5  ;;  %v2564_v44 = vmax.f32 %v2088_v35, 0.0  ;;  %v1739_v46 = vmax.f32 %v1293_v57, 0.0 }
 0x3bc   : > { %v3687_v50 = vpop.f32.mrf.mxu3 }
 0x3bd   : > { %v3688_v29 = vadd.f32 %v6247_v12, %v3687_v50  ;;  %v3391_v53 = vmax.f32 %v2888_v15, 0.0 }
 0x3bf   : > { %v4218_v23 = vmax.f32 %v3688_v29, 0.0 }
 0x3c0   : > { %v2089_v48 = vpop.f32.mrf.mxu1  ;;  %v4489_v36 = vpop.f32.mrf.mxu0 }
 0x3c1   : > { %v2090_v60 = vadd.f32 %v6286_v17, %v2089_v48  ;;  %v4490_v26 = vadd.f32 %v6319_v51, %v4489_v36  ;;  %v1740_v48 = vmax.f32 %v1295_v1, 0.0 }
 0x3c2   : > { %v2889_v37 = vpop.f32.mrf.mxu2 }
 0x3c3   : > { %v2565_v20 = vmax.f32 %v2090_v60, 0.0  ;;  %4791 = vst.msk [vmem:[%s6324_s30 + $0x68] sm:$0xff] %vm4777_vm1, %v4490_v26  ;;  %v2890_v4 = vadd.f32 %v6385_v61, %v2889_v37  ;;  %v1824_v49 = vpack.c.bf16 %v1740_v48, %v1739_v46 }
 0x3c4   : > { %v3689_v59 = vpop.f32.mrf.mxu3 }
 0x3c5   : > { %v3392_v52 = vmax.f32 %v2890_v4, 0.0  ;;  %v3690_v54 = vadd.f32 %v6247_v12, %v3689_v59  ;;  %v2659_v3 = vpack.c.bf16 %v2565_v20, %v2564_v44 }
 0x3c7   : > { %v4219_v19 = vmax.f32 %v3690_v54, 0.0  ;;  %2931 = vmatmul.bf16.gmra.mxu2 %v2659_v3  ;;  %v3495_v6 = vpack.c.bf16 %v3392_v52, %v3391_v53  ;;  %v1298_v54 = vadd.f32 %v6376_v34, %v6030_v58  ;;  %v1300_v3 = vadd.f32 %v6376_v34, %v6039_v21 }
 0x3c8   : > { %v2092_v41 = vpop.f32.mrf.mxu1  ;;  %v4492_v2 = vpop.f32.mrf.mxu0 }
 0x3c9   : > { %v4493_v18 = vadd.f32 %v6319_v51, %v4492_v2  ;;  %3731 = vmatmul.bf16.gmra.mxu3 %v3495_v6  ;;  %v4331_v39 = vpack.c.bf16 %v4219_v19, %v4218_v23  ;;  %v2093_v30 = vadd.f32 %v6286_v17, %v2092_v41 }
 0x3ca   : > { %v2892_v11 = vpop.f32.mrf.mxu2 }
 0x3cb   : > { %4792 = vst.msk [vmem:[%s6324_s30 + $0x70] sm:$0xff] %vm4777_vm1, %v4493_v18  ;;  %2131 = vmatmul.bf16.gmra.mxu1 %v1823_v16  ;;  %4531 = vmatmul.bf16.gmra.mxu0 %v4331_v39  ;;  %v2893_v31 = vadd.f32 %v6385_v61, %v2892_v11  ;;  %v2566_v50 = vmax.f32 %v2093_v30, 0.0  ;;  %v6473_v39 = vld [vmem:[%s7163_s8] ss:$0 sm:$0xff]  ;;  %v1742_v30 = vmax.f32 %v1300_v3, 0.0 }
 0x3cc   : > { %v3692_v0 = vpop.f32.mrf.mxu3 }
 0x3cd   : > { %v3693_v35 = vadd.f32 %v6247_v12, %v3692_v0  ;;  %v3393_v36 = vmax.f32 %v2893_v31, 0.0  ;;  %v1741_v0 = vmax.f32 %v1298_v54, 0.0 }
 0x3cf   : > { %v4220_v37 = vmax.f32 %v3693_v35, 0.0 }
 0x3d0   : > { %v2094_v45 = vpop.f32.mrf.mxu1  ;;  %v4494_v63 = vpop.f32.mrf.mxu0 }
 0x3d1   : > { %v2095_v62 = vadd.f32 %v6286_v17, %v2094_v45  ;;  %v4495_v28 = vadd.f32 %v6319_v51, %v4494_v63 }
 0x3d2   : > { %v2894_v5 = vpop.f32.mrf.mxu2 }
 0x3d3   : > { %v2567_v8 = vmax.f32 %v2095_v62, 0.0  ;;  %4793 = vst.msk [vmem:[%s6324_s30 + $0x78] sm:$0xff] %vm4777_vm1, %v4495_v28  ;;  %v2895_v40 = vadd.f32 %v6385_v61, %v2894_v5 }
 0x3d4   : > { %v3694_v38 = vpop.f32.mrf.mxu3 }
 0x3d5   : > { %v3394_v15 = vmax.f32 %v2895_v40, 0.0  ;;  %v3695_v60 = vadd.f32 %v6247_v12, %v3694_v38  ;;  %v2660_v26 = vpack.c.bf16 %v2567_v8, %v2566_v50  ;;  %v1825_v40 = vpack.c.bf16 %v1742_v30, %v1741_v0 }
 0x3d7   : > { %v4221_v44 = vmax.f32 %v3695_v60, 0.0  ;;  %2936 = vmatmul.bf16.gmra.mxu2 %v2660_v26  ;;  %v3496_v29 = vpack.c.bf16 %v3394_v15, %v3393_v36  ;;  %v1303_v15 = vadd.f32 %v6376_v34, %v6053_v10  ;;  %v1305_v60 = vadd.f32 %v6376_v34, %v6062_v42 }
 0x3d8   : > { %v2097_v20 = vpop.f32.mrf.mxu1  ;;  %v4497_v4 = vpop.f32.mrf.mxu0 }
 0x3d9   : > { %v4498_v55 = vadd.f32 %v6319_v51, %v4497_v4  ;;  %3736 = vmatmul.bf16.gmra.mxu3 %v3496_v29  ;;  %v4332_v59 = vpack.c.bf16 %v4221_v44, %v4220_v37  ;;  %v2098_v12 = vadd.f32 %v6286_v17, %v2097_v20 }
 0x3da   : > { %v2897_v53 = vpop.f32.mrf.mxu2 }
 0x3db   : > { %4794 = vst.msk [vmem:[%s6324_s30 + $0x80] sm:$0xff] %vm4777_vm1, %v4498_v55  ;;  %2136 = vmatmul.bf16.gmra.mxu1 %v1824_v49  ;;  %4536 = vmatmul.bf16.gmra.mxu0 %v4332_v59  ;;  %v2898_v6 = vadd.f32 %v6385_v61, %v2897_v53  ;;  %v2568_v16 = vmax.f32 %v2098_v12, 0.0  ;;  %v1743_v53 = vmax.f32 %v1303_v15, 0.0 }
 0x3dc   : > { %v3697_v52 = vpop.f32.mrf.mxu3 }
 0x3dd   : > { %v3698_v58 = vadd.f32 %v6473_v39, %v3697_v52  ;;  %v3395_v1 = vmax.f32 %v2898_v6, 0.0  ;;  %v1744_v52 = vmax.f32 %v1305_v60, 0.0 }
 0x3df   : > { %v4222_v62 = vmax.f32 %v3698_v58, 0.0  ;;  %v1826_v58 = vpack.c.bf16 %v1744_v52, %v1743_v53  ;;  %v1313_v53 = vadd.f32 %v6376_v34, %v6095_v32  ;;  %v1315_v52 = vadd.f32 %v6376_v34, %v6107_v22 }
 0x3e0   : > { %v2099_v23 = vpop.f32.mrf.mxu1  ;;  %v4499_v19 = vpop.f32.mrf.mxu0 }
 0x3e1   : > { %v2100_v41 = vadd.f32 %v6286_v17, %v2099_v23  ;;  %v4500_v2 = vadd.f32 %v6319_v51, %v4499_v19 }
 0x3e2   : > { %v2899_v18 = vpop.f32.mrf.mxu2 }
 0x3e3   : > { %v2569_v11 = vmax.f32 %v2100_v41, 0.0  ;;  %4795 = vst.msk [vmem:[%s6324_s30 + $0x88] sm:$0xff] %vm4777_vm1, %v4500_v2  ;;  %v2900_v21 = vadd.f32 %v6385_v61, %v2899_v18 }
 0x3e4   : > { %v3699_v57 = vpop.f32.mrf.mxu3 }
 0x3e5   : > { %v3396_v45 = vmax.f32 %v2900_v21, 0.0  ;;  %v3700_v63 = vadd.f32 %v6473_v39, %v3699_v57  ;;  %v2661_v31 = vpack.c.bf16 %v2569_v11, %v2568_v16  ;;  %v1308_v57 = vadd.f32 %v6376_v34, %v6075_v14 }
 0x3e7   : > { %v4223_v28 = vmax.f32 %v3700_v63, 0.0  ;;  %2941 = vmatmul.bf16.gmra.mxu2 %v2661_v31  ;;  %v3497_v5 = vpack.c.bf16 %v3396_v45, %v3395_v1  ;;  %v1310_v1 = vadd.f32 %v6376_v34, %v6090_v43 }
 0x3e8   : > { %v2102_v50 = vpop.f32.mrf.mxu1  ;;  %v4502_v35 = vpop.f32.mrf.mxu0 }
 0x3e9   : > { %v4503_v8 = vadd.f32 %v6319_v51, %v4502_v35  ;;  %3741 = vmatmul.bf16.gmra.mxu3 %v3497_v5  ;;  %v4333_v46 = vpack.c.bf16 %v4223_v28, %v4222_v62  ;;  %v2103_v36 = vadd.f32 %v6286_v17, %v2102_v50 }
 0x3ea   : > { %v2902_v48 = vpop.f32.mrf.mxu2 }
 0x3eb   : > { %4796 = vst.msk [vmem:[%s6324_s30 + $0x90] sm:$0xff] %vm4777_vm1, %v4503_v8  ;;  %2141 = vmatmul.bf16.gmra.mxu1 %v1825_v40  ;;  %4541 = vmatmul.bf16.gmra.mxu0 %v4333_v46  ;;  %v2903_v44 = vadd.f32 %v6385_v61, %v2902_v48  ;;  %v2570_v55 = vmax.f32 %v2103_v36, 0.0  ;;  %v1745_v40 = vmax.f32 %v1308_v57, 0.0  ;;  %v1746_v46 = vmax.f32 %v1310_v1, 0.0 }
 0x3ec   : > { %v3702_v38 = vpop.f32.mrf.mxu3 }
 0x3ed   : > { %v3703_v49 = vadd.f32 %v6473_v39, %v3702_v38  ;;  %v3397_v12 = vmax.f32 %v2903_v44, 0.0 }
 0x3ef   : > { %v4224_v19 = vmax.f32 %v3703_v49, 0.0 }
 0x3f0   : > { %v2104_v26 = vpop.f32.mrf.mxu1  ;;  %v4504_v37 = vpop.f32.mrf.mxu0 }
 0x3f1   : > { %v2105_v29 = vadd.f32 %v6286_v17, %v2104_v26  ;;  %v4505_v20 = vadd.f32 %v6319_v51, %v4504_v37 }
 0x3f2   : > { %v2904_v4 = vpop.f32.mrf.mxu2 }
 0x3f3   : > { %v2571_v59 = vmax.f32 %v2105_v29, 0.0  ;;  %4797 = vst.msk [vmem:[%s6324_s30 + $0x98] sm:$0xff] %vm4777_vm1, %v4505_v20  ;;  %v2905_v10 = vadd.f32 %v6385_v61, %v2904_v4  ;;  %v1827_v4 = vpack.c.bf16 %v1746_v46, %v1745_v40 }
 0x3f4   : > { %v3704_v42 = vpop.f32.mrf.mxu3 }
 0x3f5   : > { %v3398_v54 = vmax.f32 %v2905_v10, 0.0  ;;  %v3705_v3 = vadd.f32 %v6473_v39, %v3704_v42  ;;  %v2662_v23 = vpack.c.bf16 %v2571_v59, %v2570_v55 }
 0x3f7   : > { %v4225_v6 = vmax.f32 %v3705_v3, 0.0  ;;  %2946 = vmatmul.bf16.gmra.mxu2 %v2662_v23  ;;  %v3498_v41 = vpack.c.bf16 %v3398_v54, %v3397_v12 }
 0x3f8   : > { %v2107_v2 = vpop.f32.mrf.mxu1  ;;  %v4507_v18 = vpop.f32.mrf.mxu0 }
 0x3f9   : > { %v4508_v16 = vadd.f32 %v6319_v51, %v4507_v18  ;;  %3746 = vmatmul.bf16.gmra.mxu3 %v3498_v41  ;;  %v4334_v11 = vpack.c.bf16 %v4225_v6, %v4224_v19  ;;  %v2108_v30 = vadd.f32 %v6286_v17, %v2107_v2  ;;  %v1747_v18 = vmax.f32 %v1313_v53, 0.0 }
 0x3fa   : > { %v2907_v21 = vpop.f32.mrf.mxu2 }
 0x3fb   : > { %4798 = vst.msk [vmem:[%s6324_s30 + $0xa0] sm:$0xff] %vm4777_vm1, %v4508_v16  ;;  %2146 = vmatmul.bf16.gmra.mxu1 %v1826_v58  ;;  %4546 = vmatmul.bf16.gmra.mxu0 %v4334_v11  ;;  %v2908_v31 = vadd.f32 %v6385_v61, %v2907_v21  ;;  %v2572_v50 = vmax.f32 %v2108_v30, 0.0  ;;  %v1748_v16 = vmax.f32 %v1315_v52, 0.0 }
 0x3fc   : > { %v3707_v0 = vpop.f32.mrf.mxu3 }
 0x3fd   : > { %v3708_v35 = vadd.f32 %v6473_v39, %v3707_v0  ;;  %v3399_v48 = vmax.f32 %v2908_v31, 0.0  ;;  %v1828_v31 = vpack.c.bf16 %v1748_v16, %v1747_v18 }
 0x3ff   : > { %v4226_v60 = vmax.f32 %v3708_v35, 0.0 }
 0x400   : > { %v2109_v45 = vpop.f32.mrf.mxu1  ;;  %v4509_v63 = vpop.f32.mrf.mxu0 }
 0x401   : > { %v2110_v62 = vadd.f32 %v6286_v17, %v2109_v45  ;;  %v4510_v28 = vadd.f32 %v6319_v51, %v4509_v63 }
 0x402   : > { %v2909_v5 = vpop.f32.mrf.mxu2 }
 0x403   : > { %v2573_v8 = vmax.f32 %v2110_v62, 0.0  ;;  %4799 = vst.msk [vmem:[%s6324_s30 + $0xa8] sm:$0xff] %vm4777_vm1, %v4510_v28  ;;  %v2910_v14 = vadd.f32 %v6385_v61, %v2909_v5 }
 0x404   : > { %v3709_v43 = vpop.f32.mrf.mxu3 }
 0x405   : > { %v3400_v38 = vmax.f32 %v2910_v14, 0.0  ;;  %v3710_v36 = vadd.f32 %v6473_v39, %v3709_v43  ;;  %v2663_v15 = vpack.c.bf16 %v2573_v8, %v2572_v50  ;;  %v6534_v50 = vld [vmem:[%s7159_s4] ss:$0 sm:$0xff]  ;;  %v1318_v8 = vadd.f32 %v6376_v34, %v6122_v9 }
 0x406   : > { %v1320_v14 = vadd.f32 %v6376_v34, %v6126_v24 }
 0x407   : > { %v4227_v26 = vmax.f32 %v3710_v36, 0.0  ;;  %2951 = vmatmul.bf16.gmra.mxu2 %v2663_v15  ;;  %v3499_v37 = vpack.c.bf16 %v3400_v38, %v3399_v48 }
 0x408   : > { %v2112_v44 = vpop.f32.mrf.mxu1  ;;  %v4512_v29 = vpop.f32.mrf.mxu0 }
 0x409   : > { %v4513_v20 = vadd.f32 %v6319_v51, %v4512_v29  ;;  %3751 = vmatmul.bf16.gmra.mxu3 %v3499_v37  ;;  %v4335_v55 = vpack.c.bf16 %v4227_v26, %v4226_v60  ;;  %v2113_v10 = vadd.f32 %v6286_v17, %v2112_v44  ;;  %v1749_v37 = vmax.f32 %v1318_v8, 0.0 }
 0x40a   : > { %v2912_v49 = vpop.f32.mrf.mxu2  ;;  %v1750_v44 = vmax.f32 %v1320_v14, 0.0 }
 0x40b   : > { %4800 = vst.msk [vmem:[%s6324_s30 + $0xb0] sm:$0xff] %vm4777_vm1, %v4513_v20  ;;  %2151 = vmatmul.bf16.gmra.mxu1 %v1827_v4  ;;  %4551 = vmatmul.bf16.gmra.mxu0 %v4335_v55  ;;  %v2913_v54 = vadd.f32 %v6385_v61, %v2912_v49  ;;  %v2574_v6 = vmax.f32 %v2113_v10, 0.0 }
 0x40c   : > { %v3712_v59 = vpop.f32.mrf.mxu3 }
 0x40d   : > { %v3713_v41 = vadd.f32 %v6473_v39, %v3712_v59  ;;  %v3401_v58 = vmax.f32 %v2913_v54, 0.0 }
 0x40f   : > { %v4228_v0 = vmax.f32 %v3713_v41, 0.0  ;;  %v1325_v41 = vadd.f32 %v6376_v34, %v6148_v27 }
 0x410   : > { %v2114_v42 = vpop.f32.mrf.mxu1  ;;  %v4514_v12 = vpop.f32.mrf.mxu0 }
 0x411   : > { %v2115_v3 = vadd.f32 %v6286_v17, %v2114_v42  ;;  %v4515_v23 = vadd.f32 %v6319_v51, %v4514_v12  ;;  %v1829_v12 = vpack.c.bf16 %v1750_v44, %v1749_v37 }
 0x412   : > { %v2914_v19 = vpop.f32.mrf.mxu2 }
 0x413   : > { %v2575_v2 = vmax.f32 %v2115_v3, 0.0  ;;  %4801 = vst.msk [vmem:[%s6324_s30 + $0xb8] sm:$0xff] %vm4777_vm1, %v4515_v23  ;;  %v2915_v32 = vadd.f32 %v6385_v61, %v2914_v19 }
 0x414   : > { %v3714_v22 = vpop.f32.mrf.mxu3 }
 0x415   : > { %v3402_v11 = vmax.f32 %v2915_v32, 0.0  ;;  %v3715_v21 = vadd.f32 %v6473_v39, %v3714_v22  ;;  %v2664_v17 = vpack.c.bf16 %v2575_v2, %v2574_v6  ;;  %v1323_v6 = vadd.f32 %v6376_v34, %v6142_v25 }
 0x417   : > { %v4229_v30 = vmax.f32 %v3715_v21, 0.0  ;;  %2956 = vmatmul.bf16.gmra.mxu2 %v2664_v17  ;;  %v3500_v57 = vpack.c.bf16 %v3402_v11, %v3401_v58 }
 0x418   : > { %v2117_v1 = vpop.f32.mrf.mxu1  ;;  %v4517_v45 = vpop.f32.mrf.mxu0 }
 0x419   : > { %v4518_v63 = vadd.f32 %v6319_v51, %v4517_v45  ;;  %3756 = vmatmul.bf16.gmra.mxu3 %v3500_v57  ;;  %v4336_v62 = vpack.c.bf16 %v4229_v30, %v4228_v0  ;;  %v2118_v35 = vadd.f32 %v6534_v50, %v2117_v1  ;;  %v1751_v0 = vmax.f32 %v1323_v6, 0.0 }
 0x41a   : > { %v2917_v28 = vpop.f32.mrf.mxu2  ;;  %v1752_v30 = vmax.f32 %v1325_v41, 0.0 }
 0x41b   : > { %4802 = vst.msk [vmem:[%s6324_s30 + $0xc0] sm:$0xff] %vm4777_vm1, %v4518_v63  ;;  %2156 = vmatmul.bf16.gmra.mxu1 %v1828_v31  ;;  %4556 = vmatmul.bf16.gmra.mxu0 %v4336_v62  ;;  %v2918_v43 = vadd.f32 %v6385_v61, %v2917_v28  ;;  %v2576_v15 = vmax.f32 %v2118_v35, 0.0 }
 0x41c   : > { %v3717_v5 = vpop.f32.mrf.mxu3  ;;  %v1830_v14 = vpack.c.bf16 %v1752_v30, %v1751_v0 }
 0x41d   : > { %v3718_v60 = vadd.f32 %v6473_v39, %v3717_v5  ;;  %v3403_v29 = vmax.f32 %v2918_v43, 0.0 }
 0x41f   : > { %v4230_v49 = vmax.f32 %v3718_v60, 0.0 }
 0x420   : > { %v2119_v40 = vpop.f32.mrf.mxu1  ;;  %v4519_v46 = vpop.f32.mrf.mxu0 }
 0x421   : > { %v2120_v48 = vadd.f32 %v6534_v50, %v2119_v40  ;;  %v4520_v38 = vadd.f32 %v6319_v51, %v4519_v46 }
 0x422   : > { %v2919_v36 = vpop.f32.mrf.mxu2 }
 0x423   : > { %v2577_v26 = vmax.f32 %v2120_v48, 0.0  ;;  %4803 = vst.msk [vmem:[%s6324_s30 + $0xc8] sm:$0xff] %vm4777_vm1, %v4520_v38  ;;  %v2920_v9 = vadd.f32 %v6385_v61, %v2919_v36 }
 0x424   : > { %v3719_v24 = vpop.f32.mrf.mxu3 }
 0x425   : > { %v3404_v20 = vmax.f32 %v2920_v9, 0.0  ;;  %v3720_v4 = vadd.f32 %v6473_v39, %v3719_v24  ;;  %v2665_v55 = vpack.c.bf16 %v2577_v26, %v2576_v15 }
 0x427   : > { %v4231_v59 = vmax.f32 %v3720_v4, 0.0  ;;  %2961 = vmatmul.bf16.gmra.mxu2 %v2665_v55  ;;  %v3501_v10 = vpack.c.bf16 %v3404_v20, %v3403_v29 }
 0x428   : > { %v2122_v53 = vpop.f32.mrf.mxu1  ;;  %v4522_v52 = vpop.f32.mrf.mxu0 }
 0x429   : > { %v4523_v42 = vadd.f32 %v6319_v51, %v4522_v52  ;;  %3761 = vmatmul.bf16.gmra.mxu3 %v3501_v10  ;;  %v4337_v54 = vpack.c.bf16 %v4231_v59, %v4230_v49  ;;  %v2123_v19 = vadd.f32 %v6534_v50, %v2122_v53 }
 0x42a   : > { %v2922_v3 = vpop.f32.mrf.mxu2 }
 0x42b   : > { %4804 = vst.msk [vmem:[%s6324_s30 + $0xd0] sm:$0xff] %vm4777_vm1, %v4523_v42  ;;  %2161 = vmatmul.bf16.gmra.mxu1 %v1829_v12  ;;  %4561 = vmatmul.bf16.gmra.mxu0 %v4337_v54  ;;  %v2923_v18 = vadd.f32 %v6385_v61, %v2922_v3  ;;  %v2578_v11 = vmax.f32 %v2123_v19, 0.0 }
 0x42c   : > { %v3722_v23 = vpop.f32.mrf.mxu3 }
 0x42d   : > { %v3723_v21 = vadd.f32 %v6473_v39, %v3722_v23  ;;  %v3405_v57 = vmax.f32 %v2923_v18, 0.0 }
 0x42f   : > { %v4232_v31 = vmax.f32 %v3723_v21, 0.0 }
 0x430   : > { %v2124_v2 = vpop.f32.mrf.mxu1  ;;  %v4524_v32 = vpop.f32.mrf.mxu0 }
 0x431   : > { %v2125_v16 = vadd.f32 %v6534_v50, %v2124_v2  ;;  %v4525_v22 = vadd.f32 %v6319_v51, %v4524_v32 }
 0x432   : > { %v2924_v58 = vpop.f32.mrf.mxu2 }
 0x433   : > { %v2579_v17 = vmax.f32 %v2125_v16, 0.0  ;;  %4805 = vst.msk [vmem:[%s6324_s30 + $0xd8] sm:$0xff] %vm4777_vm1, %v4525_v22  ;;  %v2925_v25 = vadd.f32 %v6385_v61, %v2924_v58 }
 0x434   : > { %v3724_v27 = vpop.f32.mrf.mxu3 }
 0x435   : > { %v3406_v1 = vmax.f32 %v2925_v25, 0.0  ;;  %v3725_v45 = vadd.f32 %v6473_v39, %v3724_v27  ;;  %v2666_v63 = vpack.c.bf16 %v2579_v17, %v2578_v11 }
 0x437   : > { %v4233_v62 = vmax.f32 %v3725_v45, 0.0  ;;  %2966 = vmatmul.bf16.gmra.mxu2 %v2666_v63  ;;  %v3502_v28 = vpack.c.bf16 %v3406_v1, %v3405_v57 }
 0x438   : > { %v2127_v5 = vpop.f32.mrf.mxu1  ;;  %v4527_v35 = vpop.f32.mrf.mxu0 }
 0x439   : > { %v4528_v8 = vadd.f32 %v6319_v51, %v4527_v35  ;;  %3766 = vmatmul.bf16.gmra.mxu3 %v3502_v28  ;;  %v4338_v40 = vpack.c.bf16 %v4233_v62, %v4232_v31  ;;  %v2128_v48 = vadd.f32 %v6534_v50, %v2127_v5  ;;  %v6574_v51 = vld [vmem:[%s7165_s10] ss:$0 sm:$0xff] }
 0x43a   : > { %v2927_v46 = vpop.f32.mrf.mxu2  ;;  %v7188_v35 = vld [vmem:[#allocation2_spill] sm:$0xff] }
 0x43b   : > { %4806 = vst.msk [vmem:[%s6324_s30 + $0xe0] sm:$0xff] %vm4777_vm1, %v4528_v8  ;;  %2166 = vmatmul.bf16.gmra.mxu1 %v1830_v14  ;;  %4566 = vmatmul.bf16.gmra.mxu0 %v4338_v40  ;;  %v2928_v15 = vadd.f32 %v6385_v61, %v2927_v46  ;;  %v2580_v37 = vmax.f32 %v2128_v48, 0.0  ;;  %v7189_v40 = vld [vmem:[#allocation3_spill] sm:$0xff] }
 0x43c   : > { %v3727_v43 = vpop.f32.mrf.mxu3  ;;  %v1338_v46 = vadd.f32 %v6376_v34, %v7189_v40 }
 0x43d   : > { %v3728_v44 = vadd.f32 %v6473_v39, %v3727_v43  ;;  %v3407_v4 = vmax.f32 %v2928_v15, 0.0  ;;  %v7190_v43 = vld [vmem:[#allocation4_spill] sm:$0xff] }
 0x43e   : > { %v1340_v48 = vadd.f32 %v6376_v34, %v7190_v43 }
 0x43f   : > { %v4234_v10 = vmax.f32 %v3728_v44, 0.0 }
 0x440   : > { %v2129_v38 = vpop.f32.mrf.mxu1  ;;  %v4529_v36 = vpop.f32.mrf.mxu0 }
 0x441   : > { %v2130_v60 = vadd.f32 %v6534_v50, %v2129_v38  ;;  %v4530_v26 = vadd.f32 %v6574_v51, %v4529_v36 }
 0x442   : > { %v2929_v9 = vpop.f32.mrf.mxu2 }
 0x443   : > { %v2581_v24 = vmax.f32 %v2130_v60, 0.0  ;;  %4807 = vst.msk [vmem:[%s6324_s30 + $0xe8] sm:$0xff] %vm4777_vm1, %v4530_v26  ;;  %v2930_v29 = vadd.f32 %v6385_v61, %v2929_v9 }
 0x444   : > { %v3729_v20 = vpop.f32.mrf.mxu3 }
 0x445   : > { %v3408_v55 = vmax.f32 %v2930_v29, 0.0  ;;  %v3730_v49 = vadd.f32 %v6473_v39, %v3729_v20  ;;  %v2667_v59 = vpack.c.bf16 %v2581_v24, %v2580_v37  ;;  %v1757_v20 = vmax.f32 %v1338_v46, 0.0 }
 0x447   : > { %v4235_v53 = vmax.f32 %v3730_v49, 0.0  ;;  %2971 = vmatmul.bf16.gmra.mxu2 %v2667_v59  ;;  %v3503_v52 = vpack.c.bf16 %v3408_v55, %v3407_v4  ;;  %v1758_v4 = vmax.f32 %v1340_v48, 0.0 }
 0x448   : > { %v2132_v42 = vpop.f32.mrf.mxu1  ;;  %v4532_v12 = vpop.f32.mrf.mxu0 }
 0x449   : > { %v4533_v54 = vadd.f32 %v6574_v51, %v4532_v12  ;;  %3771 = vmatmul.bf16.gmra.mxu3 %v3503_v52  ;;  %v4339_v3 = vpack.c.bf16 %v4235_v53, %v4234_v10  ;;  %v2133_v6 = vadd.f32 %v6534_v50, %v2132_v42 }
 0x44a   : > { %v2932_v23 = vpop.f32.mrf.mxu2 }
 0x44b   : > { %4808 = vst.msk [vmem:[%s6324_s30 + $0xf0] sm:$0xff] %vm4777_vm1, %v4533_v54  ;;  %2171 = vmatmul.bf16.gmra.mxu1 %v6048_v47  ;;  %4571 = vmatmul.bf16.gmra.mxu0 %v4339_v3  ;;  %v2933_v32 = vadd.f32 %v6385_v61, %v2932_v23  ;;  %v2582_v58 = vmax.f32 %v2133_v6, 0.0 }
 0x44c   : > { %v3732_v19 = vpop.f32.mrf.mxu3 }
 0x44d   : > { %v3733_v11 = vadd.f32 %v6473_v39, %v3732_v19  ;;  %v3409_v25 = vmax.f32 %v2933_v32, 0.0  ;;  %v1833_v19 = vpack.c.bf16 %v1758_v4, %v1757_v20  ;;  %v6644_v20 = vld [vmem:[%s7161_s6] ss:$0 sm:$0xff] }
 0x44f   : > { %v4236_v57 = vmax.f32 %v3733_v11, 0.0 }
 0x450   : > { %v2134_v41 = vpop.f32.mrf.mxu1  ;;  %v4534_v2 = vpop.f32.mrf.mxu0 }
 0x451   : > { %v2135_v18 = vadd.f32 %v6534_v50, %v2134_v41  ;;  %v4535_v16 = vadd.f32 %v6574_v51, %v4534_v2 }
 0x452   : > { %v2934_v22 = vpop.f32.mrf.mxu2 }
 0x453   : > { %v2583_v21 = vmax.f32 %v2135_v18, 0.0  ;;  %4809 = vst.msk [vmem:[%s6324_s30 + $0xf8] sm:$0xff] %vm4777_vm1, %v4535_v16  ;;  %v2935_v47 = vadd.f32 %v6385_v61, %v2934_v22  ;;  %v7191_v18 = vld [vmem:[#allocation5_spill] sm:$0xff]  ;;  %v7192_v22 = vld [vmem:[#allocation6_spill] sm:$0xff] }
 0x454   : > { %v3734_v17 = vpop.f32.mrf.mxu3  ;;  %v1343_v16 = vadd.f32 %v6376_v34, %v7191_v18 }
 0x455   : > { %v3410_v0 = vmax.f32 %v2935_v47, 0.0  ;;  %v3735_v30 = vadd.f32 %v6473_v39, %v3734_v17  ;;  %v2668_v27 = vpack.c.bf16 %v2583_v21, %v2582_v58  ;;  %v1345_v58 = vadd.f32 %v6376_v34, %v7192_v22 }
 0x457   : > { %v4237_v1 = vmax.f32 %v3735_v30, 0.0  ;;  %2976 = vmatmul.bf16.gmra.mxu2 %v2668_v27  ;;  %v3504_v45 = vpack.c.bf16 %v3410_v0, %v3409_v25 }
 0x458   : > { %v2137_v63 = vpop.f32.mrf.mxu1  ;;  %v4537_v31 = vpop.f32.mrf.mxu0 }
 0x459   : > { %v4538_v62 = vadd.f32 %v6574_v51, %v4537_v31  ;;  %3776 = vmatmul.bf16.gmra.mxu3 %v3504_v45  ;;  %v4340_v28 = vpack.c.bf16 %v4237_v1, %v4236_v57  ;;  %v2138_v14 = vadd.f32 %v6534_v50, %v2137_v63  ;;  %v1759_v45 = vmax.f32 %v1343_v16, 0.0 }
 0x45a   : > { %v2937_v5 = vpop.f32.mrf.mxu2  ;;  %v1760_v63 = vmax.f32 %v1345_v58, 0.0 }
 0x45b   : > { %4810 = vst.msk [vmem:[%s6324_s30 + $0x100] sm:$0xff] %vm4777_vm1, %v4538_v62  ;;  %2176 = vmatmul.bf16.gmra.mxu1 %v7188_v35  ;;  %4576 = vmatmul.bf16.gmra.mxu0 %v4340_v28  ;;  %v2938_v15 = vadd.f32 %v6385_v61, %v2937_v5  ;;  %v2584_v37 = vmax.f32 %v2138_v14, 0.0 }
 0x45c   : > { %v3737_v8 = vpop.f32.mrf.mxu3  ;;  %v1834_v48 = vpack.c.bf16 %v1760_v63, %v1759_v45 }
 0x45d   : > { %v3738_v44 = vadd.f32 %v6473_v39, %v3737_v8  ;;  %v3411_v49 = vmax.f32 %v2938_v15, 0.0 }
 0x45f   : > { %v4238_v52 = vmax.f32 %v3738_v44, 0.0 }
 0x460   : > { %v2139_v38 = vpop.f32.mrf.mxu1  ;;  %v4539_v36 = vpop.f32.mrf.mxu0 }
 0x461   : > { %v2140_v60 = vadd.f32 %v6534_v50, %v2139_v38  ;;  %v4540_v26 = vadd.f32 %v6574_v51, %v4539_v36 }
 0x462   : > { %v2939_v9 = vpop.f32.mrf.mxu2 }
 0x463   : > { %v2585_v24 = vmax.f32 %v2140_v60, 0.0  ;;  %4811 = vst.msk [vmem:[%s6324_s30 + $0x108] sm:$0xff] %vm4777_vm1, %v4540_v26  ;;  %v2940_v29 = vadd.f32 %v6385_v61, %v2939_v9  ;;  %v6635_v60 = vld [vmem:[%s7157_s2] ss:$0 sm:$0xff]  ;;  %v7193_v26 = vld [vmem:[#allocation7_spill] sm:$0xff] }
 0x464   : > { %v3739_v55 = vpop.f32.mrf.mxu3  ;;  %v1348_v9 = vadd.f32 %v6635_v60, %v7193_v26 }
 0x465   : > { %v3412_v59 = vmax.f32 %v2940_v29, 0.0  ;;  %v3740_v10 = vadd.f32 %v6473_v39, %v3739_v55  ;;  %v2669_v53 = vpack.c.bf16 %v2585_v24, %v2584_v37  ;;  %v7194_v37 = vld [vmem:[#allocation8_spill] sm:$0xff] }
 0x466   : > { %v1350_v44 = vadd.f32 %v6635_v60, %v7194_v37 }
 0x467   : > { %v4239_v42 = vmax.f32 %v3740_v10, 0.0  ;;  %2981 = vmatmul.bf16.gmra.mxu2 %v2669_v53  ;;  %v3505_v12 = vpack.c.bf16 %v3412_v59, %v3411_v49 }
 0x468   : > { %v2142_v54 = vpop.f32.mrf.mxu1  ;;  %v4542_v3 = vpop.f32.mrf.mxu0 }
 0x469   : > { %v4543_v23 = vadd.f32 %v6574_v51, %v4542_v3  ;;  %3781 = vmatmul.bf16.gmra.mxu3 %v3505_v12  ;;  %v4341_v6 = vpack.c.bf16 %v4239_v42, %v4238_v52  ;;  %v2143_v32 = vadd.f32 %v6534_v50, %v2142_v54  ;;  %v1761_v12 = vmax.f32 %v1348_v9, 0.0 }
 0x46a   : > { %v2942_v41 = vpop.f32.mrf.mxu2  ;;  %v1762_v54 = vmax.f32 %v1350_v44, 0.0 }
 0x46b   : > { %4812 = vst.msk [vmem:[%s6324_s30 + $0x110] sm:$0xff] %vm4777_vm1, %v4543_v23  ;;  %2181 = vmatmul.bf16.gmra.mxu1 %v1833_v19  ;;  %4581 = vmatmul.bf16.gmra.mxu0 %v4341_v6  ;;  %v2943_v47 = vadd.f32 %v6385_v61, %v2942_v41  ;;  %v2586_v30 = vmax.f32 %v2143_v32, 0.0 }
 0x46c   : > { %v3742_v2 = vpop.f32.mrf.mxu3 }
 0x46d   : > { %v3743_v27 = vadd.f32 %v6473_v39, %v3742_v2  ;;  %v3413_v31 = vmax.f32 %v2943_v47, 0.0 }
 0x46f   : > { %v4240_v35 = vmax.f32 %v3743_v27, 0.0  ;;  %v7196_v27 = vld [vmem:[#allocation10_spill] sm:$0xff] }
 0x470   : > { %v2144_v11 = vpop.f32.mrf.mxu1  ;;  %v4544_v21 = vpop.f32.mrf.mxu0 }
 0x471   : > { %v2145_v17 = vadd.f32 %v6534_v50, %v2144_v11  ;;  %v4545_v25 = vadd.f32 %v6574_v51, %v4544_v21  ;;  %v1835_v11 = vpack.c.bf16 %v1762_v54, %v1761_v12 }
 0x472   : > { %v2944_v0 = vpop.f32.mrf.mxu2 }
 0x473   : > { %v2587_v57 = vmax.f32 %v2145_v17, 0.0  ;;  %4813 = vst.msk [vmem:[%s6324_s30 + $0x118] sm:$0xff] %vm4777_vm1, %v4545_v25  ;;  %v2945_v1 = vadd.f32 %v6385_v61, %v2944_v0  ;;  %v7195_v0 = vld [vmem:[#allocation9_spill] sm:$0xff] }
 0x474   : > { %v3744_v34 = vpop.f32.mrf.mxu3 }
 0x475   : > { %v3414_v62 = vmax.f32 %v2945_v1, 0.0  ;;  %v3745_v28 = vadd.f32 %v6473_v39, %v3744_v34  ;;  %v2670_v5 = vpack.c.bf16 %v2587_v57, %v2586_v30  ;;  %v1353_v30 = vadd.f32 %v6635_v60, %v7195_v0 }
 0x476   : > { %v1355_v57 = vadd.f32 %v6635_v60, %v7196_v27 }
 0x477   : > { %v4241_v8 = vmax.f32 %v3745_v28, 0.0  ;;  %2986 = vmatmul.bf16.gmra.mxu2 %v2670_v5  ;;  %v3506_v14 = vpack.c.bf16 %v3414_v62, %v3413_v31 }
 0x478   : > { %v2147_v40 = vpop.f32.mrf.mxu1  ;;  %v4547_v46 = vpop.f32.mrf.mxu0 }
 0x479   : > { %v4548_v43 = vadd.f32 %v6574_v51, %v4547_v46  ;;  %3786 = vmatmul.bf16.gmra.mxu3 %v3506_v14  ;;  %v4342_v61 = vpack.c.bf16 %v4241_v8, %v4240_v35  ;;  %v2148_v15 = vadd.f32 %v6534_v50, %v2147_v40  ;;  %v1763_v14 = vmax.f32 %v1353_v30, 0.0 }
 0x47a   : > { %v2947_v38 = vpop.f32.mrf.mxu2  ;;  %v1764_v40 = vmax.f32 %v1355_v57, 0.0 }
 0x47b   : > { %4814 = vst.msk [vmem:[%s6324_s30 + $0x120] sm:$0xff] %vm4777_vm1, %v4548_v43  ;;  %2186 = vmatmul.bf16.gmra.mxu1 %v1834_v48  ;;  %4586 = vmatmul.bf16.gmra.mxu0 %v4342_v61  ;;  %v2948_v4 = vadd.f32 %v6644_v20, %v2947_v38  ;;  %v2588_v10 = vmax.f32 %v2148_v15, 0.0 }
 0x47c   : > { %v3747_v36 = vpop.f32.mrf.mxu3 }
 0x47d   : > { %v3748_v53 = vadd.f32 %v6473_v39, %v3747_v36  ;;  %v3415_v23 = vmax.f32 %v2948_v4, 0.0 }
 0x47f   : > { %v4242_v2 = vmax.f32 %v3748_v53, 0.0  ;;  %v7198_v53 = vld [vmem:[#allocation12_spill] sm:$0xff] }
 0x480   : > { %v2149_v24 = vpop.f32.mrf.mxu1  ;;  %v4549_v29 = vpop.f32.mrf.mxu0 }
 0x481   : > { %v2150_v55 = vadd.f32 %v6534_v50, %v2149_v24  ;;  %v4550_v49 = vadd.f32 %v6574_v51, %v4549_v29  ;;  %v1836_v24 = vpack.c.bf16 %v1764_v40, %v1763_v14 }
 0x482   : > { %v2949_v59 = vpop.f32.mrf.mxu2 }
 0x483   : > { %v2589_v52 = vmax.f32 %v2150_v55, 0.0  ;;  %4815 = vst.msk [vmem:[%s6324_s30 + $0x128] sm:$0xff] %vm4777_vm1, %v4550_v49  ;;  %v2950_v42 = vadd.f32 %v6644_v20, %v2949_v59  ;;  %v7197_v59 = vld [vmem:[#allocation11_spill] sm:$0xff] }
 0x484   : > { %v3749_v3 = vpop.f32.mrf.mxu3 }
 0x485   : > { %v3416_v19 = vmax.f32 %v2950_v42, 0.0  ;;  %v3750_v6 = vadd.f32 %v6473_v39, %v3749_v3  ;;  %v2671_v41 = vpack.c.bf16 %v2589_v52, %v2588_v10  ;;  %v1358_v10 = vadd.f32 %v6635_v60, %v7197_v59 }
 0x486   : > { %v1360_v52 = vadd.f32 %v6635_v60, %v7198_v53 }
 0x487   : > { %v4243_v32 = vmax.f32 %v3750_v6, 0.0  ;;  %2991 = vmatmul.bf16.gmra.mxu2 %v2671_v41  ;;  %v3507_v18 = vpack.c.bf16 %v3416_v19, %v3415_v23 }
 0x488   : > { %v2152_v16 = vpop.f32.mrf.mxu1  ;;  %v4552_v22 = vpop.f32.mrf.mxu0 }
 0x489   : > { %v4553_v58 = vadd.f32 %v6574_v51, %v4552_v22  ;;  %3791 = vmatmul.bf16.gmra.mxu3 %v3507_v18  ;;  %v4343_v21 = vpack.c.bf16 %v4243_v32, %v4242_v2  ;;  %v2153_v25 = vadd.f32 %v6534_v50, %v2152_v16  ;;  %v1765_v18 = vmax.f32 %v1358_v10, 0.0 }
 0x48a   : > { %v2952_v47 = vpop.f32.mrf.mxu2  ;;  %v1766_v16 = vmax.f32 %v1360_v52, 0.0 }
 0x48b   : > { %4816 = vst.msk [vmem:[%s6324_s30 + $0x130] sm:$0xff] %vm4777_vm1, %v4553_v58  ;;  %2191 = vmatmul.bf16.gmra.mxu1 %v1835_v11  ;;  %4591 = vmatmul.bf16.gmra.mxu0 %v4343_v21  ;;  %v2953_v63 = vadd.f32 %v6644_v20, %v2952_v47  ;;  %v2590_v28 = vmax.f32 %v2153_v25, 0.0 }
 0x48c   : > { %v3752_v17 = vpop.f32.mrf.mxu3 }
 0x48d   : > { %v3753_v5 = vadd.f32 %v6473_v39, %v3752_v17  ;;  %v3417_v43 = vmax.f32 %v2953_v63, 0.0 }
 0x48f   : > { %v4244_v36 = vmax.f32 %v3753_v5, 0.0  ;;  %v7200_v5 = vld [vmem:[#allocation14_spill] sm:$0xff] }
 0x490   : > { %v2154_v1 = vpop.f32.mrf.mxu1  ;;  %v4554_v45 = vpop.f32.mrf.mxu0 }
 0x491   : > { %v2155_v34 = vadd.f32 %v6534_v50, %v2154_v1  ;;  %v4555_v31 = vadd.f32 %v6574_v51, %v4554_v45  ;;  %v1837_v1 = vpack.c.bf16 %v1766_v16, %v1765_v18 }
 0x492   : > { %v2954_v62 = vpop.f32.mrf.mxu2 }
 0x493   : > { %v2591_v35 = vmax.f32 %v2155_v34, 0.0  ;;  %4817 = vst.msk [vmem:[%s6324_s30 + $0x138] sm:$0xff] %vm4777_vm1, %v4555_v31  ;;  %v2955_v8 = vadd.f32 %v6644_v20, %v2954_v62  ;;  %v7199_v62 = vld [vmem:[#allocation13_spill] sm:$0xff] }
 0x494   : > { %v3754_v46 = vpop.f32.mrf.mxu3 }
 0x495   : > { %v3418_v48 = vmax.f32 %v2955_v8, 0.0  ;;  %v3755_v61 = vadd.f32 %v6473_v39, %v3754_v46  ;;  %v2672_v38 = vpack.c.bf16 %v2591_v35, %v2590_v28  ;;  %v1363_v28 = vadd.f32 %v6635_v60, %v7199_v62 }
 0x496   : > { %v1365_v35 = vadd.f32 %v6635_v60, %v7200_v5 }
 0x497   : > { %v4245_v15 = vmax.f32 %v3755_v61, 0.0  ;;  %2996 = vmatmul.bf16.gmra.mxu2 %v2672_v38  ;;  %v3508_v26 = vpack.c.bf16 %v3418_v48, %v3417_v43 }
 0x498   : > { %v2157_v9 = vpop.f32.mrf.mxu1  ;;  %v4557_v37 = vpop.f32.mrf.mxu0 }
 0x499   : > { %v4558_v44 = vadd.f32 %v6574_v51, %v4557_v37  ;;  %3796 = vmatmul.bf16.gmra.mxu3 %v3508_v26  ;;  %v4344_v29 = vpack.c.bf16 %v4245_v15, %v4244_v36  ;;  %v2158_v49 = vadd.f32 %v6534_v50, %v2157_v9  ;;  %v1767_v26 = vmax.f32 %v1363_v28, 0.0 }
 0x49a   : > { %v2957_v4 = vpop.f32.mrf.mxu2  ;;  %v1768_v9 = vmax.f32 %v1365_v35, 0.0 }
 0x49b   : > { %4818 = vst.msk [vmem:[%s6324_s30 + $0x140] sm:$0xff] %vm4777_vm1, %v4558_v44  ;;  %2196 = vmatmul.bf16.gmra.mxu1 %v1836_v24  ;;  %4596 = vmatmul.bf16.gmra.mxu0 %v4344_v29  ;;  %v2958_v54 = vadd.f32 %v6644_v20, %v2957_v4  ;;  %v2592_v6 = vmax.f32 %v2158_v49, 0.0 }
 0x49c   : > { %v3757_v55 = vpop.f32.mrf.mxu3 }
 0x49d   : > { %v3758_v41 = vadd.f32 %v6473_v39, %v3757_v55  ;;  %v3419_v58 = vmax.f32 %v2958_v54, 0.0 }
 0x49f   : > { %v4246_v17 = vmax.f32 %v3758_v41, 0.0 }
 0x4a0   : > { %v2159_v42 = vpop.f32.mrf.mxu1  ;;  %v4559_v12 = vpop.f32.mrf.mxu0 }
 0x4a1   : > { %v2160_v3 = vadd.f32 %v6534_v50, %v2159_v42  ;;  %v4560_v23 = vadd.f32 %v6574_v51, %v4559_v12  ;;  %v1838_v42 = vpack.c.bf16 %v1768_v9, %v1767_v26  ;;  %v6732_v26 = vld [vmem:[%s7163_s8] ss:$0 sm:$0xff] }
 0x4a2   : > { %v2959_v19 = vpop.f32.mrf.mxu2 }
 0x4a3   : > { %v2593_v2 = vmax.f32 %v2160_v3, 0.0  ;;  %4819 = vst.msk [vmem:[%s6324_s30 + $0x148] sm:$0xff] %vm4777_vm1, %v4560_v23  ;;  %v2960_v32 = vadd.f32 %v6644_v20, %v2959_v19  ;;  %v1368_v19 = vadd.f32 %v6635_v60, %v6174_v33 }
 0x4a4   : > { %v3759_v22 = vpop.f32.mrf.mxu3 }
 0x4a5   : > { %v3420_v11 = vmax.f32 %v2960_v32, 0.0  ;;  %v3760_v21 = vadd.f32 %v6473_v39, %v3759_v22  ;;  %v2673_v47 = vpack.c.bf16 %v2593_v2, %v2592_v6  ;;  %v1370_v6 = vadd.f32 %v6635_v60, %v6178_v13 }
 0x4a7   : > { %v4247_v25 = vmax.f32 %v3760_v21, 0.0  ;;  %3001 = vmatmul.bf16.gmra.mxu2 %v2673_v47  ;;  %v3509_v0 = vpack.c.bf16 %v3420_v11, %v3419_v58  ;;  %v1769_v47 = vmax.f32 %v1368_v19, 0.0 }
 0x4a8   : > { %v2162_v30 = vpop.f32.mrf.mxu1  ;;  %v4562_v27 = vpop.f32.mrf.mxu0 }
 0x4a9   : > { %v4563_v57 = vadd.f32 %v6574_v51, %v4562_v27  ;;  %3801 = vmatmul.bf16.gmra.mxu3 %v3509_v0  ;;  %v4345_v45 = vpack.c.bf16 %v4247_v25, %v4246_v17  ;;  %v2163_v31 = vadd.f32 %v6534_v50, %v2162_v30  ;;  %v1770_v17 = vmax.f32 %v1370_v6, 0.0 }
 0x4aa   : > { %v2962_v63 = vpop.f32.mrf.mxu2 }
 0x4ab   : > { %4820 = vst.msk [vmem:[%s6324_s30 + $0x150] sm:$0xff] %vm4777_vm1, %v4563_v57  ;;  %2201 = vmatmul.bf16.gmra.mxu1 %v1837_v1  ;;  %4601 = vmatmul.bf16.gmra.mxu0 %v4345_v45  ;;  %v2963_v40 = vadd.f32 %v6644_v20, %v2962_v63  ;;  %v2594_v61 = vmax.f32 %v2163_v31, 0.0  ;;  %v1839_v62 = vpack.c.bf16 %v1770_v17, %v1769_v47 }
 0x4ac   : > { %v3762_v34 = vpop.f32.mrf.mxu3 }
 0x4ad   : > { %v3763_v38 = vadd.f32 %v6473_v39, %v3762_v34  ;;  %v3421_v44 = vmax.f32 %v2963_v40, 0.0 }
 0x4af   : > { %v4248_v55 = vmax.f32 %v3763_v38, 0.0 }
 0x4b0   : > { %v2164_v8 = vpop.f32.mrf.mxu1  ;;  %v4564_v14 = vpop.f32.mrf.mxu0 }
 0x4b1   : > { %v2165_v46 = vadd.f32 %v6534_v50, %v2164_v8  ;;  %v4565_v43 = vadd.f32 %v6574_v51, %v4564_v14  ;;  %v1373_v8 = vadd.f32 %v6635_v60, %v6183_v7  ;;  %v7201_v14 = vld [vmem:[#allocation15_spill] sm:$0xff] }
 0x4b2   : > { %v2964_v48 = vpop.f32.mrf.mxu2  ;;  %v1375_v40 = vadd.f32 %v6635_v60, %v7201_v14 }
 0x4b3   : > { %v2595_v36 = vmax.f32 %v2165_v46, 0.0  ;;  %4821 = vst.msk [vmem:[%s6324_s30 + $0x158] sm:$0xff] %vm4777_vm1, %v4565_v43  ;;  %v2965_v15 = vadd.f32 %v6644_v20, %v2964_v48 }
 0x4b4   : > { %v3764_v37 = vpop.f32.mrf.mxu3 }
 0x4b5   : > { %v3422_v24 = vmax.f32 %v2965_v15, 0.0  ;;  %v3765_v29 = vadd.f32 %v6473_v39, %v3764_v37  ;;  %v2674_v4 = vpack.c.bf16 %v2595_v36, %v2594_v61 }
 0x4b7   : > { %v4249_v49 = vmax.f32 %v3765_v29, 0.0  ;;  %3006 = vmatmul.bf16.gmra.mxu2 %v2674_v4  ;;  %v3510_v59 = vpack.c.bf16 %v3422_v24, %v3421_v44  ;;  %v1771_v44 = vmax.f32 %v1373_v8, 0.0  ;;  %v1772_v24 = vmax.f32 %v1375_v40, 0.0 }
 0x4b8   : > { %v2167_v10 = vpop.f32.mrf.mxu1  ;;  %v4567_v53 = vpop.f32.mrf.mxu0 }
 0x4b9   : > { %v4568_v52 = vadd.f32 %v6574_v51, %v4567_v53  ;;  %3806 = vmatmul.bf16.gmra.mxu3 %v3510_v59  ;;  %v4346_v12 = vpack.c.bf16 %v4249_v49, %v4248_v55  ;;  %v2168_v23 = vadd.f32 %v6534_v50, %v2167_v10 }
 0x4ba   : > { %v2967_v54 = vpop.f32.mrf.mxu2 }
 0x4bb   : > { %4822 = vst.msk [vmem:[%s6324_s30 + $0x160] sm:$0xff] %vm4777_vm1, %v4568_v52  ;;  %2206 = vmatmul.bf16.gmra.mxu1 %v1838_v42  ;;  %4606 = vmatmul.bf16.gmra.mxu0 %v4346_v12  ;;  %v2968_v32 = vadd.f32 %v6644_v20, %v2967_v54  ;;  %v2596_v58 = vmax.f32 %v2168_v23, 0.0 }
 0x4bc   : > { %v3767_v3 = vpop.f32.mrf.mxu3 }
 0x4bd   : > { %v3768_v11 = vadd.f32 %v6473_v39, %v3767_v3  ;;  %v3423_v25 = vmax.f32 %v2968_v32, 0.0  ;;  %v1840_v3 = vpack.c.bf16 %v1772_v24, %v1771_v44  ;;  %v7202_v32 = vld [vmem:[#allocation16_spill] sm:$0xff] }
 0x4bf   : > { %v4250_v57 = vmax.f32 %v3768_v11, 0.0 }
 0x4c0   : > { %v2169_v41 = vpop.f32.mrf.mxu1  ;;  %v4569_v2 = vpop.f32.mrf.mxu0 }
 0x4c1   : > { %v2170_v18 = vadd.f32 %v6534_v50, %v2169_v41  ;;  %v4570_v16 = vadd.f32 %v6574_v51, %v4569_v2  ;;  %v1378_v2 = vadd.f32 %v6635_v60, %v6196_v56 }
 0x4c2   : > { %v2969_v22 = vpop.f32.mrf.mxu2 }
 0x4c3   : > { %v2597_v21 = vmax.f32 %v2170_v18, 0.0  ;;  %4823 = vst.msk [vmem:[%s6324_s30 + $0x168] sm:$0xff] %vm4777_vm1, %v4570_v16  ;;  %v2970_v33 = vadd.f32 %v6644_v20, %v2969_v22  ;;  %v1380_v18 = vadd.f32 %v6635_v60, %v7202_v32 }
 0x4c4   : > { %v3769_v13 = vpop.f32.mrf.mxu3 }
 0x4c5   : > { %v3424_v0 = vmax.f32 %v2970_v33, 0.0  ;;  %v3770_v30 = vadd.f32 %v6473_v39, %v3769_v13  ;;  %v2675_v27 = vpack.c.bf16 %v2597_v21, %v2596_v58 }
 0x4c7   : > { %v4251_v1 = vmax.f32 %v3770_v30, 0.0  ;;  %3011 = vmatmul.bf16.gmra.mxu2 %v2675_v27  ;;  %v3511_v45 = vpack.c.bf16 %v3424_v0, %v3423_v25  ;;  %v1773_v25 = vmax.f32 %v1378_v2, 0.0  ;;  %v1774_v0 = vmax.f32 %v1380_v18, 0.0 }
 0x4c8   : > { %v2172_v63 = vpop.f32.mrf.mxu1  ;;  %v4572_v34 = vpop.f32.mrf.mxu0 }
 0x4c9   : > { %v4573_v31 = vadd.f32 %v6574_v51, %v4572_v34  ;;  %3811 = vmatmul.bf16.gmra.mxu3 %v3511_v45  ;;  %v4347_v28 = vpack.c.bf16 %v4251_v1, %v4250_v57  ;;  %v2173_v39 = vadd.f32 %v6534_v50, %v2172_v63 }
 0x4ca   : > { %v2972_v5 = vpop.f32.mrf.mxu2 }
 0x4cb   : > { %4824 = vst.msk [vmem:[%s6324_s30 + $0x170] sm:$0xff] %vm4777_vm1, %v4573_v31  ;;  %2211 = vmatmul.bf16.gmra.mxu1 %v1839_v62  ;;  %4611 = vmatmul.bf16.gmra.mxu0 %v4347_v28  ;;  %v2973_v48 = vadd.f32 %v6644_v20, %v2972_v5  ;;  %v2598_v15 = vmax.f32 %v2173_v39, 0.0 }
 0x4cc   : > { %v3772_v35 = vpop.f32.mrf.mxu3 }
 0x4cd   : > { %v3773_v7 = vadd.f32 %v6732_v26, %v3772_v35  ;;  %v3425_v4 = vmax.f32 %v2973_v48, 0.0  ;;  %v1841_v35 = vpack.c.bf16 %v1774_v0, %v1773_v25  ;;  %v7204_v48 = vld [vmem:[#allocation18_spill] sm:$0xff] }
 0x4cf   : > { %v4252_v10 = vmax.f32 %v3773_v7, 0.0 }
 0x4d0   : > { %v2174_v46 = vpop.f32.mrf.mxu1  ;;  %v4574_v43 = vpop.f32.mrf.mxu0 }
 0x4d1   : > { %v2175_v61 = vadd.f32 %v6534_v50, %v2174_v46  ;;  %v4575_v38 = vadd.f32 %v6574_v51, %v4574_v43  ;;  %v7203_v46 = vld [vmem:[#allocation17_spill] sm:$0xff] }
 0x4d2   : > { %v2974_v36 = vpop.f32.mrf.mxu2  ;;  %v1383_v43 = vadd.f32 %v6635_v60, %v7203_v46 }
 0x4d3   : > { %v2599_v9 = vmax.f32 %v2175_v61, 0.0  ;;  %4825 = vst.msk [vmem:[%s6324_s30 + $0x178] sm:$0xff] %vm4777_vm1, %v4575_v38  ;;  %v2975_v37 = vadd.f32 %v6644_v20, %v2974_v36  ;;  %v1385_v61 = vadd.f32 %v6635_v60, %v7204_v48 }
 0x4d4   : > { %v3774_v29 = vpop.f32.mrf.mxu3 }
 0x4d5   : > { %v3426_v55 = vmax.f32 %v2975_v37, 0.0  ;;  %v3775_v49 = vadd.f32 %v6732_v26, %v3774_v29  ;;  %v2676_v59 = vpack.c.bf16 %v2599_v9, %v2598_v15 }
 0x4d7   : > { %v4253_v53 = vmax.f32 %v3775_v49, 0.0  ;;  %3016 = vmatmul.bf16.gmra.mxu2 %v2676_v59  ;;  %v3512_v52 = vpack.c.bf16 %v3426_v55, %v3425_v4  ;;  %v1775_v55 = vmax.f32 %v1383_v43, 0.0  ;;  %v1776_v49 = vmax.f32 %v1385_v61, 0.0  ;;  %v6793_v61 = vld [vmem:[%s7159_s4] ss:$0 sm:$0xff] }
 0x4d8   : > { %v2177_v42 = vpop.f32.mrf.mxu1  ;;  %v4577_v12 = vpop.f32.mrf.mxu0 }
 0x4d9   : > { %v4578_v54 = vadd.f32 %v6574_v51, %v4577_v12  ;;  %3816 = vmatmul.bf16.gmra.mxu3 %v3512_v52  ;;  %v4348_v23 = vpack.c.bf16 %v4253_v53, %v4252_v10  ;;  %v2178_v41 = vadd.f32 %v6534_v50, %v2177_v42 }
 0x4da   : > { %v2977_v19 = vpop.f32.mrf.mxu2 }
 0x4db   : > { %4826 = vst.msk [vmem:[%s6324_s30 + $0x180] sm:$0xff] %vm4777_vm1, %v4578_v54  ;;  %2216 = vmatmul.bf16.gmra.mxu1 %v1840_v3  ;;  %4616 = vmatmul.bf16.gmra.mxu0 %v4348_v23  ;;  %v2978_v58 = vadd.f32 %v6644_v20, %v2977_v19  ;;  %v2600_v47 = vmax.f32 %v2178_v41, 0.0  ;;  %v1842_v41 = vpack.c.bf16 %v1776_v49, %v1775_v55 }
 0x4dc   : > { %v3777_v6 = vpop.f32.mrf.mxu3 }
 0x4dd   : > { %v3778_v17 = vadd.f32 %v6732_v26, %v3777_v6  ;;  %v3427_v27 = vmax.f32 %v2978_v58, 0.0 }
 0x4df   : > { %v4254_v63 = vmax.f32 %v3778_v17, 0.0 }
 0x4e0   : > { %v2179_v16 = vpop.f32.mrf.mxu1  ;;  %v4579_v22 = vpop.f32.mrf.mxu0 }
 0x4e1   : > { %v2180_v11 = vadd.f32 %v6534_v50, %v2179_v16  ;;  %v4580_v21 = vadd.f32 %v6574_v51, %v4579_v22  ;;  %v7205_v22 = vld [vmem:[#allocation19_spill] sm:$0xff] }
 0x4e2   : > { %v2979_v33 = vpop.f32.mrf.mxu2  ;;  %v1388_v58 = vadd.f32 %v6635_v60, %v7205_v22 }
 0x4e3   : > { %v2601_v13 = vmax.f32 %v2180_v11, 0.0  ;;  %4827 = vst.msk [vmem:[%s6324_s30 + $0x188] sm:$0xff] %vm4777_vm1, %v4580_v21  ;;  %v2980_v56 = vadd.f32 %v6644_v20, %v2979_v33  ;;  %v7206_v11 = vld [vmem:[#allocation20_spill] sm:$0xff] }
 0x4e4   : > { %v3779_v30 = vpop.f32.mrf.mxu3  ;;  %v1390_v21 = vadd.f32 %v6635_v60, %v7206_v11 }
 0x4e5   : > { %v3428_v57 = vmax.f32 %v2980_v56, 0.0  ;;  %v3780_v1 = vadd.f32 %v6732_v26, %v3779_v30  ;;  %v2677_v45 = vpack.c.bf16 %v2601_v13, %v2600_v47 }
 0x4e7   : > { %v4255_v34 = vmax.f32 %v3780_v1, 0.0  ;;  %3021 = vmatmul.bf16.gmra.mxu2 %v2677_v45  ;;  %v3513_v31 = vpack.c.bf16 %v3428_v57, %v3427_v27  ;;  %v1777_v1 = vmax.f32 %v1388_v58, 0.0  ;;  %v1778_v45 = vmax.f32 %v1390_v21, 0.0 }
 0x4e8   : > { %v2182_v62 = vpop.f32.mrf.mxu1  ;;  %v4582_v28 = vpop.f32.mrf.mxu0 }
 0x4e9   : > { %v4583_v5 = vadd.f32 %v6574_v51, %v4582_v28  ;;  %3821 = vmatmul.bf16.gmra.mxu3 %v3513_v31  ;;  %v4349_v39 = vpack.c.bf16 %v4255_v34, %v4254_v63  ;;  %v2183_v40 = vadd.f32 %v6534_v50, %v2182_v62 }
 0x4ea   : > { %v2982_v8 = vpop.f32.mrf.mxu2 }
 0x4eb   : > { %4828 = vst.msk [vmem:[%s6324_s30 + $0x190] sm:$0xff] %vm4777_vm1, %v4583_v5  ;;  %2221 = vmatmul.bf16.gmra.mxu1 %v1841_v35  ;;  %4621 = vmatmul.bf16.gmra.mxu0 %v4349_v39  ;;  %v2983_v15 = vadd.f32 %v6644_v20, %v2982_v8  ;;  %v2602_v44 = vmax.f32 %v2183_v40, 0.0  ;;  %v1843_v40 = vpack.c.bf16 %v1778_v45, %v1777_v1 }
 0x4ec   : > { %v3782_v14 = vpop.f32.mrf.mxu3 }
 0x4ed   : > { %v3783_v24 = vadd.f32 %v6732_v26, %v3782_v14  ;;  %v3429_v10 = vmax.f32 %v2983_v15, 0.0 }
 0x4ef   : > { %v4256_v12 = vmax.f32 %v3783_v24, 0.0 }
 0x4f0   : > { %v2184_v38 = vpop.f32.mrf.mxu1  ;;  %v4584_v36 = vpop.f32.mrf.mxu0 }
 0x4f1   : > { %v2185_v7 = vadd.f32 %v6534_v50, %v2184_v38  ;;  %v4585_v9 = vadd.f32 %v6574_v51, %v4584_v36  ;;  %v7207_v36 = vld [vmem:[#allocation21_spill] sm:$0xff] }
 0x4f2   : > { %v2984_v37 = vpop.f32.mrf.mxu2  ;;  %v1393_v15 = vadd.f32 %v6635_v60, %v7207_v36 }
 0x4f3   : > { %v2603_v29 = vmax.f32 %v2185_v7, 0.0  ;;  %4829 = vst.msk [vmem:[%s6324_s30 + $0x198] sm:$0xff] %vm4777_vm1, %v4585_v9  ;;  %v2985_v4 = vadd.f32 %v6644_v20, %v2984_v37  ;;  %v7208_v7 = vld [vmem:[#allocation22_spill] sm:$0xff] }
 0x4f4   : > { %v3784_v59 = vpop.f32.mrf.mxu3  ;;  %v1395_v9 = vadd.f32 %v6635_v60, %v7208_v7 }
 0x4f5   : > { %v2678_v53 = vpack.c.bf16 %v2603_v29, %v2602_v44  ;;  %v3430_v52 = vmax.f32 %v2985_v4, 0.0  ;;  %v3785_v42 = vadd.f32 %v6732_v26, %v3784_v59 }
 0x4f7   : > { %v4257_v54 = vmax.f32 %v3785_v42, 0.0  ;;  %3026 = vmatmul.bf16.gmra.mxu2 %v2678_v53  ;;  %v3514_v3 = vpack.c.bf16 %v3430_v52, %v3429_v10  ;;  %v1779_v52 = vmax.f32 %v1393_v15, 0.0  ;;  %v1780_v42 = vmax.f32 %v1395_v9, 0.0 }
 0x4f8   : > { %v2187_v23 = vpop.f32.mrf.mxu1  ;;  %v4587_v19 = vpop.f32.mrf.mxu0 }
 0x4f9   : > { %v4588_v6 = vadd.f32 %v6574_v51, %v4587_v19  ;;  %3826 = vmatmul.bf16.gmra.mxu3 %v3514_v3  ;;  %v4350_v2 = vpack.c.bf16 %v4257_v54, %v4256_v12  ;;  %v2188_v16 = vadd.f32 %v6534_v50, %v2187_v23 }
 0x4fa   : > { %v2987_v32 = vpop.f32.mrf.mxu2 }
 0x4fb   : > { %4830 = vst.msk [vmem:[%s6324_s30 + $0x1a0] sm:$0xff] %vm4777_vm1, %v4588_v6  ;;  %2226 = vmatmul.bf16.gmra.mxu1 %v1842_v41  ;;  %4626 = vmatmul.bf16.gmra.mxu0 %v4350_v2  ;;  %v2988_v17 = vadd.f32 %v6644_v20, %v2987_v32  ;;  %v2604_v0 = vmax.f32 %v2188_v16, 0.0  ;;  %v1844_v16 = vpack.c.bf16 %v1780_v42, %v1779_v52 }
 0x4fc   : > { %v3787_v18 = vpop.f32.mrf.mxu3 }
 0x4fd   : > { %v3788_v30 = vadd.f32 %v6732_v26, %v3787_v18  ;;  %v3431_v34 = vmax.f32 %v2988_v17, 0.0 }
 0x4ff   : > { %v4258_v28 = vmax.f32 %v3788_v30, 0.0 }
 0x500   : > { %v2189_v33 = vpop.f32.mrf.mxu1  ;;  %v4589_v47 = vpop.f32.mrf.mxu0 }
 0x501   : > { %v2190_v13 = vadd.f32 %v6534_v50, %v2189_v33  ;;  %v4590_v56 = vadd.f32 %v6574_v51, %v4589_v47 }
 0x502   : > { %v2989_v25 = vpop.f32.mrf.mxu2 }
 0x503   : > { %v2605_v27 = vmax.f32 %v2190_v13, 0.0  ;;  %4831 = vst.msk [vmem:[%s6324_s30 + $0x1a8] sm:$0xff] %vm4777_vm1, %v4590_v56  ;;  %v2990_v57 = vadd.f32 %v6644_v20, %v2989_v25 }
 0x504   : > { %v3789_v63 = vpop.f32.mrf.mxu3 }
 0x505   : > { %v2679_v31 = vpack.c.bf16 %v2605_v27, %v2604_v0  ;;  %v3432_v62 = vmax.f32 %v2990_v57, 0.0  ;;  %v3790_v50 = vadd.f32 %v6732_v26, %v3789_v63 }
 0x507   : > { %v4259_v5 = vmax.f32 %v3790_v50, 0.0  ;;  %3031 = vmatmul.bf16.gmra.mxu2 %v2679_v31  ;;  %v3515_v35 = vpack.c.bf16 %v3432_v62, %v3431_v34 }
 0x508   : > { %v2192_v39 = vpop.f32.mrf.mxu1  ;;  %v4592_v8 = vpop.f32.mrf.mxu0 }
 0x509   : > { %v4593_v14 = vadd.f32 %v6574_v51, %v4592_v8  ;;  %3831 = vmatmul.bf16.gmra.mxu3 %v3515_v35  ;;  %v4351_v46 = vpack.c.bf16 %v4259_v5, %v4258_v28  ;;  %v2193_v38 = vadd.f32 %v6793_v61, %v2192_v39  ;;  %v6823_v35 = vld [vmem:[%s7165_s10] ss:$0 sm:$0xff] }
 0x50a   : > { %v2992_v43 = vpop.f32.mrf.mxu2 }
 0x50b   : > { %4832 = vst.msk [vmem:[%s6324_s30 + $0x1b0] sm:$0xff] %vm4777_vm1, %v4593_v14  ;;  %2231 = vmatmul.bf16.gmra.mxu1 %v1843_v40  ;;  %4631 = vmatmul.bf16.gmra.mxu0 %v4351_v46  ;;  %v2993_v24 = vadd.f32 %v6644_v20, %v2992_v43  ;;  %v2606_v49 = vmax.f32 %v2193_v38, 0.0 }
 0x50c   : > { %v3792_v48 = vpop.f32.mrf.mxu3 }
 0x50d   : > { %v3793_v59 = vadd.f32 %v6732_v26, %v3792_v48  ;;  %v3433_v12 = vmax.f32 %v2993_v24, 0.0 }
 0x50f   : > { %v4260_v19 = vmax.f32 %v3793_v59, 0.0 }
 0x510   : > { %v2194_v37 = vpop.f32.mrf.mxu1  ;;  %v4594_v44 = vpop.f32.mrf.mxu0 }
 0x511   : > { %v2195_v29 = vadd.f32 %v6793_v61, %v2194_v37  ;;  %v4595_v4 = vadd.f32 %v6574_v51, %v4594_v44 }
 0x512   : > { %v2994_v55 = vpop.f32.mrf.mxu2 }
 0x513   : > { %v2607_v10 = vmax.f32 %v2195_v29, 0.0  ;;  %4833 = vst.msk [vmem:[%s6324_s30 + $0x1b8] sm:$0xff] %vm4777_vm1, %v4595_v4  ;;  %v2995_v53 = vadd.f32 %v6644_v20, %v2994_v55 }
 0x514   : > { %v3794_v60 = vpop.f32.mrf.mxu3 }
 0x515   : > { %v2680_v54 = vpack.c.bf16 %v2607_v10, %v2606_v49  ;;  %v3434_v3 = vmax.f32 %v2995_v53, 0.0  ;;  %v3795_v23 = vadd.f32 %v6732_v26, %v3794_v60 }
 0x517   : > { %v4261_v6 = vmax.f32 %v3795_v23, 0.0  ;;  %3036 = vmatmul.bf16.gmra.mxu2 %v2680_v54  ;;  %v3516_v41 = vpack.c.bf16 %v3434_v3, %v3433_v12 }
 0x518   : > { %v2197_v2 = vpop.f32.mrf.mxu1  ;;  %v4597_v32 = vpop.f32.mrf.mxu0 }
 0x519   : > { %v4598_v18 = vadd.f32 %v6574_v51, %v4597_v32  ;;  %3836 = vmatmul.bf16.gmra.mxu3 %v3516_v41  ;;  %v4352_v22 = vpack.c.bf16 %v4261_v6, %v4260_v19  ;;  %v2198_v21 = vadd.f32 %v6793_v61, %v2197_v2 }
 0x51a   : > { %v2997_v58 = vpop.f32.mrf.mxu2 }
 0x51b   : > { %4834 = vst.msk [vmem:[%s6324_s30 + $0x1c0] sm:$0xff] %vm4777_vm1, %v4598_v18  ;;  %2236 = vmatmul.bf16.gmra.mxu1 %v1844_v16  ;;  %4636 = vmatmul.bf16.gmra.mxu0 %v4352_v22  ;;  %v2998_v17 = vadd.f32 %v6644_v20, %v2997_v58  ;;  %v2608_v0 = vmax.f32 %v2198_v21, 0.0 }
 0x51c   : > { %v3797_v11 = vpop.f32.mrf.mxu3 }
 0x51d   : > { %v3798_v30 = vadd.f32 %v6732_v26, %v3797_v11  ;;  %v3435_v45 = vmax.f32 %v2998_v17, 0.0 }
 0x51f   : > { %v4262_v62 = vmax.f32 %v3798_v30, 0.0 }
 0x520   : > { %v2199_v33 = vpop.f32.mrf.mxu1  ;;  %v4599_v47 = vpop.f32.mrf.mxu0 }
 0x521   : > { %v2200_v13 = vadd.f32 %v6793_v61, %v2199_v33  ;;  %v4600_v56 = vadd.f32 %v6574_v51, %v4599_v47 }
 0x522   : > { %v2999_v25 = vpop.f32.mrf.mxu2 }
 0x523   : > { %v2609_v27 = vmax.f32 %v2200_v13, 0.0  ;;  %4835 = vst.msk [vmem:[%s6324_s30 + $0x1c8] sm:$0xff] %vm4777_vm1, %v4600_v56  ;;  %v3000_v57 = vadd.f32 %v6644_v20, %v2999_v25 }
 0x524   : > { %v3799_v1 = vpop.f32.mrf.mxu3 }
 0x525   : > { %v2681_v63 = vpack.c.bf16 %v2609_v27, %v2608_v0  ;;  %v3436_v34 = vmax.f32 %v3000_v57, 0.0  ;;  %v3800_v31 = vadd.f32 %v6732_v26, %v3799_v1 }
 0x527   : > { %v4263_v50 = vmax.f32 %v3800_v31, 0.0  ;;  %3041 = vmatmul.bf16.gmra.mxu2 %v2681_v63  ;;  %v3517_v51 = vpack.c.bf16 %v3436_v34, %v3435_v45 }
 0x528   : > { %v2202_v28 = vpop.f32.mrf.mxu1  ;;  %v4602_v5 = vpop.f32.mrf.mxu0 }
 0x529   : > { %v4603_v39 = vadd.f32 %v6823_v35, %v4602_v5  ;;  %3841 = vmatmul.bf16.gmra.mxu3 %v3517_v51  ;;  %v4353_v8 = vpack.c.bf16 %v4263_v50, %v4262_v62  ;;  %v2203_v46 = vadd.f32 %v6793_v61, %v2202_v28 }
 0x52a   : > { %v3002_v14 = vpop.f32.mrf.mxu2 }
 0x52b   : > { %4836 = vst.msk [vmem:[%s6324_s30 + $0x1d0] sm:$0xff] %vm4777_vm1, %v4603_v39  ;;  %4641 = vmatmul.bf16.gmra.mxu0 %v4353_v8  ;;  %v3003_v38 = vadd.f32 %v6644_v20, %v3002_v14  ;;  %v2610_v9 = vmax.f32 %v2203_v46, 0.0 }
 0x52c   : > { %v3802_v40 = vpop.f32.mrf.mxu3 }
 0x52d   : > { %v3803_v37 = vadd.f32 %v6732_v26, %v3802_v40  ;;  %v3437_v4 = vmax.f32 %v3003_v38, 0.0 }
 0x52f   : > { %v4264_v10 = vmax.f32 %v3803_v37, 0.0 }
 0x530   : > { %v2204_v43 = vpop.f32.mrf.mxu1  ;;  %v4604_v48 = vpop.f32.mrf.mxu0 }
 0x531   : > { %v2205_v36 = vadd.f32 %v6793_v61, %v2204_v43  ;;  %v4605_v15 = vadd.f32 %v6823_v35, %v4604_v48 }
 0x532   : > { %v3004_v7 = vpop.f32.mrf.mxu2 }
 0x533   : > { %v2611_v44 = vmax.f32 %v2205_v36, 0.0  ;;  %4837 = vst.msk [vmem:[%s6324_s30 + $0x1d8] sm:$0xff] %vm4777_vm1, %v4605_v15  ;;  %v3005_v24 = vadd.f32 %v6644_v20, %v3004_v7 }
 0x534   : > { %v3804_v29 = vpop.f32.mrf.mxu3 }
 0x535   : > { %v2682_v55 = vpack.c.bf16 %v2611_v44, %v2610_v9  ;;  %v3438_v49 = vmax.f32 %v3005_v24, 0.0  ;;  %v3805_v59 = vadd.f32 %v6732_v26, %v3804_v29 }
 0x537   : > { %v4265_v53 = vmax.f32 %v3805_v59, 0.0  ;;  %3046 = vmatmul.bf16.gmra.mxu2 %v2682_v55  ;;  %v3518_v52 = vpack.c.bf16 %v3438_v49, %v3437_v4 }
 0x538   : > { %v2207_v42 = vpop.f32.mrf.mxu1  ;;  %v4607_v60 = vpop.f32.mrf.mxu0 }
 0x539   : > { %v4608_v12 = vadd.f32 %v6823_v35, %v4607_v60  ;;  %3846 = vmatmul.bf16.gmra.mxu3 %v3518_v52  ;;  %v4354_v54 = vpack.c.bf16 %v4265_v53, %v4264_v10  ;;  %v2208_v19 = vadd.f32 %v6793_v61, %v2207_v42 }
 0x53a   : > { %v3007_v3 = vpop.f32.mrf.mxu2 }
 0x53b   : > { %4838 = vst.msk [vmem:[%s6324_s30 + $0x1e0] sm:$0xff] %vm4777_vm1, %v4608_v12  ;;  %4646 = vmatmul.bf16.gmra.mxu0 %v4354_v54  ;;  %v3008_v2 = vadd.f32 %v6644_v20, %v3007_v3  ;;  %v2612_v22 = vmax.f32 %v2208_v19, 0.0 }
 0x53c   : > { %v3807_v23 = vpop.f32.mrf.mxu3 }
 0x53d   : > { %v3808_v58 = vadd.f32 %v6732_v26, %v3807_v23  ;;  %v3439_v47 = vmax.f32 %v3008_v2, 0.0 }
 0x53f   : > { %v4266_v25 = vmax.f32 %v3808_v58, 0.0 }
 0x540   : > { %v2209_v6 = vpop.f32.mrf.mxu1  ;;  %v4609_v41 = vpop.f32.mrf.mxu0 }
 0x541   : > { %v2210_v32 = vadd.f32 %v6793_v61, %v2209_v6  ;;  %v4610_v18 = vadd.f32 %v6823_v35, %v4609_v41 }
 0x542   : > { %v3009_v16 = vpop.f32.mrf.mxu2 }
 0x543   : > { %v2613_v11 = vmax.f32 %v2210_v32, 0.0  ;;  %4839 = vst.msk [vmem:[%s6324_s30 + $0x1e8] sm:$0xff] %vm4777_vm1, %v4610_v18  ;;  %v3010_v21 = vadd.f32 %v6644_v20, %v3009_v16 }
 0x544   : > { %v3809_v33 = vpop.f32.mrf.mxu3 }
 0x545   : > { %v2683_v17 = vpack.c.bf16 %v2613_v11, %v2612_v22  ;;  %v3440_v13 = vmax.f32 %v3010_v21, 0.0  ;;  %v3810_v56 = vadd.f32 %v6732_v26, %v3809_v33 }
 0x547   : > { %v4267_v0 = vmax.f32 %v3810_v56, 0.0  ;;  %3051 = vmatmul.bf16.gmra.mxu2 %v2683_v17  ;;  %v3519_v30 = vpack.c.bf16 %v3440_v13, %v3439_v47 }
 0x548   : > { %v2212_v27 = vpop.f32.mrf.mxu1  ;;  %v4612_v57 = vpop.f32.mrf.mxu0 }
 0x549   : > { %v4613_v1 = vadd.f32 %v6823_v35, %v4612_v57  ;;  %3851 = vmatmul.bf16.gmra.mxu3 %v3519_v30  ;;  %v4355_v45 = vpack.c.bf16 %v4267_v0, %v4266_v25  ;;  %v2213_v31 = vadd.f32 %v6793_v61, %v2212_v27 }
 0x54a   : > { %v3012_v63 = vpop.f32.mrf.mxu2 }
 0x54b   : > { %4840 = vst.msk [vmem:[%s6324_s30 + $0x1f0] sm:$0xff] %vm4777_vm1, %v4613_v1  ;;  %4651 = vmatmul.bf16.gmra.mxu0 %v4355_v45  ;;  %v3013_v51 = vadd.f32 %v6644_v20, %v3012_v63  ;;  %v2614_v8 = vmax.f32 %v2213_v31, 0.0  ;;  %v6886_v31 = vld [vmem:[%s7161_s6] ss:$0 sm:$0xff] }
 0x54c   : > { %v3812_v34 = vpop.f32.mrf.mxu3 }
 0x54d   : > { %v3813_v14 = vadd.f32 %v6732_v26, %v3812_v34  ;;  %v3441_v48 = vmax.f32 %v3013_v51, 0.0 }
 0x54f   : > { %v4268_v7 = vmax.f32 %v3813_v14, 0.0 }
 0x550   : > { %v2214_v62 = vpop.f32.mrf.mxu1  ;;  %v4614_v50 = vpop.f32.mrf.mxu0 }
 0x551   : > { %v2215_v28 = vadd.f32 %v6793_v61, %v2214_v62  ;;  %v4615_v5 = vadd.f32 %v6823_v35, %v4614_v50 }
 0x552   : > { %v3014_v39 = vpop.f32.mrf.mxu2 }
 0x553   : > { %v2615_v40 = vmax.f32 %v2215_v28, 0.0  ;;  %4841 = vst.msk [vmem:[%s6324_s30 + $0x1f8] sm:$0xff] %vm4777_vm1, %v4615_v5  ;;  %v3015_v46 = vadd.f32 %v6644_v20, %v3014_v39 }
 0x554   : > { %v3814_v43 = vpop.f32.mrf.mxu3 }
 0x555   : > { %v2684_v38 = vpack.c.bf16 %v2615_v40, %v2614_v8  ;;  %v3442_v36 = vmax.f32 %v3015_v46, 0.0  ;;  %v3815_v15 = vadd.f32 %v6732_v26, %v3814_v43 }
 0x557   : > { %v4269_v9 = vmax.f32 %v3815_v15, 0.0  ;;  %3056 = vmatmul.bf16.gmra.mxu2 %v2684_v38  ;;  %v3520_v37 = vpack.c.bf16 %v3442_v36, %v3441_v48 }
 0x558   : > { %v2217_v44 = vpop.f32.mrf.mxu1  ;;  %v4617_v24 = vpop.f32.mrf.mxu0 }
 0x559   : > { %v4618_v29 = vadd.f32 %v6823_v35, %v4617_v24  ;;  %3856 = vmatmul.bf16.gmra.mxu3 %v3520_v37  ;;  %v4356_v4 = vpack.c.bf16 %v4269_v9, %v4268_v7  ;;  %v2218_v59 = vadd.f32 %v6793_v61, %v2217_v44 }
 0x55a   : > { %v3017_v55 = vpop.f32.mrf.mxu2 }
 0x55b   : > { %4842 = vst.msk [vmem:[%s6324_s30 + $0x200] sm:$0xff] %vm4777_vm1, %v4618_v29  ;;  %4656 = vmatmul.bf16.gmra.mxu0 %v4356_v4  ;;  %v3018_v52 = vadd.f32 %v6644_v20, %v3017_v55  ;;  %v2616_v54 = vmax.f32 %v2218_v59, 0.0 }
 0x55c   : > { %v3817_v49 = vpop.f32.mrf.mxu3 }
 0x55d   : > { %v3818_v3 = vadd.f32 %v6732_v26, %v3817_v49  ;;  %v3443_v41 = vmax.f32 %v3018_v52, 0.0 }
 0x55f   : > { %v4270_v16 = vmax.f32 %v3818_v3, 0.0 }
 0x560   : > { %v2219_v10 = vpop.f32.mrf.mxu1  ;;  %v4619_v53 = vpop.f32.mrf.mxu0 }
 0x561   : > { %v2220_v42 = vadd.f32 %v6793_v61, %v2219_v10  ;;  %v4620_v60 = vadd.f32 %v6823_v35, %v4619_v53 }
 0x562   : > { %v3019_v12 = vpop.f32.mrf.mxu2 }
 0x563   : > { %v2617_v23 = vmax.f32 %v2220_v42, 0.0  ;;  %4843 = vst.msk [vmem:[%s6324_s30 + $0x208] sm:$0xff] %vm4777_vm1, %v4620_v60  ;;  %v3020_v19 = vadd.f32 %v6644_v20, %v3019_v12 }
 0x564   : > { %v3819_v6 = vpop.f32.mrf.mxu3 }
 0x565   : > { %v2685_v2 = vpack.c.bf16 %v2617_v23, %v2616_v54  ;;  %v3444_v32 = vmax.f32 %v3020_v19, 0.0  ;;  %v3820_v18 = vadd.f32 %v6732_v26, %v3819_v6 }
 0x567   : > { %v4271_v22 = vmax.f32 %v3820_v18, 0.0  ;;  %3061 = vmatmul.bf16.gmra.mxu2 %v2685_v2  ;;  %v3521_v58 = vpack.c.bf16 %v3444_v32, %v3443_v41 }
 0x568   : > { %v2222_v11 = vpop.f32.mrf.mxu1  ;;  %v4622_v21 = vpop.f32.mrf.mxu0 }
 0x569   : > { %v4623_v33 = vadd.f32 %v6823_v35, %v4622_v21  ;;  %3861 = vmatmul.bf16.gmra.mxu3 %v3521_v58  ;;  %v4357_v47 = vpack.c.bf16 %v4271_v22, %v4270_v16  ;;  %v2223_v56 = vadd.f32 %v6793_v61, %v2222_v11 }
 0x56a   : > { %v3022_v17 = vpop.f32.mrf.mxu2 }
 0x56b   : > { %4844 = vst.msk [vmem:[%s6324_s30 + $0x210] sm:$0xff] %vm4777_vm1, %v4623_v33  ;;  %4661 = vmatmul.bf16.gmra.mxu0 %v4357_v47  ;;  %v3023_v30 = vadd.f32 %v6644_v20, %v3022_v17  ;;  %v2618_v45 = vmax.f32 %v2223_v56, 0.0 }
 0x56c   : > { %v3822_v13 = vpop.f32.mrf.mxu3 }
 0x56d   : > { %v3823_v63 = vadd.f32 %v6732_v26, %v3822_v13  ;;  %v3445_v50 = vmax.f32 %v3023_v30, 0.0 }
 0x56f   : > { %v4272_v39 = vmax.f32 %v3823_v63, 0.0 }
 0x570   : > { %v2224_v25 = vpop.f32.mrf.mxu1  ;;  %v4624_v0 = vpop.f32.mrf.mxu0 }
 0x571   : > { %v2225_v27 = vadd.f32 %v6793_v61, %v2224_v25  ;;  %v4625_v57 = vadd.f32 %v6823_v35, %v4624_v0 }
 0x572   : > { %v3024_v1 = vpop.f32.mrf.mxu2 }
 0x573   : > { %v2619_v34 = vmax.f32 %v2225_v27, 0.0  ;;  %4845 = vst.msk [vmem:[%s6324_s30 + $0x218] sm:$0xff] %vm4777_vm1, %v4625_v57  ;;  %v3025_v62 = vadd.f32 %v6886_v31, %v3024_v1 }
 0x574   : > { %v3824_v20 = vpop.f32.mrf.mxu3 }
 0x575   : > { %v2686_v51 = vpack.c.bf16 %v2619_v34, %v2618_v45  ;;  %v3446_v28 = vmax.f32 %v3025_v62, 0.0  ;;  %v3825_v5 = vadd.f32 %v6732_v26, %v3824_v20 }
 0x577   : > { %v4273_v8 = vmax.f32 %v3825_v5, 0.0  ;;  %3066 = vmatmul.bf16.gmra.mxu2 %v2686_v51  ;;  %v3522_v14 = vpack.c.bf16 %v3446_v28, %v3445_v50 }
 0x578   : > { %v2227_v40 = vpop.f32.mrf.mxu1  ;;  %v4627_v46 = vpop.f32.mrf.mxu0 }
 0x579   : > { %v4628_v43 = vadd.f32 %v6823_v35, %v4627_v46  ;;  %3866 = vmatmul.bf16.gmra.mxu3 %v3522_v14  ;;  %v4358_v48 = vpack.c.bf16 %v4273_v8, %v4272_v39  ;;  %v2228_v15 = vadd.f32 %v6793_v61, %v2227_v40 }
 0x57a   : > { %v3027_v38 = vpop.f32.mrf.mxu2 }
 0x57b   : > { %4846 = vst.msk [vmem:[%s6324_s30 + $0x220] sm:$0xff] %vm4777_vm1, %v4628_v43  ;;  %4666 = vmatmul.bf16.gmra.mxu0 %v4358_v48  ;;  %v3028_v37 = vadd.f32 %v6886_v31, %v3027_v38  ;;  %v2620_v4 = vmax.f32 %v2228_v15, 0.0 }
 0x57c   : > { %v3827_v36 = vpop.f32.mrf.mxu3 }
 0x57d   : > { %v3828_v55 = vadd.f32 %v6732_v26, %v3827_v36  ;;  %v3447_v53 = vmax.f32 %v3028_v37, 0.0 }
 0x57f   : > { %v4274_v12 = vmax.f32 %v3828_v55, 0.0 }
 0x580   : > { %v2229_v7 = vpop.f32.mrf.mxu1  ;;  %v4629_v9 = vpop.f32.mrf.mxu0 }
 0x581   : > { %v2230_v44 = vadd.f32 %v6793_v61, %v2229_v7  ;;  %v4630_v24 = vadd.f32 %v6823_v35, %v4629_v9 }
 0x582   : > { %v3029_v29 = vpop.f32.mrf.mxu2 }
 0x583   : > { %v2621_v49 = vmax.f32 %v2230_v44, 0.0  ;;  %4847 = vst.msk [vmem:[%s6324_s30 + $0x228] sm:$0xff] %vm4777_vm1, %v4630_v24  ;;  %v3030_v59 = vadd.f32 %v6886_v31, %v3029_v29 }
 0x584   : > { %v3829_v10 = vpop.f32.mrf.mxu3 }
 0x585   : > { %v2687_v52 = vpack.c.bf16 %v2621_v49, %v2620_v4  ;;  %v3448_v42 = vmax.f32 %v3030_v59, 0.0  ;;  %v3830_v60 = vadd.f32 %v6732_v26, %v3829_v10 }
 0x587   : > { %v3523_v54 = vpack.c.bf16 %v3448_v42, %v3447_v53  ;;  %v4275_v3 = vmax.f32 %v3830_v60, 0.0  ;;  %3071 = vmatmul.bf16.gmra.mxu2 %v2687_v52 }
 0x588   : > { %v2232_v23 = vpop.f32.mrf.mxu1  ;;  %v4632_v19 = vpop.f32.mrf.mxu0 }
 0x589   : > { %v4633_v6 = vadd.f32 %v6823_v35, %v4632_v19  ;;  %3871 = vmatmul.bf16.gmra.mxu3 %v3523_v54  ;;  %v4359_v41 = vpack.c.bf16 %v4275_v3, %v4274_v12  ;;  %v2233_v18 = vadd.f32 %v6793_v61, %v2232_v23 }
 0x58a   : > { %v3032_v2 = vpop.f32.mrf.mxu2 }
 0x58b   : > { %4848 = vst.msk [vmem:[%s6324_s30 + $0x230] sm:$0xff] %vm4777_vm1, %v4633_v6  ;;  %4671 = vmatmul.bf16.gmra.mxu0 %v4359_v41  ;;  %v3033_v58 = vadd.f32 %v6886_v31, %v3032_v2  ;;  %v2622_v47 = vmax.f32 %v2233_v18, 0.0 }
 0x58c   : > { %v3832_v32 = vpop.f32.mrf.mxu3 }
 0x58d   : > { %v3833_v17 = vadd.f32 %v6732_v26, %v3832_v32  ;;  %v3449_v0 = vmax.f32 %v3033_v58, 0.0 }
 0x58f   : > { %v4276_v1 = vmax.f32 %v3833_v17, 0.0 }
 0x590   : > { %v2234_v16 = vpop.f32.mrf.mxu1  ;;  %v4634_v22 = vpop.f32.mrf.mxu0 }
 0x591   : > { %v2235_v11 = vadd.f32 %v6793_v61, %v2234_v16  ;;  %v4635_v21 = vadd.f32 %v6823_v35, %v4634_v22 }
 0x592   : > { %v3034_v33 = vpop.f32.mrf.mxu2 }
 0x593   : > { %v2623_v13 = vmax.f32 %v2235_v11, 0.0  ;;  %4849 = vst.msk [vmem:[%s6324_s30 + $0x238] sm:$0xff] %vm4777_vm1, %v4635_v21  ;;  %v3035_v56 = vadd.f32 %v6886_v31, %v3034_v33 }
 0x594   : > { %v3834_v25 = vpop.f32.mrf.mxu3 }
 0x595   : > { %v2688_v30 = vpack.c.bf16 %v2623_v13, %v2622_v47  ;;  %v3450_v27 = vmax.f32 %v3035_v56, 0.0  ;;  %v3835_v57 = vadd.f32 %v6732_v26, %v3834_v25 }
 0x597   : > { %v3524_v45 = vpack.c.bf16 %v3450_v27, %v3449_v0  ;;  %v4277_v63 = vmax.f32 %v3835_v57, 0.0  ;;  %3076 = vmatmul.bf16.gmra.mxu2 %v2688_v30 }
 0x598   : > { %v2237_v34 = vpop.f32.mrf.mxu1  ;;  %v4637_v62 = vpop.f32.mrf.mxu0 }
 0x599   : > { %v4638_v20 = vadd.f32 %v6823_v35, %v4637_v62  ;;  %3876 = vmatmul.bf16.gmra.mxu3 %v3524_v45  ;;  %v4360_v50 = vpack.c.bf16 %v4277_v63, %v4276_v1  ;;  %v2238_v5 = vadd.f32 %v6793_v61, %v2237_v34 }
 0x59a   : > { %v3037_v51 = vpop.f32.mrf.mxu2 }
 0x59b   : > { %4850 = vst.msk [vmem:[%s6324_s30 + $0x240] sm:$0xff] %vm4777_vm1, %v4638_v20  ;;  %4676 = vmatmul.bf16.gmra.mxu0 %v4360_v50  ;;  %v3038_v14 = vadd.f32 %v6886_v31, %v3037_v51  ;;  %v2624_v48 = vmax.f32 %v2238_v5, 0.0 }
 0x59c   : > { %v3837_v28 = vpop.f32.mrf.mxu3 }
 0x59d   : > { %v3838_v38 = vadd.f32 %v6732_v26, %v3837_v28  ;;  %v3451_v9 = vmax.f32 %v3038_v14, 0.0 }
 0x59f   : > { %v4278_v29 = vmax.f32 %v3838_v38, 0.0 }
 0x5a0   : > { %v2239_v39 = vpop.f32.mrf.mxu1  ;;  %v4639_v8 = vpop.f32.mrf.mxu0 }
 0x5a1   : > { %v2240_v40 = vadd.f32 %v6793_v61, %v2239_v39  ;;  %v4640_v46 = vadd.f32 %v6823_v35, %v4639_v8 }
 0x5a2   : > { %v3039_v43 = vpop.f32.mrf.mxu2 }
 0x5a3   : > { %v2625_v36 = vmax.f32 %v2240_v40, 0.0  ;;  %4851 = vst.msk [vmem:[%s6324_s30 + $0x248] sm:$0xff] %vm4777_vm1, %v4640_v46  ;;  %v3040_v15 = vadd.f32 %v6886_v31, %v3039_v43 }
 0x5a4   : > { %v3839_v7 = vpop.f32.mrf.mxu3 }
 0x5a5   : > { %v2689_v37 = vpack.c.bf16 %v2625_v36, %v2624_v48  ;;  %v3452_v44 = vmax.f32 %v3040_v15, 0.0  ;;  %v3840_v24 = vadd.f32 %v6732_v26, %v3839_v7 }
 0x5a7   : > { %v3525_v61 = vpack.c.bf16 %v3452_v44, %v3451_v9  ;;  %v4279_v4 = vmax.f32 %v3840_v24, 0.0  ;;  %3081 = vmatmul.bf16.gmra.mxu2 %v2689_v37 }
 0x5a8   : > { %v4642_v55 = vpop.f32.mrf.mxu0 }
 0x5a9   : > { %v4643_v49 = vadd.f32 %v6823_v35, %v4642_v55  ;;  %3881 = vmatmul.bf16.gmra.mxu3 %v3525_v61  ;;  %v4361_v59 = vpack.c.bf16 %v4279_v4, %v4278_v29 }
 0x5aa   : > { %v3042_v10 = vpop.f32.mrf.mxu2 }
 0x5ab   : > { %4852 = vst.msk [vmem:[%s6324_s30 + $0x250] sm:$0xff] %vm4777_vm1, %v4643_v49  ;;  %4681 = vmatmul.bf16.gmra.mxu0 %v4361_v59  ;;  %v3043_v42 = vadd.f32 %v6886_v31, %v3042_v10 }
 0x5ac   : > { %v3842_v53 = vpop.f32.mrf.mxu3 }
 0x5ad   : > { %v3843_v54 = vadd.f32 %v6732_v26, %v3842_v53  ;;  %v3453_v19 = vmax.f32 %v3043_v42, 0.0 }
 0x5af   : > { %v4280_v2 = vmax.f32 %v3843_v54, 0.0 }
 0x5b0   : > { %v4644_v52 = vpop.f32.mrf.mxu0 }
 0x5b1   : > { %v4645_v60 = vadd.f32 %v6823_v35, %v4644_v52 }
 0x5b2   : > { %v3044_v12 = vpop.f32.mrf.mxu2 }
 0x5b3   : > { %4853 = vst.msk [vmem:[%s6324_s30 + $0x258] sm:$0xff] %vm4777_vm1, %v4645_v60  ;;  %v3045_v3 = vadd.f32 %v6886_v31, %v3044_v12  ;;  %v6968_v60 = vld [vmem:[%s7163_s8] ss:$0 sm:$0xff] }
 0x5b4   : > { %v3844_v23 = vpop.f32.mrf.mxu3 }
 0x5b5   : > { %v3454_v6 = vmax.f32 %v3045_v3, 0.0  ;;  %v3845_v41 = vadd.f32 %v6732_v26, %v3844_v23 }
 0x5b7   : > { %v3526_v32 = vpack.c.bf16 %v3454_v6, %v3453_v19  ;;  %v4281_v18 = vmax.f32 %v3845_v41, 0.0 }
 0x5b8   : > { %v4647_v16 = vpop.f32.mrf.mxu0 }
 0x5b9   : > { %v4648_v22 = vadd.f32 %v6823_v35, %v4647_v16  ;;  %3886 = vmatmul.bf16.gmra.mxu3 %v3526_v32  ;;  %v4362_v58 = vpack.c.bf16 %v4281_v18, %v4280_v2 }
 0x5ba   : > { %v3047_v11 = vpop.f32.mrf.mxu2 }
 0x5bb   : > { %4854 = vst.msk [vmem:[%s6324_s30 + $0x260] sm:$0xff] %vm4777_vm1, %v4648_v22  ;;  %4686 = vmatmul.bf16.gmra.mxu0 %v4362_v58  ;;  %v3048_v47 = vadd.f32 %v6886_v31, %v3047_v11 }
 0x5bc   : > { %v3847_v21 = vpop.f32.mrf.mxu3 }
 0x5bd   : > { %v3848_v56 = vadd.f32 %v6732_v26, %v3847_v21  ;;  %v3455_v30 = vmax.f32 %v3048_v47, 0.0 }
 0x5bf   : > { %v4282_v1 = vmax.f32 %v3848_v56, 0.0 }
 0x5c0   : > { %v4649_v33 = vpop.f32.mrf.mxu0 }
 0x5c1   : > { %v4650_v17 = vadd.f32 %v6823_v35, %v4649_v33 }
 0x5c2   : > { %v3049_v13 = vpop.f32.mrf.mxu2 }
 0x5c3   : > { %4855 = vst.msk [vmem:[%s6324_s30 + $0x268] sm:$0xff] %vm4777_vm1, %v4650_v17  ;;  %v3050_v25 = vadd.f32 %v6886_v31, %v3049_v13 }
 0x5c4   : > { %v3849_v0 = vpop.f32.mrf.mxu3 }
 0x5c5   : > { %v3456_v27 = vmax.f32 %v3050_v25, 0.0  ;;  %v3850_v57 = vadd.f32 %v6732_v26, %v3849_v0 }
 0x5c7   : > { %v3527_v45 = vpack.c.bf16 %v3456_v27, %v3455_v30  ;;  %v4283_v63 = vmax.f32 %v3850_v57, 0.0 }
 0x5c8   : > { %v4652_v34 = vpop.f32.mrf.mxu0 }
 0x5c9   : > { %v4653_v62 = vadd.f32 %v6823_v35, %v4652_v34  ;;  %3891 = vmatmul.bf16.gmra.mxu3 %v3527_v45  ;;  %v4363_v20 = vpack.c.bf16 %v4283_v63, %v4282_v1 }
 0x5ca   : > { %v3052_v50 = vpop.f32.mrf.mxu2 }
 0x5cb   : > { %4856 = vst.msk [vmem:[%s6324_s30 + $0x270] sm:$0xff] %vm4777_vm1, %v4653_v62  ;;  %4691 = vmatmul.bf16.gmra.mxu0 %v4363_v20  ;;  %v3053_v5 = vadd.f32 %v6886_v31, %v3052_v50 }
 0x5cc   : > { %v3852_v51 = vpop.f32.mrf.mxu3 }
 0x5cd   : > { %v3853_v14 = vadd.f32 %v6732_v26, %v3852_v51  ;;  %v3457_v43 = vmax.f32 %v3053_v5, 0.0 }
 0x5cf   : > { %v4284_v36 = vmax.f32 %v3853_v14, 0.0 }
 0x5d0   : > { %v4654_v28 = vpop.f32.mrf.mxu0 }
 0x5d1   : > { %v4655_v39 = vadd.f32 %v6823_v35, %v4654_v28 }
 0x5d2   : > { %v3054_v8 = vpop.f32.mrf.mxu2 }
 0x5d3   : > { %4857 = vst.msk [vmem:[%s6324_s30 + $0x278] sm:$0xff] %vm4777_vm1, %v4655_v39  ;;  %v3055_v40 = vadd.f32 %v6886_v31, %v3054_v8 }
 0x5d4   : > { %v3854_v46 = vpop.f32.mrf.mxu3 }
 0x5d5   : > { %v3458_v48 = vmax.f32 %v3055_v40, 0.0  ;;  %v3855_v38 = vadd.f32 %v6732_v26, %v3854_v46 }
 0x5d7   : > { %v3528_v15 = vpack.c.bf16 %v3458_v48, %v3457_v43  ;;  %v4285_v7 = vmax.f32 %v3855_v38, 0.0 }
 0x5d8   : > { %v4657_v9 = vpop.f32.mrf.mxu0 }
 0x5d9   : > { %v4658_v37 = vadd.f32 %v6823_v35, %v4657_v9  ;;  %3896 = vmatmul.bf16.gmra.mxu3 %v3528_v15  ;;  %v4364_v44 = vpack.c.bf16 %v4285_v7, %v4284_v36 }
 0x5da   : > { %v3057_v24 = vpop.f32.mrf.mxu2 }
 0x5db   : > { %4858 = vst.msk [vmem:[%s6324_s30 + $0x280] sm:$0xff] %vm4777_vm1, %v4658_v37  ;;  %4696 = vmatmul.bf16.gmra.mxu0 %v4364_v44  ;;  %v3058_v4 = vadd.f32 %v6886_v31, %v3057_v24 }
 0x5dc   : > { %v3857_v29 = vpop.f32.mrf.mxu3 }
 0x5dd   : > { %v3858_v59 = vadd.f32 %v6732_v26, %v3857_v29  ;;  %v3459_v52 = vmax.f32 %v3058_v4, 0.0 }
 0x5df   : > { %v4286_v54 = vmax.f32 %v3858_v59, 0.0 }
 0x5e0   : > { %v4659_v61 = vpop.f32.mrf.mxu0 }
 0x5e1   : > { %v4660_v55 = vadd.f32 %v6823_v35, %v4659_v61 }
 0x5e2   : > { %v3059_v49 = vpop.f32.mrf.mxu2 }
 0x5e3   : > { %4859 = vst.msk [vmem:[%s6324_s30 + $0x288] sm:$0xff] %vm4777_vm1, %v4660_v55  ;;  %v3060_v10 = vadd.f32 %v6886_v31, %v3059_v49 }
 0x5e4   : > { %v3859_v53 = vpop.f32.mrf.mxu3 }
 0x5e5   : > { %v3460_v42 = vmax.f32 %v3060_v10, 0.0  ;;  %v3860_v12 = vadd.f32 %v6968_v60, %v3859_v53 }
 0x5e7   : > { %v3529_v3 = vpack.c.bf16 %v3460_v42, %v3459_v52  ;;  %v4287_v23 = vmax.f32 %v3860_v12, 0.0 }
 0x5e8   : > { %v4662_v26 = vpop.f32.mrf.mxu0 }
 0x5e9   : > { %v4663_v19 = vadd.f32 %v6823_v35, %v4662_v26  ;;  %3901 = vmatmul.bf16.gmra.mxu3 %v3529_v3  ;;  %v4365_v6 = vpack.c.bf16 %v4287_v23, %v4286_v54 }
 0x5ea   : > { %v3062_v41 = vpop.f32.mrf.mxu2 }
 0x5eb   : > { %4860 = vst.msk [vmem:[%s6324_s30 + $0x290] sm:$0xff] %vm4777_vm1, %v4663_v19  ;;  %4701 = vmatmul.bf16.gmra.mxu0 %v4365_v6  ;;  %v3063_v18 = vadd.f32 %v6886_v31, %v3062_v41 }
 0x5ec   : > { %v3862_v2 = vpop.f32.mrf.mxu3 }
 0x5ed   : > { %v3863_v58 = vadd.f32 %v6968_v60, %v3862_v2  ;;  %v3461_v33 = vmax.f32 %v3063_v18, 0.0 }
 0x5ef   : > { %v4288_v13 = vmax.f32 %v3863_v58, 0.0 }
 0x5f0   : > { %v4664_v32 = vpop.f32.mrf.mxu0 }
 0x5f1   : > { %v4665_v16 = vadd.f32 %v6823_v35, %v4664_v32 }
 0x5f2   : > { %v3064_v22 = vpop.f32.mrf.mxu2 }
 0x5f3   : > { %4861 = vst.msk [vmem:[%s6324_s30 + $0x298] sm:$0xff] %vm4777_vm1, %v4665_v16  ;;  %v3065_v11 = vadd.f32 %v6886_v31, %v3064_v22 }
 0x5f4   : > { %v3864_v21 = vpop.f32.mrf.mxu3 }
 0x5f5   : > { %v3462_v47 = vmax.f32 %v3065_v11, 0.0  ;;  %v3865_v17 = vadd.f32 %v6968_v60, %v3864_v21 }
 0x5f7   : > { %v3530_v56 = vpack.c.bf16 %v3462_v47, %v3461_v33  ;;  %v4289_v25 = vmax.f32 %v3865_v17, 0.0 }
 0x5f8   : > { %v4667_v0 = vpop.f32.mrf.mxu0 }
 0x5f9   : > { %v4668_v30 = vadd.f32 %v6823_v35, %v4667_v0  ;;  %3906 = vmatmul.bf16.gmra.mxu3 %v3530_v56  ;;  %v4366_v27 = vpack.c.bf16 %v4289_v25, %v4288_v13 }
 0x5fa   : > { %v3067_v57 = vpop.f32.mrf.mxu2 }
 0x5fb   : > { %4862 = vst.msk [vmem:[%s6324_s30 + $0x2a0] sm:$0xff] %vm4777_vm1, %v4668_v30  ;;  %4706 = vmatmul.bf16.gmra.mxu0 %v4366_v27  ;;  %v3068_v63 = vadd.f32 %v6886_v31, %v3067_v57 }
 0x5fc   : > { %v3867_v1 = vpop.f32.mrf.mxu3 }
 0x5fd   : > { %v3868_v20 = vadd.f32 %v6968_v60, %v3867_v1  ;;  %v3463_v28 = vmax.f32 %v3068_v63, 0.0 }
 0x5ff   : > { %v4290_v8 = vmax.f32 %v3868_v20, 0.0 }
 0x600   : > { %v4669_v45 = vpop.f32.mrf.mxu0 }
 0x601   : > { %v4670_v34 = vadd.f32 %v6823_v35, %v4669_v45 }
 0x602   : > { %v3069_v62 = vpop.f32.mrf.mxu2 }
 0x603   : > { %4863 = vst.msk [vmem:[%s6324_s30 + $0x2a8] sm:$0xff] %vm4777_vm1, %v4670_v34  ;;  %v3070_v50 = vadd.f32 %v6886_v31, %v3069_v62 }
 0x604   : > { %v3869_v51 = vpop.f32.mrf.mxu3 }
 0x605   : > { %v3464_v5 = vmax.f32 %v3070_v50, 0.0  ;;  %v3870_v39 = vadd.f32 %v6968_v60, %v3869_v51 }
 0x607   : > { %v3531_v14 = vpack.c.bf16 %v3464_v5, %v3463_v28  ;;  %v4291_v40 = vmax.f32 %v3870_v39, 0.0 }
 0x608   : > { %v4672_v46 = vpop.f32.mrf.mxu0 }
 0x609   : > { %v4673_v43 = vadd.f32 %v6823_v35, %v4672_v46  ;;  %3911 = vmatmul.bf16.gmra.mxu3 %v3531_v14  ;;  %v4367_v48 = vpack.c.bf16 %v4291_v40, %v4290_v8 }
 0x60a   : > { %v3072_v38 = vpop.f32.mrf.mxu2 }
 0x60b   : > { %4864 = vst.msk [vmem:[%s6324_s30 + $0x2b0] sm:$0xff] %vm4777_vm1, %v4673_v43  ;;  %4711 = vmatmul.bf16.gmra.mxu0 %v4367_v48  ;;  %v3073_v7 = vadd.f32 %v6886_v31, %v3072_v38 }
 0x60c   : > { %v3872_v36 = vpop.f32.mrf.mxu3 }
 0x60d   : > { %v3873_v44 = vadd.f32 %v6968_v60, %v3872_v36  ;;  %v3465_v61 = vmax.f32 %v3073_v7, 0.0 }
 0x60f   : > { %v4292_v49 = vmax.f32 %v3873_v44, 0.0 }
 0x610   : > { %v4674_v15 = vpop.f32.mrf.mxu0 }
 0x611   : > { %v4675_v9 = vadd.f32 %v6823_v35, %v4674_v15 }
 0x612   : > { %v3074_v37 = vpop.f32.mrf.mxu2 }
 0x613   : > { %4865 = vst.msk [vmem:[%s6324_s30 + $0x2b8] sm:$0xff] %vm4777_vm1, %v4675_v9  ;;  %v3075_v24 = vadd.f32 %v6886_v31, %v3074_v37 }
 0x614   : > { %v3874_v29 = vpop.f32.mrf.mxu3 }
 0x615   : > { %v3466_v4 = vmax.f32 %v3075_v24, 0.0  ;;  %v3875_v55 = vadd.f32 %v6968_v60, %v3874_v29 }
 0x617   : > { %v3532_v59 = vpack.c.bf16 %v3466_v4, %v3465_v61  ;;  %v4293_v10 = vmax.f32 %v3875_v55, 0.0 }
 0x618   : > { %v4677_v53 = vpop.f32.mrf.mxu0 }
 0x619   : > { %v4678_v52 = vadd.f32 %v6823_v35, %v4677_v53  ;;  %3916 = vmatmul.bf16.gmra.mxu3 %v3532_v59  ;;  %v4368_v42 = vpack.c.bf16 %v4293_v10, %v4292_v49 }
 0x61a   : > { %v3077_v12 = vpop.f32.mrf.mxu2 }
 0x61b   : > { %4866 = vst.msk [vmem:[%s6324_s30 + $0x2c0] sm:$0xff] %vm4777_vm1, %v4678_v52  ;;  %4716 = vmatmul.bf16.gmra.mxu0 %v4368_v42  ;;  %v3078_v23 = vadd.f32 %v6886_v31, %v3077_v12 }
 0x61c   : > { %v3877_v54 = vpop.f32.mrf.mxu3 }
 0x61d   : > { %v3878_v6 = vadd.f32 %v6968_v60, %v3877_v54  ;;  %v3467_v32 = vmax.f32 %v3078_v23, 0.0 }
 0x61f   : > { %v4294_v22 = vmax.f32 %v3878_v6, 0.0 }
 0x620   : > { %v4679_v3 = vpop.f32.mrf.mxu0 }
 0x621   : > { %v4680_v26 = vadd.f32 %v6823_v35, %v4679_v3 }
 0x622   : > { %v3079_v19 = vpop.f32.mrf.mxu2 }
 0x623   : > { %4867 = vst.msk [vmem:[%s6324_s30 + $0x2c8] sm:$0xff] %vm4777_vm1, %v4680_v26  ;;  %v3080_v41 = vadd.f32 %v6886_v31, %v3079_v19 }
 0x624   : > { %v3879_v2 = vpop.f32.mrf.mxu3 }
 0x625   : > { %v3468_v18 = vmax.f32 %v3080_v41, 0.0  ;;  %v3880_v16 = vadd.f32 %v6968_v60, %v3879_v2 }
 0x627   : > { %v3533_v58 = vpack.c.bf16 %v3468_v18, %v3467_v32  ;;  %v4295_v11 = vmax.f32 %v3880_v16, 0.0 }
 0x628   : > { %v4682_v21 = vpop.f32.mrf.mxu0 }
 0x629   : > { %v4369_v33 = vpack.c.bf16 %v4295_v11, %v4294_v22  ;;  %v4683_v47 = vadd.f32 %v6823_v35, %v4682_v21  ;;  %3921 = vmatmul.bf16.gmra.mxu3 %v3533_v58 }
 0x62a   : > { %v3082_v17 = vpop.f32.mrf.mxu2 }
 0x62b   : > { %4868 = vst.msk [vmem:[%s6324_s30 + $0x2d0] sm:$0xff] %vm4777_vm1, %v4683_v47  ;;  %4721 = vmatmul.bf16.gmra.mxu0 %v4369_v33  ;;  %v3083_v25 = vadd.f32 %v6886_v31, %v3082_v17 }
 0x62c   : > { %v3882_v13 = vpop.f32.mrf.mxu3 }
 0x62d   : > { %v3883_v27 = vadd.f32 %v6968_v60, %v3882_v13  ;;  %v3469_v45 = vmax.f32 %v3083_v25, 0.0 }
 0x62f   : > { %v4296_v62 = vmax.f32 %v3883_v27, 0.0 }
 0x630   : > { %v4684_v56 = vpop.f32.mrf.mxu0 }
 0x631   : > { %v4685_v0 = vadd.f32 %v6823_v35, %v4684_v56 }
 0x632   : > { %v3084_v30 = vpop.f32.mrf.mxu2 }
 0x633   : > { %4869 = vst.msk [vmem:[%s6324_s30 + $0x2d8] sm:$0xff] %vm4777_vm1, %v4685_v0  ;;  %v3085_v57 = vadd.f32 %v6886_v31, %v3084_v30 }
 0x634   : > { %v3884_v1 = vpop.f32.mrf.mxu3 }
 0x635   : > { %v3470_v63 = vmax.f32 %v3085_v57, 0.0  ;;  %v3885_v34 = vadd.f32 %v6968_v60, %v3884_v1 }
 0x637   : > { %v3534_v20 = vpack.c.bf16 %v3470_v63, %v3469_v45  ;;  %v4297_v50 = vmax.f32 %v3885_v34, 0.0 }
 0x638   : > { %v4687_v51 = vpop.f32.mrf.mxu0 }
 0x639   : > { %v4370_v28 = vpack.c.bf16 %v4297_v50, %v4296_v62  ;;  %v4688_v5 = vadd.f32 %v6823_v35, %v4687_v51  ;;  %3926 = vmatmul.bf16.gmra.mxu3 %v3534_v20  ;;  %v7067_v20 = vld [vmem:[%s7165_s10] ss:$0 sm:$0xff] }
 0x63b   : > { %4870 = vst.msk [vmem:[%s6324_s30 + $0x2e0] sm:$0xff] %vm4777_vm1, %v4688_v5  ;;  %4726 = vmatmul.bf16.gmra.mxu0 %v4370_v28 }
 0x63c   : > { %v3887_v39 = vpop.f32.mrf.mxu3 }
 0x63d   : > { %v3888_v14 = vadd.f32 %v6968_v60, %v3887_v39 }
 0x63f   : > { %v4298_v43 = vmax.f32 %v3888_v14, 0.0 }
 0x640   : > { %v4689_v31 = vpop.f32.mrf.mxu0 }
 0x641   : > { %v4690_v8 = vadd.f32 %v6823_v35, %v4689_v31 }
 0x643   : > { %4871 = vst.msk [vmem:[%s6324_s30 + $0x2e8] sm:$0xff] %vm4777_vm1, %v4690_v8 }
 0x644   : > { %v3889_v40 = vpop.f32.mrf.mxu3 }
 0x645   : > { %v3890_v46 = vadd.f32 %v6968_v60, %v3889_v40 }
 0x647   : > { %v4299_v48 = vmax.f32 %v3890_v46, 0.0 }
 0x648   : > { %v4692_v38 = vpop.f32.mrf.mxu0 }
 0x649   : > { %v4371_v36 = vpack.c.bf16 %v4299_v48, %v4298_v43  ;;  %v4693_v15 = vadd.f32 %v6823_v35, %v4692_v38 }
 0x64b   : > { %4872 = vst.msk [vmem:[%s6324_s30 + $0x2f0] sm:$0xff] %vm4777_vm1, %v4693_v15  ;;  %4731 = vmatmul.bf16.gmra.mxu0 %v4371_v36 }
 0x64c   : > { %v3892_v7 = vpop.f32.mrf.mxu3 }
 0x64d   : > { %v3893_v44 = vadd.f32 %v6968_v60, %v3892_v7 }
 0x64f   : > { %v4300_v61 = vmax.f32 %v3893_v44, 0.0 }
 0x650   : > { %v4694_v9 = vpop.f32.mrf.mxu0 }
 0x651   : > { %v4695_v37 = vadd.f32 %v6823_v35, %v4694_v9 }
 0x653   : > { %4873 = vst.msk [vmem:[%s6324_s30 + $0x2f8] sm:$0xff] %vm4777_vm1, %v4695_v37 }
 0x654   : > { %v3894_v24 = vpop.f32.mrf.mxu3 }
 0x655   : > { %v3895_v29 = vadd.f32 %v6968_v60, %v3894_v24 }
 0x657   : > { %v4301_v4 = vmax.f32 %v3895_v29, 0.0 }
 0x658   : > { %v4697_v55 = vpop.f32.mrf.mxu0 }
 0x659   : > { %v4372_v49 = vpack.c.bf16 %v4301_v4, %v4300_v61  ;;  %v4698_v59 = vadd.f32 %v6823_v35, %v4697_v55 }
 0x65b   : > { %4874 = vst.msk [vmem:[%s6324_s30 + $0x300] sm:$0xff] %vm4777_vm1, %v4698_v59  ;;  %4736 = vmatmul.bf16.gmra.mxu0 %v4372_v49 }
 0x65c   : > { %v3897_v10 = vpop.f32.mrf.mxu3 }
 0x65d   : > { %v3898_v42 = vadd.f32 %v6968_v60, %v3897_v10 }
 0x65f   : > { %v4302_v3 = vmax.f32 %v3898_v42, 0.0 }
 0x660   : > { %v4699_v53 = vpop.f32.mrf.mxu0 }
 0x661   : > { %v4700_v52 = vadd.f32 %v6823_v35, %v4699_v53 }
 0x663   : > { %4875 = vst.msk [vmem:[%s6324_s30 + $0x308] sm:$0xff] %vm4777_vm1, %v4700_v52 }
 0x664   : > { %v3899_v12 = vpop.f32.mrf.mxu3 }
 0x665   : > { %v3900_v54 = vadd.f32 %v6968_v60, %v3899_v12 }
 0x667   : > { %v4303_v23 = vmax.f32 %v3900_v54, 0.0 }
 0x668   : > { %v4702_v26 = vpop.f32.mrf.mxu0 }
 0x669   : > { %v4373_v19 = vpack.c.bf16 %v4303_v23, %v4302_v3  ;;  %v4703_v6 = vadd.f32 %v6823_v35, %v4702_v26 }
 0x66b   : > { %4876 = vst.msk [vmem:[%s6324_s30 + $0x310] sm:$0xff] %vm4777_vm1, %v4703_v6  ;;  %4741 = vmatmul.bf16.gmra.mxu0 %v4373_v19 }
 0x66c   : > { %v3902_v41 = vpop.f32.mrf.mxu3 }
 0x66d   : > { %v3903_v18 = vadd.f32 %v6968_v60, %v3902_v41 }
 0x66f   : > { %v4304_v58 = vmax.f32 %v3903_v18, 0.0 }
 0x670   : > { %v4704_v2 = vpop.f32.mrf.mxu0 }
 0x671   : > { %v4705_v32 = vadd.f32 %v6823_v35, %v4704_v2 }
 0x673   : > { %4877 = vst.msk [vmem:[%s6324_s30 + $0x318] sm:$0xff] %vm4777_vm1, %v4705_v32 }
 0x674   : > { %v3904_v16 = vpop.f32.mrf.mxu3 }
 0x675   : > { %v3905_v22 = vadd.f32 %v6968_v60, %v3904_v16 }
 0x677   : > { %v4305_v11 = vmax.f32 %v3905_v22, 0.0 }
 0x678   : > { %v4707_v21 = vpop.f32.mrf.mxu0 }
 0x679   : > { %v4374_v33 = vpack.c.bf16 %v4305_v11, %v4304_v58  ;;  %v4708_v47 = vadd.f32 %v6823_v35, %v4707_v21 }
 0x67b   : > { %4878 = vst.msk [vmem:[%s6324_s30 + $0x320] sm:$0xff] %vm4777_vm1, %v4708_v47  ;;  %4746 = vmatmul.bf16.gmra.mxu0 %v4374_v33 }
 0x67c   : > { %v3907_v17 = vpop.f32.mrf.mxu3 }
 0x67d   : > { %v3908_v25 = vadd.f32 %v6968_v60, %v3907_v17 }
 0x67f   : > { %v4306_v27 = vmax.f32 %v3908_v25, 0.0 }
 0x680   : > { %v4709_v13 = vpop.f32.mrf.mxu0 }
 0x681   : > { %v4710_v56 = vadd.f32 %v6823_v35, %v4709_v13 }
 0x683   : > { %4879 = vst.msk [vmem:[%s6324_s30 + $0x328] sm:$0xff] %vm4777_vm1, %v4710_v56 }
 0x684   : > { %v3909_v0 = vpop.f32.mrf.mxu3 }
 0x685   : > { %v3910_v30 = vadd.f32 %v6968_v60, %v3909_v0 }
 0x687   : > { %v4307_v57 = vmax.f32 %v3910_v30, 0.0 }
 0x688   : > { %v4712_v1 = vpop.f32.mrf.mxu0 }
 0x689   : > { %v4375_v45 = vpack.c.bf16 %v4307_v57, %v4306_v27  ;;  %v4713_v63 = vadd.f32 %v6823_v35, %v4712_v1 }
 0x68b   : > { %4880 = vst.msk [vmem:[%s6324_s30 + $0x330] sm:$0xff] %vm4777_vm1, %v4713_v63  ;;  %4751 = vmatmul.bf16.gmra.mxu0 %v4375_v45 }
 0x68c   : > { %v3912_v34 = vpop.f32.mrf.mxu3 }
 0x68d   : > { %v3913_v51 = vadd.f32 %v6968_v60, %v3912_v34 }
 0x68f   : > { %v4308_v5 = vmax.f32 %v3913_v51, 0.0 }
 0x690   : > { %v4714_v62 = vpop.f32.mrf.mxu0 }
 0x691   : > { %v4715_v50 = vadd.f32 %v7067_v20, %v4714_v62 }
 0x693   : > { %4881 = vst.msk [vmem:[%s6324_s30 + $0x338] sm:$0xff] %vm4777_vm1, %v4715_v50 }
 0x694   : > { %v3914_v28 = vpop.f32.mrf.mxu3 }
 0x695   : > { %v3915_v35 = vadd.f32 %v6968_v60, %v3914_v28 }
 0x697   : > { %v4309_v39 = vmax.f32 %v3915_v35, 0.0 }
 0x698   : > { %v4717_v31 = vpop.f32.mrf.mxu0 }
 0x699   : > { %v4376_v8 = vpack.c.bf16 %v4309_v39, %v4308_v5  ;;  %v4718_v14 = vadd.f32 %v7067_v20, %v4717_v31 }
 0x69b   : > { %4882 = vst.msk [vmem:[%s6324_s30 + $0x340] sm:$0xff] %vm4777_vm1, %v4718_v14  ;;  %4756 = vmatmul.bf16.gmra.mxu0 %v4376_v8 }
 0x69c   : > { %v3917_v40 = vpop.f32.mrf.mxu3 }
 0x69d   : > { %v3918_v48 = vadd.f32 %v6968_v60, %v3917_v40 }
 0x69f   : > { %v4310_v15 = vmax.f32 %v3918_v48, 0.0 }
 0x6a0   : > { %v4719_v46 = vpop.f32.mrf.mxu0 }
 0x6a1   : > { %v4720_v43 = vadd.f32 %v7067_v20, %v4719_v46 }
 0x6a3   : > { %4883 = vst.msk [vmem:[%s6324_s30 + $0x348] sm:$0xff] %vm4777_vm1, %v4720_v43 }
 0x6a4   : > { %v3919_v38 = vpop.f32.mrf.mxu3 }
 0x6a5   : > { %v3920_v36 = vadd.f32 %v6968_v60, %v3919_v38 }
 0x6a7   : > { %v4311_v7 = vmax.f32 %v3920_v36, 0.0 }
 0x6a8   : > { %v4722_v9 = vpop.f32.mrf.mxu0 }
 0x6a9   : > { %v4377_v37 = vpack.c.bf16 %v4311_v7, %v4310_v15  ;;  %v4723_v44 = vadd.f32 %v7067_v20, %v4722_v9 }
 0x6ab   : > { %4884 = vst.msk [vmem:[%s6324_s30 + $0x350] sm:$0xff] %vm4777_vm1, %v4723_v44  ;;  %4761 = vmatmul.bf16.gmra.mxu0 %v4377_v37 }
 0x6ac   : > { %v3922_v24 = vpop.f32.mrf.mxu3 }
 0x6ad   : > { %v3923_v4 = vadd.f32 %v6968_v60, %v3922_v24 }
 0x6af   : > { %v4312_v59 = vmax.f32 %v3923_v4, 0.0 }
 0x6b0   : > { %v4724_v29 = vpop.f32.mrf.mxu0 }
 0x6b1   : > { %v4725_v61 = vadd.f32 %v7067_v20, %v4724_v29 }
 0x6b3   : > { %4885 = vst.msk [vmem:[%s6324_s30 + $0x358] sm:$0xff] %vm4777_vm1, %v4725_v61 }
 0x6b4   : > { %v3924_v55 = vpop.f32.mrf.mxu3 }
 0x6b5   : > { %v3925_v49 = vadd.f32 %v6968_v60, %v3924_v55 }
 0x6b7   : > { %v4313_v10 = vmax.f32 %v3925_v49, 0.0 }
 0x6b8   : > { %v4727_v53 = vpop.f32.mrf.mxu0 }
 0x6b9   : > { %v4378_v52 = vpack.c.bf16 %v4313_v10, %v4312_v59  ;;  %v4728_v42 = vadd.f32 %v7067_v20, %v4727_v53 }
 0x6bb   : > { %4886 = vst.msk [vmem:[%s6324_s30 + $0x360] sm:$0xff] %vm4777_vm1, %v4728_v42  ;;  %4766 = vmatmul.bf16.gmra.mxu0 %v4378_v52 }
 0x6bc   : > { %v3927_v12 = vpop.f32.mrf.mxu3 }
 0x6bd   : > { %v3928_v23 = vadd.f32 %v6968_v60, %v3927_v12 }
 0x6bf   : > { %v4314_v6 = vmax.f32 %v3928_v23, 0.0 }
 0x6c0   : > { %v4729_v54 = vpop.f32.mrf.mxu0 }
 0x6c1   : > { %v4730_v3 = vadd.f32 %v7067_v20, %v4729_v54 }
 0x6c3   : > { %4887 = vst.msk [vmem:[%s6324_s30 + $0x368] sm:$0xff] %vm4777_vm1, %v4730_v3 }
 0x6c4   : > { %v3929_v26 = vpop.f32.mrf.mxu3 }
 0x6c5   : > { %v3930_v19 = vadd.f32 %v6968_v60, %v3929_v26 }
 0x6c7   : > { %v4315_v41 = vmax.f32 %v3930_v19, 0.0 }
 0x6c8   : > { %v4732_v2 = vpop.f32.mrf.mxu0 }
 0x6c9   : > { %v4379_v32 = vpack.c.bf16 %v4315_v41, %v4314_v6  ;;  %v4733_v18 = vadd.f32 %v7067_v20, %v4732_v2 }
 0x6cb   : > { %4888 = vst.msk [vmem:[%s6324_s30 + $0x370] sm:$0xff] %vm4777_vm1, %v4733_v18  ;;  %4771 = vmatmul.bf16.vlgmr.msra.gmra.mxu3 %v4379_v32 }
 0x6d0   : > { %v4734_v16 = vpop.f32.mrf.mxu0 }
 0x6d1   : > { %v4735_v22 = vadd.f32 %v7067_v20, %v4734_v16 }
 0x6d3   : > { %4889 = vst.msk [vmem:[%s6324_s30 + $0x378] sm:$0xff] %vm4777_vm1, %v4735_v22 }
 0x6d8   : > { %v4737_v58 = vpop.f32.mrf.mxu0 }
 0x6d9   : > { %v4738_v60 = vadd.f32 %v7067_v20, %v4737_v58 }
 0x6db   : > { %4890 = vst.msk [vmem:[%s6324_s30 + $0x380] sm:$0xff] %vm4777_vm1, %v4738_v60 }
 0x6e0   : > { %v4739_v11 = vpop.f32.mrf.mxu0 }
 0x6e1   : > { %v4740_v21 = vadd.f32 %v7067_v20, %v4739_v11 }
 0x6e3   : > { %4891 = vst.msk [vmem:[%s6324_s30 + $0x388] sm:$0xff] %vm4777_vm1, %v4740_v21 }
 0x6e8   : > { %v4742_v33 = vpop.f32.mrf.mxu0 }
 0x6e9   : > { %v4743_v47 = vadd.f32 %v7067_v20, %v4742_v33 }
 0x6eb   : > { %4892 = vst.msk [vmem:[%s6324_s30 + $0x390] sm:$0xff] %vm4777_vm1, %v4743_v47 }
 0x6f0   : > { %v4744_v17 = vpop.f32.mrf.mxu0 }
 0x6f1   : > { %v4745_v13 = vadd.f32 %v7067_v20, %v4744_v17 }
 0x6f3   : > { %4893 = vst.msk [vmem:[%s6324_s30 + $0x398] sm:$0xff] %vm4777_vm1, %v4745_v13 }
 0x6f8   : > { %v4747_v56 = vpop.f32.mrf.mxu0 }
 0x6f9   : > { %v4748_v25 = vadd.f32 %v7067_v20, %v4747_v56 }
 0x6fb   : > { %4894 = vst.msk [vmem:[%s6324_s30 + $0x3a0] sm:$0xff] %vm4777_vm1, %v4748_v25 }
 0x700   : > { %v4749_v0 = vpop.f32.mrf.mxu0 }
 0x701   : > { %v4750_v30 = vadd.f32 %v7067_v20, %v4749_v0 }
 0x703   : > { %4895 = vst.msk [vmem:[%s6324_s30 + $0x3a8] sm:$0xff] %vm4777_vm1, %v4750_v30 }
 0x708   : > { %v4752_v27 = vpop.f32.mrf.mxu0 }
 0x709   : > { %v4753_v57 = vadd.f32 %v7067_v20, %v4752_v27 }
 0x70b   : > { %4896 = vst.msk [vmem:[%s6324_s30 + $0x3b0] sm:$0xff] %vm4777_vm1, %v4753_v57 }
 0x710   : > { %v4754_v1 = vpop.f32.mrf.mxu0 }
 0x711   : > { %v4755_v45 = vadd.f32 %v7067_v20, %v4754_v1 }
 0x713   : > { %4897 = vst.msk [vmem:[%s6324_s30 + $0x3b8] sm:$0xff] %vm4777_vm1, %v4755_v45 }
 0x718   : > { %v4757_v63 = vpop.f32.mrf.mxu0 }
 0x719   : > { %v4758_v34 = vadd.f32 %v7067_v20, %v4757_v63 }
 0x71b   : > { %4898 = vst.msk [vmem:[%s6324_s30 + $0x3c0] sm:$0xff] %vm4777_vm1, %v4758_v34 }
 0x720   : > { %v4759_v62 = vpop.f32.mrf.mxu0 }
 0x721   : > { %v4760_v50 = vadd.f32 %v7067_v20, %v4759_v62 }
 0x723   : > { %4899 = vst.msk [vmem:[%s6324_s30 + $0x3c8] sm:$0xff] %vm4777_vm1, %v4760_v50 }
 0x728   : > { %v4762_v51 = vpop.f32.mrf.mxu0 }
 0x729   : > { %v4763_v28 = vadd.f32 %v7067_v20, %v4762_v51 }
 0x72b   : > { %4900 = vst.msk [vmem:[%s6324_s30 + $0x3d0] sm:$0xff] %vm4777_vm1, %v4763_v28 }
 0x730   : > { %v4764_v35 = vpop.f32.mrf.mxu0 }
 0x731   : > { %v4765_v5 = vadd.f32 %v7067_v20, %v4764_v35 }
 0x733   : > { %4901 = vst.msk [vmem:[%s6324_s30 + $0x3d8] sm:$0xff] %vm4777_vm1, %v4765_v5 }
 0x738   : > { %v4767_v39 = vpop.f32.mrf.mxu0 }
 0x739   : > { %v4768_v31 = vadd.f32 %v7067_v20, %v4767_v39 }
 0x73b   : > { %4902 = vst.msk [vmem:[%s6324_s30 + $0x3e0] sm:$0xff] %vm4777_vm1, %v4768_v31 }
 0x740   : > { %v4769_v8 = vpop.f32.mrf.mxu0 }
 0x741   : > { %v4770_v14 = vadd.f32 %v7067_v20, %v4769_v8 }
 0x743   : > { %4903 = vst.msk [vmem:[%s6324_s30 + $0x3e8] sm:$0xff] %vm4777_vm1, %v4770_v14 }
 0x74e   : > { %v4772_v40 = vpop.f32.mrf.mxu3 }
 0x74f   : > { %v4773_v46 = vadd.f32 %v7067_v20, %v4772_v40 }
 0x751   : > { %4904 = vst.msk [vmem:[%s6324_s30 + $0x3f0] sm:$0xff] %vm4777_vm1, %v4773_v46 }
 0x756   : > { %v4774_v43 = vpop.f32.mrf.mxu3 }
 0x757   : > { %v4775_v48 = vadd.f32 %v7067_v20, %v4774_v43 }
 0x759   : > { %4905 = vst.msk [vmem:[%s6324_s30 + $0x3f8] sm:$0xff] %vm4777_vm1, %v4775_v48 }
 0x75a PF: > { %s21_s17 = sadd.s32 1, %s5591_s17  }
 0x75b   : > { %p18_p4 = scmp.ge.s32.totalorder %s21_s17, 4  }
 0x75d   :  { %20 = sbr.rel (!%p18_p4) target bundleno = 1 (0x1), region = 94 }

</bundles_post_ra>
